<compile_context>
chip_gen: v7x
topology: tpu7x:2x2x1
jax: 0.10.0
libtpu: 0.0.40
codegen_flags: <defaults>
</compile_context>

<pallas_src>
import functools

import jax
import jax.numpy as jnp
from jax.experimental import pallas as pl
from jax.experimental.pallas import tpu as pltpu


def _round_up(n, m):
    return ((n + m - 1) // m) * m


def _vib_i_kernel(x_ref,
                  wfc_ref, bfc_ref,
                  w1_ref, s1_ref, t1_ref,
                  w2_ref, s2_ref, t2_ref,
                  w3_ref, b3_ref,
                  v_ref, z_ref):
    cdt = wfc_ref.dtype                      # MXU compute dtype (bf16)
    x = x_ref[...].astype(cdt)               # in-kernel cast (VPU filler)

    # fc: v = x @ Wfc_t + bfc      (Wfc_t pre-transposed to (in, out))
    v = jnp.dot(x, wfc_ref[...], preferred_element_type=jnp.float32) + bfc_ref[...]
    v_ref[...] = v.astype(v_ref.dtype)

    # bottleneck L1: Linear(512, 1024p) + BN1d (eval, folded) + ReLU
    h1 = jnp.dot(v.astype(cdt), w1_ref[...], preferred_element_type=jnp.float32)
    h1 = jnp.maximum(h1 * s1_ref[...] + t1_ref[...], 0.0)

    # bottleneck L2: Linear(1024p, 512p) + BN1d (eval, folded) + ReLU
    h2 = jnp.dot(h1.astype(cdt), w2_ref[...], preferred_element_type=jnp.float32)
    h2 = jnp.maximum(h2 * s2_ref[...] + t2_ref[...], 0.0)

    # bottleneck L3: Linear(512p, 512)
    z = jnp.dot(h2.astype(cdt), w3_ref[...], preferred_element_type=jnp.float32) + b3_ref[...]
    z_ref[...] = z.astype(z_ref.dtype)


def vib_i_forward(v_in, params, *, tm=512, bn_eps=1e-5,
                  compute_dtype=jnp.bfloat16, out_dtype=None):
    """VIB_I.forward: returns (v, z_given_v). v_in: (..., 512)."""
    f32 = jnp.float32

    wfc = params["fc_w"].astype(f32);  bfc = params["fc_b"].astype(f32)
    w1 = params["b1_w"].astype(f32);   b1 = params["b1_b"].astype(f32)
    g1 = params["bn1_g"].astype(f32);  be1 = params["bn1_b"].astype(f32)
    m1 = params["bn1_m"].astype(f32);  va1 = params["bn1_v"].astype(f32)
    w2 = params["b2_w"].astype(f32);   b2 = params["b2_b"].astype(f32)
    g2 = params["bn2_g"].astype(f32);  be2 = params["bn2_b"].astype(f32)
    m2 = params["bn2_m"].astype(f32);  va2 = params["bn2_v"].astype(f32)
    w3 = params["b3_w"].astype(f32);   b3 = params["b3_b"].astype(f32)

    # Fold BatchNorm1d (eval mode) + preceding linear bias into scale/shift (f32).
    s1 = g1 / jnp.sqrt(va1 + bn_eps); t1 = (b1 - m1) * s1 + be1
    s2 = g2 / jnp.sqrt(va2 + bn_eps); t2 = (b2 - m2) * s2 + be2

    K, n_fc = wfc.shape[1], wfc.shape[0]
    n1, n2, n3 = w1.shape[0], w2.shape[0], w3.shape[0]

    # Zero-pad hidden dims to lane/MXU-friendly multiples of 128 (1000->1024, 500->512).
    n1p = _round_up(n1, 128)
    n2p = _round_up(n2, 128)

    cdt = compute_dtype
    # Pre-transpose once to (in, out) and cast to bf16 so the kernel never transposes.
    wfc_t = wfc.T.astype(cdt)                                              # (K, n_fc)
    w1_t = jnp.pad(w1.T, ((0, 0), (0, n1p - n1))).astype(cdt)             # (n_fc, n1p)
    w2_t = jnp.pad(w2.T, ((0, n1p - n1), (0, n2p - n2))).astype(cdt)      # (n1p, n2p)
    w3_t = jnp.pad(w3.T, ((0, n2p - n2), (0, 0))).astype(cdt)             # (n2p, n3)
    # Zero-padded scale/shift => padded lanes of h1/h2 are exactly 0 after ReLU.
    s1p = jnp.pad(s1, (0, n1p - n1)); t1p = jnp.pad(t1, (0, n1p - n1))
    s2p = jnp.pad(s2, (0, n2p - n2)); t2p = jnp.pad(t2, (0, n2p - n2))

    orig_shape = v_in.shape
    assert orig_shape[-1] == K
    out_dt = jnp.dtype(out_dtype) if out_dtype is not None else v_in.dtype

    # No wrapper dtype cast: pass x through in its native dtype.
    x2 = v_in.reshape(-1, K)
    M = x2.shape[0]

    # Row tiling: multiple of 8 sublanes; pad ragged M; ensure >= 2 grid steps when
    # there is enough work (keeps both TensorCores busy on v7x megacore).
    tm = max(8, (int(tm) // 8) * 8)
    m8 = _round_up(M, 8)
    tm_eff = min(tm, m8)
    if m8 >= 16 and -(-m8 // tm_eff) < 2:
        tm_eff = _round_up(-(-m8 // 2), 8)
    Mp = _round_up(M, tm_eff)
    if Mp != M:
        x2 = jnp.pad(x2, ((0, Mp - M), (0, 0)))

    # Explicit VMEM budget: single-buffered weights + double-buffered I/O tiles + temps.
    cbytes = jnp.dtype(cdt).itemsize
    xbytes = jnp.dtype(x2.dtype).itemsize
    obytes = jnp.dtype(out_dt).itemsize
    w_bytes = cbytes * (K * n_fc + n_fc * n1p + n1p * n2p + n2p * n3)
    io_bytes = 2 * tm_eff * (K * xbytes + (n_fc + n3) * obytes)
    tmp_bytes = tm_eff * (n_fc + n1p + n2p) * (4 + cbytes)
    vmem_limit = int(1.4 * (w_bytes + io_bytes + tmp_bytes)) + (6 << 20)
    vmem_limit = max(32 << 20, min(vmem_limit, 56 << 20))

    row = lambda a: a.astype(f32).reshape(1, -1)
    # Constant block index + single buffer -> weights stay resident in VMEM.
    resident = lambda shape: pl.BlockSpec(shape, lambda i: (0, 0),
                                          pipeline_mode=pl.Buffered(1))

    v_out, z_out = pl.pallas_call(
        _vib_i_kernel,
        out_shape=(jax.ShapeDtypeStruct((Mp, n_fc), out_dt),
                   jax.ShapeDtypeStruct((Mp, n3), out_dt)),
        grid_spec=pltpu.PrefetchScalarGridSpec(
            num_scalar_prefetch=0,
            grid=(Mp // tm_eff,),
            in_specs=[
                pl.BlockSpec((tm_eff, K), lambda i: (i, 0)),           # x row tile
                resident((K, n_fc)), resident((1, n_fc)),              # fc
                resident((n_fc, n1p)), resident((1, n1p)), resident((1, n1p)),  # L1+BN1
                resident((n1p, n2p)), resident((1, n2p)), resident((1, n2p)),   # L2+BN2
                resident((n2p, n3)), resident((1, n3)),                # L3
            ],
            out_specs=(
                pl.BlockSpec((tm_eff, n_fc), lambda i: (i, 0)),        # v
                pl.BlockSpec((tm_eff, n3), lambda i: (i, 0)),          # z_given_v
            ),
        ),
        compiler_params=pltpu.CompilerParams(
            dimension_semantics=("parallel",),
            vmem_limit_bytes=vmem_limit),
    )(x2, wfc_t, row(bfc),
      w1_t, row(s1p), row(t1p),
      w2_t, row(s2p), row(t2p),
      w3_t, row(b3))

    v_out = v_out[:M].reshape(*orig_shape[:-1], n_fc)
    z_out = z_out[:M].reshape(*orig_shape[:-1], n3)
    return v_out, z_out


if __name__ == "__main__":
    key = jax.random.PRNGKey(0)
    ks = jax.random.split(key, 20)

    B = 8
    IN_CH = 512
    Z_DIM = 256
    OUT_CH = 2 * Z_DIM     # 512 (bottleneck output width)
    H1, H2 = 1000, 500     # ChannelCompress hidden widths
    BN_EPS = 1e-5

    def lin(kw, kb, out_f, in_f):
        bound = 1.0 / (in_f ** 0.5)
        w = jax.random.uniform(kw, (out_f, in_f), jnp.float32, -bound, bound)
        b = jax.random.uniform(kb, (out_f,), jnp.float32, -bound, bound)
        return w, b

    def bn(kg, kb, km, kv, n):
        g = jax.random.uniform(kg, (n,), jnp.float32, 0.5, 1.5)
        be = 0.1 * jax.random.normal(kb, (n,), jnp.float32)
        m = 0.1 * jax.random.normal(km, (n,), jnp.float32)
        va = jax.random.uniform(kv, (n,), jnp.float32, 0.5, 1.5)
        return g, be, m, va

    x = jax.random.normal(ks[0], (B, IN_CH), dtype=jnp.float32)

    fc_w, fc_b = lin(ks[1], ks[2], IN_CH, IN_CH)
    b1_w, b1_b = lin(ks[3], ks[4], H1, IN_CH)
    bn1_g, bn1_be, bn1_m, bn1_v = bn(ks[5], ks[6], ks[7], ks[8], H1)
    b2_w, b2_b = lin(ks[9], ks[10], H2, H1)
    bn2_g, bn2_be, bn2_m, bn2_v = bn(ks[11], ks[12], ks[13], ks[14], H2)
    b3_w, b3_b = lin(ks[15], ks[16], OUT_CH, H2)

    params = dict(fc_w=fc_w, fc_b=fc_b,
                  b1_w=b1_w, b1_b=b1_b,
                  bn1_g=bn1_g, bn1_b=bn1_be, bn1_m=bn1_m, bn1_v=bn1_v,
                  b2_w=b2_w, b2_b=b2_b,
                  bn2_g=bn2_g, bn2_b=bn2_be, bn2_m=bn2_m, bn2_v=bn2_v,
                  b3_w=b3_w, b3_b=b3_b)

    v_out, z_out = vib_i_forward(x, params, tm=512, bn_eps=BN_EPS)
    v_out, z_out = jax.block_until_ready((v_out, z_out))

    # Pure-JAX reference with matching precision (bf16 MXU operands, f32 accumulation,
    # eval-mode BatchNorm folded in f32 exactly as in the kernel).
    bf = jnp.bfloat16
    f32 = jnp.float32
    xb = x.astype(bf)
    v_ref = jnp.dot(xb, fc_w.T.astype(bf), preferred_element_type=f32) + fc_b
    s1 = bn1_g / jnp.sqrt(bn1_v + BN_EPS); t1 = (b1_b - bn1_m) * s1 + bn1_be
    s2 = bn2_g / jnp.sqrt(bn2_v + BN_EPS); t2 = (b2_b - bn2_m) * s2 + bn2_be
    h1 = jnp.dot(v_ref.astype(bf), b1_w.T.astype(bf), preferred_element_type=f32)
    h1 = jnp.maximum(h1 * s1 + t1, 0.0)
    h2 = jnp.dot(h1.astype(bf), b2_w.T.astype(bf), preferred_element_type=f32)
    h2 = jnp.maximum(h2 * s2 + t2, 0.0)
    z_ref = jnp.dot(h2.astype(bf), b3_w.T.astype(bf), preferred_element_type=f32) + b3_b

    assert v_out.shape == (B, IN_CH) and z_out.shape == (B, OUT_CH)
    assert jnp.allclose(v_out.astype(f32), v_ref, atol=2e-2, rtol=2e-2)
    assert jnp.allclose(z_out.astype(f32), z_ref, atol=2e-2, rtol=2e-2)

    print("KERNEL_OK")
</pallas_src>

<mosaic_0001>
module attributes {stable_mosaic.version = 11 : i64} {
  func.func @_vib_i_kernel(%arg0: i32, %arg1: memref<8x512xf32, #tpu.memory_space<vmem>>, %arg2: memref<512x512xbf16, #tpu.memory_space<vmem>>, %arg3: memref<1x512xf32, #tpu.memory_space<vmem>>, %arg4: memref<512x1024xbf16, #tpu.memory_space<vmem>>, %arg5: memref<1x1024xf32, #tpu.memory_space<vmem>>, %arg6: memref<1x1024xf32, #tpu.memory_space<vmem>>, %arg7: memref<1024x512xbf16, #tpu.memory_space<vmem>>, %arg8: memref<1x512xf32, #tpu.memory_space<vmem>>, %arg9: memref<1x512xf32, #tpu.memory_space<vmem>>, %arg10: memref<512x512xbf16, #tpu.memory_space<vmem>>, %arg11: memref<1x512xf32, #tpu.memory_space<vmem>>, %arg12: memref<8x512xf32, #tpu.memory_space<vmem>>, %arg13: memref<8x512xf32, #tpu.memory_space<vmem>>) attributes {dimension_semantics = [#tpu.dimension_semantics<parallel>], iteration_bounds = array<i64: 1>, scalar_prefetch = 0 : i64, scratch_operands = 0 : i64, tpu.core_type = #tpu.core_type<tc>, window_params = [{transform_indices = @transform_0, window_bounds = array<i64: 8, 512>}, {pipeline_mode = #tpu.pipeline_mode<synchronous>, transform_indices = @transform_1, window_bounds = array<i64: 512, 512>}, {pipeline_mode = #tpu.pipeline_mode<synchronous>, transform_indices = @transform_2, window_bounds = array<i64: 1, 512>}, {pipeline_mode = #tpu.pipeline_mode<synchronous>, transform_indices = @transform_3, window_bounds = array<i64: 512, 1024>}, {pipeline_mode = #tpu.pipeline_mode<synchronous>, transform_indices = @transform_4, window_bounds = array<i64: 1, 1024>}, {pipeline_mode = #tpu.pipeline_mode<synchronous>, transform_indices = @transform_5, window_bounds = array<i64: 1, 1024>}, {pipeline_mode = #tpu.pipeline_mode<synchronous>, transform_indices = @transform_6, window_bounds = array<i64: 1024, 512>}, {pipeline_mode = #tpu.pipeline_mode<synchronous>, transform_indices = @transform_7, window_bounds = array<i64: 1, 512>}, {pipeline_mode = #tpu.pipeline_mode<synchronous>, transform_indices = @transform_8, window_bounds = array<i64: 1, 512>}, {pipeline_mode = #tpu.pipeline_mode<synchronous>, transform_indices = @transform_9, window_bounds = array<i64: 512, 512>}, {pipeline_mode = #tpu.pipeline_mode<synchronous>, transform_indices = @transform_10, window_bounds = array<i64: 1, 512>}, {transform_indices = @transform_11, window_bounds = array<i64: 8, 512>}, {transform_indices = @transform_12, window_bounds = array<i64: 8, 512>}]} {
    %c0 = arith.constant 0 : index
    %c0_0 = arith.constant 0 : index
    %0 = vector.load %arg1[%c0, %c0_0] : memref<8x512xf32, #tpu.memory_space<vmem>>, vector<8x512xf32>
    %1 = arith.truncf %0 : vector<8x512xf32> to vector<8x512xbf16>
    %c0_1 = arith.constant 0 : index
    %c0_2 = arith.constant 0 : index
    %2 = vector.load %arg2[%c0_1, %c0_2] : memref<512x512xbf16, #tpu.memory_space<vmem>>, vector<512x512xbf16>
    %cst = arith.constant dense<0.000000e+00> : vector<8x512xf32>
    %3 = tpu.matmul %1, %2, %cst {dimension_numbers = #tpu.dot_dimension_numbers<[1], [0], [0], [1], [0, 0, 1, 1], [], []>} : vector<8x512xbf16>, vector<512x512xbf16>, vector<8x512xf32> -> vector<8x512xf32>
    %c0_3 = arith.constant 0 : index
    %c0_4 = arith.constant 0 : index
    %4 = vector.load %arg3[%c0_3, %c0_4] : memref<1x512xf32, #tpu.memory_space<vmem>>, vector<1x512xf32>
    %5 = vector.broadcast %4 : vector<1x512xf32> to vector<8x512xf32>
    %6 = arith.addf %3, %5 : vector<8x512xf32>
    %c0_5 = arith.constant 0 : index
    %c0_6 = arith.constant 0 : index
    %7 = vector.load %arg12[%c0_5, %c0_6] : memref<8x512xf32, #tpu.memory_space<vmem>>, vector<8x512xf32>
    tpu.vector_store %arg12[%c0_5, %c0_6], %6 {strides = array<i32>} : memref<8x512xf32, #tpu.memory_space<vmem>>, vector<8x512xf32>,
    %8 = arith.truncf %6 : vector<8x512xf32> to vector<8x512xbf16>
    %c0_7 = arith.constant 0 : index
    %c0_8 = arith.constant 0 : index
    %9 = vector.load %arg4[%c0_7, %c0_8] : memref<512x1024xbf16, #tpu.memory_space<vmem>>, vector<512x1024xbf16>
    %cst_9 = arith.constant dense<0.000000e+00> : vector<8x1024xf32>
    %10 = tpu.matmul %8, %9, %cst_9 {dimension_numbers = #tpu.dot_dimension_numbers<[1], [0], [0], [1], [0, 0, 1, 1], [], []>} : vector<8x512xbf16>, vector<512x1024xbf16>, vector<8x1024xf32> -> vector<8x1024xf32>
    %c0_10 = arith.constant 0 : index
    %c0_11 = arith.constant 0 : index
    %11 = vector.load %arg5[%c0_10, %c0_11] : memref<1x1024xf32, #tpu.memory_space<vmem>>, vector<1x1024xf32>
    %12 = vector.broadcast %11 : vector<1x1024xf32> to vector<8x1024xf32>
    %13 = arith.mulf %10, %12 : vector<8x1024xf32>
    %c0_12 = arith.constant 0 : index
    %c0_13 = arith.constant 0 : index
    %14 = vector.load %arg6[%c0_12, %c0_13] : memref<1x1024xf32, #tpu.memory_space<vmem>>, vector<1x1024xf32>
    %15 = vector.broadcast %14 : vector<1x1024xf32> to vector<8x1024xf32>
    %16 = arith.addf %13, %15 : vector<8x1024xf32>
    %cst_14 = arith.constant 0.000000e+00 : f32
    %17 = vector.broadcast %cst_14 : f32 to vector<8x1024xf32>
    %18 = arith.maximumf %16, %17 : vector<8x1024xf32>
    %19 = arith.truncf %18 : vector<8x1024xf32> to vector<8x1024xbf16>
    %c0_15 = arith.constant 0 : index
    %c0_16 = arith.constant 0 : index
    %20 = vector.load %arg7[%c0_15, %c0_16] : memref<1024x512xbf16, #tpu.memory_space<vmem>>, vector<1024x512xbf16>
    %cst_17 = arith.constant dense<0.000000e+00> : vector<8x512xf32>
    %21 = tpu.matmul %19, %20, %cst_17 {dimension_numbers = #tpu.dot_dimension_numbers<[1], [0], [0], [1], [0, 0, 1, 1], [], []>} : vector<8x1024xbf16>, vector<1024x512xbf16>, vector<8x512xf32> -> vector<8x512xf32>
    %c0_18 = arith.constant 0 : index
    %c0_19 = arith.constant 0 : index
    %22 = vector.load %arg8[%c0_18, %c0_19] : memref<1x512xf32, #tpu.memory_space<vmem>>, vector<1x512xf32>
    %23 = vector.broadcast %22 : vector<1x512xf32> to vector<8x512xf32>
    %24 = arith.mulf %21, %23 : vector<8x512xf32>
    %c0_20 = arith.constant 0 : index
    %c0_21 = arith.constant 0 : index
    %25 = vector.load %arg9[%c0_20, %c0_21] : memref<1x512xf32, #tpu.memory_space<vmem>>, vector<1x512xf32>
    %26 = vector.broadcast %25 : vector<1x512xf32> to vector<8x512xf32>
    %27 = arith.addf %24, %26 : vector<8x512xf32>
    %cst_22 = arith.constant 0.000000e+00 : f32
    %28 = vector.broadcast %cst_22 : f32 to vector<8x512xf32>
    %29 = arith.maximumf %27, %28 : vector<8x512xf32>
    %30 = arith.truncf %29 : vector<8x512xf32> to vector<8x512xbf16>
    %c0_23 = arith.constant 0 : index
    %c0_24 = arith.constant 0 : index
    %31 = vector.load %arg10[%c0_23, %c0_24] : memref<512x512xbf16, #tpu.memory_space<vmem>>, vector<512x512xbf16>
    %cst_25 = arith.constant dense<0.000000e+00> : vector<8x512xf32>
    %32 = tpu.matmul %30, %31, %cst_25 {dimension_numbers = #tpu.dot_dimension_numbers<[1], [0], [0], [1], [0, 0, 1, 1], [], []>} : vector<8x512xbf16>, vector<512x512xbf16>, vector<8x512xf32> -> vector<8x512xf32>
    %c0_26 = arith.constant 0 : index
    %c0_27 = arith.constant 0 : index
    %33 = vector.load %arg11[%c0_26, %c0_27] : memref<1x512xf32, #tpu.memory_space<vmem>>, vector<1x512xf32>
    %34 = vector.broadcast %33 : vector<1x512xf32> to vector<8x512xf32>
    %35 = arith.addf %32, %34 : vector<8x512xf32>
    %c0_28 = arith.constant 0 : index
    %c0_29 = arith.constant 0 : index
    %36 = vector.load %arg13[%c0_28, %c0_29] : memref<8x512xf32, #tpu.memory_space<vmem>>, vector<8x512xf32>
    tpu.vector_store %arg13[%c0_28, %c0_29], %35 {strides = array<i32>} : memref<8x512xf32, #tpu.memory_space<vmem>>, vector<8x512xf32>,
    return
  }
  func.func @transform_0(%arg0: i32) -> (i32, i32) {
    %c0_i32 = arith.constant 0 : i32
    %c0_i32_0 = arith.constant 0 : i32
    return %arg0, %c0_i32 : i32, i32
  }
  func.func @transform_1(%arg0: i32) -> (i32, i32) {
    %c0_i32 = arith.constant 0 : i32
    %c0_i32_0 = arith.constant 0 : i32
    %c0_i32_1 = arith.constant 0 : i32
    return %c0_i32, %c0_i32_0 : i32, i32
  }
  func.func @transform_2(%arg0: i32) -> (i32, i32) {
    %c0_i32 = arith.constant 0 : i32
    %c0_i32_0 = arith.constant 0 : i32
    %c0_i32_1 = arith.constant 0 : i32
    return %c0_i32, %c0_i32_0 : i32, i32
  }
  func.func @transform_3(%arg0: i32) -> (i32, i32) {
    %c0_i32 = arith.constant 0 : i32
    %c0_i32_0 = arith.constant 0 : i32
    %c0_i32_1 = arith.constant 0 : i32
    return %c0_i32, %c0_i32_0 : i32, i32
  }
  func.func @transform_4(%arg0: i32) -> (i32, i32) {
    %c0_i32 = arith.constant 0 : i32
    %c0_i32_0 = arith.constant 0 : i32
    %c0_i32_1 = arith.constant 0 : i32
    return %c0_i32, %c0_i32_0 : i32, i32
  }
  func.func @transform_5(%arg0: i32) -> (i32, i32) {
    %c0_i32 = arith.constant 0 : i32
    %c0_i32_0 = arith.constant 0 : i32
    %c0_i32_1 = arith.constant 0 : i32
    return %c0_i32, %c0_i32_0 : i32, i32
  }
  func.func @transform_6(%arg0: i32) -> (i32, i32) {
    %c0_i32 = arith.constant 0 : i32
    %c0_i32_0 = arith.constant 0 : i32
    %c0_i32_1 = arith.constant 0 : i32
    return %c0_i32, %c0_i32_0 : i32, i32
  }
  func.func @transform_7(%arg0: i32) -> (i32, i32) {
    %c0_i32 = arith.constant 0 : i32
    %c0_i32_0 = arith.constant 0 : i32
    %c0_i32_1 = arith.constant 0 : i32
    return %c0_i32, %c0_i32_0 : i32, i32
  }
  func.func @transform_8(%arg0: i32) -> (i32, i32) {
    %c0_i32 = arith.constant 0 : i32
    %c0_i32_0 = arith.constant 0 : i32
    %c0_i32_1 = arith.constant 0 : i32
    return %c0_i32, %c0_i32_0 : i32, i32
  }
  func.func @transform_9(%arg0: i32) -> (i32, i32) {
    %c0_i32 = arith.constant 0 : i32
    %c0_i32_0 = arith.constant 0 : i32
    %c0_i32_1 = arith.constant 0 : i32
    return %c0_i32, %c0_i32_0 : i32, i32
  }
  func.func @transform_10(%arg0: i32) -> (i32, i32) {
    %c0_i32 = arith.constant 0 : i32
    %c0_i32_0 = arith.constant 0 : i32
    %c0_i32_1 = arith.constant 0 : i32
    return %c0_i32, %c0_i32_0 : i32, i32
  }
  func.func @transform_11(%arg0: i32) -> (i32, i32) {
    %c0_i32 = arith.constant 0 : i32
    %c0_i32_0 = arith.constant 0 : i32
    return %arg0, %c0_i32 : i32, i32
  }
  func.func @transform_12(%arg0: i32) -> (i32, i32) {
    %c0_i32 = arith.constant 0 : i32
    %c0_i32_0 = arith.constant 0 : i32
    return %arg0, %c0_i32 : i32, i32
  }
}

</mosaic_0001>

<bundles_post_ra>
// kernel: tpu_custom_call.1
= control target key start
LH: loop header
LB: loop body
LE: loop exit
PB: predicated region body
PF: predicated region fallthrough
CT: control target
= control target key end

     0   :  { %18 = vsyncpa [#allocation3], 0  ;;  %s8088_s0 = inlined_call_operand.hbm [shape: f32[8,512], index: 0, kind: input, shape index: {}]   ;;  %s8089_s1 = inlined_call_operand.hbm [shape: bf16[512,512], index: 1, kind: input, shape index: {}]   ;;  %s8090_s2 = inlined_call_operand.hbm [shape: f32[1,512], index: 2, kind: input, shape index: {}]   ;;  %s8091_s3 = inlined_call_operand.hbm [shape: bf16[512,1024], index: 3, kind: input, shape index: {}]   ;;  %s8092_s4 = inlined_call_operand.vmem [shape: f32[1,1024], index: 4, kind: input, shape index: {}]   ;;  %s8093_s5 = inlined_call_operand.vmem [shape: f32[1,1024], index: 5, kind: input, shape index: {}]   ;;  %s8094_s6 = inlined_call_operand.hbm [shape: bf16[1024,512], index: 6, kind: input, shape index: {}]   ;;  %s8095_s7 = inlined_call_operand.vmem [shape: f32[1,512], index: 7, kind: input, shape index: {}]   ;;  %s8096_s8 = inlined_call_operand.vmem [shape: f32[1,512], index: 8, kind: input, shape index: {}]   ;;  %s8097_s9 = inlined_call_operand.hbm [shape: bf16[512,512], index: 9, kind: input, shape index: {}]   ;;  %s8098_s10 = inlined_call_operand.vmem [shape: f32[1,512], index: 10, kind: input, shape index: {}]   ;;  %s8099_s11 = inlined_call_operand.hbm [shape: f32[8,512], index: 11, kind: output, shape index: {0}]   ;;  %s8100_s12 = inlined_call_operand.hbm [shape: f32[8,512], index: 12, kind: output, shape index: {1}]  }
   0x1   :  { %19 = vsyncpa [#allocation6], 0 }
   0x2   :  { %20 = vsyncpa [#allocation9], 0 }
   0x3   :  { %21 = vsyncpa [#allocation12], 0 }
   0x4   :  { %22 = vsyncpa [#allocation4], 0 }
   0x5   :  { %23 = vsyncpa [#allocation15], 0  ;;  %s7784_s21 = smov [#allocation5]   ;;  %s7596_s25 = scalar_lea.hbm %s8089_s1, 16384 }
   0x6   :  { %s39_s22 = sshll.u32 %s7784_s21, 4  ;;  %p7597_p0 = scmp.ne.s32.totalorder %s8089_s1, %s7596_s25  ;;  %s40_s22 = int_to_ptr.vmem [resolvable:$true] %s39_s22 }
   0x7   :  { %p7600_p1 = scmp.lt.u32.totalorder %s7596_s25, %s8089_s1 }
   0x9   :  { %p7602_p2 = pnand %p7600_p1, %p7597_p0 }
   0xb   :  { %7605 = shalt.err (!%p7602_p2)
}
   0xc   :  { %s7606_s30 = scalar_lea.vmem %s40_s22, 16384  ;;  %p7611_p4 = scmp.lt.s32.totalorder %s40_s22, %s40_s22 }
   0xd   :  { %p7607_p3 = scmp.ne.s32.totalorder %s40_s22, %s7606_s30  ;;  %p7612_p5 = scmp.lt.s32.totalorder %s7606_s30, %s7606_s30 }
   0xf   :  { %p7613_p6 = por %p7612_p5, %p7611_p4 }
  0x11   :  { %p7614_p7 = pnand %p7613_p6, %p7607_p3 }
  0x13   :  { %7617 = shalt.err (!%p7614_p7)
}
  0x14   :  { %s7785_s13 = smov 256   ;;  %s7786_s14 = smov 16  }
  0x15   :  { %45 = dma.hbm_to_vmem [thread:$0]  %s8089_s1, 16384, %s40_s22, [#allocation6], %s7785_s13, %s7785_s13, %s7786_s14  }
  0x16   :  { %s7787_s17 = smov [#allocation8]   ;;  %s7618_s21 = scalar_lea.hbm %s8091_s3, 32768 }
  0x17   :  { %s61_s18 = sshll.u32 %s7787_s17, 4  ;;  %p7619_p8 = scmp.ne.s32.totalorder %s8091_s3, %s7618_s21  ;;  %s62_s18 = int_to_ptr.vmem [resolvable:$true] %s61_s18 }
  0x18   :  { %p7622_p9 = scmp.lt.u32.totalorder %s7618_s21, %s8091_s3 }
  0x1a   :  { %p7624_p10 = pnand %p7622_p9, %p7619_p8 }
  0x1c   :  { %7627 = shalt.err (!%p7624_p10)
}
  0x1d   :  { %s7628_s27 = scalar_lea.vmem %s62_s18, 32768  ;;  %p7633_p12 = scmp.lt.s32.totalorder %s62_s18, %s62_s18 }
  0x1e   :  { %p7629_p11 = scmp.ne.s32.totalorder %s62_s18, %s7628_s27  ;;  %p7634_p13 = scmp.lt.s32.totalorder %s7628_s27, %s7628_s27 }
  0x20   :  { %p7635_p0 = por %p7634_p13, %p7633_p12 }
  0x22   :  { %p7636_p1 = pnand %p7635_p0, %p7629_p11 }
  0x24   :  { %7639 = shalt.err (!%p7636_p1)
}
  0x25   :  { %s7788_s1 = smov 512   ;;  %s7789_s22 = smov 32  }
  0x26   :  { %67 = dma.hbm_to_vmem [thread:$0]  %s8091_s3, 32768, %s62_s18, [#allocation9], %s7788_s1, %s7788_s1, %s7789_s22  }
  0x27   :  { %s7790_s30 = smov [#allocation2]   ;;  %s7791_s16 = smov [#allocation7]  }
  0x28   :  { %s30_s15 = sshll.u32 %s7790_s30, 4  ;;  %s52_s17 = sshll.u32 %s7791_s16, 4  ;;  %s31_s15 = int_to_ptr.vmem [resolvable:$true] %s30_s15  ;;  %s53_s17 = int_to_ptr.vmem [resolvable:$true] %s52_s17 }
  0x29   :  { %s7640_s21 = scalar_lea.hbm %s8088_s0, 512 }
  0x2a   :  { %p7641_p2 = scmp.ne.s32.totalorder %s8088_s0, %s7640_s21  ;;  %p7644_p3 = scmp.lt.u32.totalorder %s7640_s21, %s8088_s0 }
  0x2c   :  { %p7646_p4 = pnand %p7644_p3, %p7641_p2 }
  0x2e   :  { %7649 = shalt.err (!%p7646_p4)
}
  0x2f   :  { %s7650_s3 = scalar_lea.vmem %s31_s15, 512  ;;  %p7655_p6 = scmp.lt.s32.totalorder %s31_s15, %s31_s15 }
  0x30   :  { %p7651_p5 = scmp.ne.s32.totalorder %s31_s15, %s7650_s3  ;;  %p7656_p7 = scmp.lt.s32.totalorder %s7650_s3, %s7650_s3 }
  0x32   :  { %p7657_p8 = por %p7656_p7, %p7655_p6 }
  0x34   :  { %p7658_p9 = pnand %p7657_p8, %p7651_p5 }
  0x36   :  { %7661 = shalt.err (!%p7658_p9)
}
  0x37   :  { %33 = dma.hbm_to_vmem [thread:$0]  %s8088_s0, 512, %s31_s15, [#allocation3]  }
  0x38   :  { %s7662_s28 = scalar_lea.hbm %s8090_s2, 64 }
  0x39   :  { %p7663_p10 = scmp.ne.s32.totalorder %s8090_s2, %s7662_s28  ;;  %p7666_p11 = scmp.lt.u32.totalorder %s7662_s28, %s8090_s2 }
  0x3b   :  { %p7668_p12 = pnand %p7666_p11, %p7663_p10 }
  0x3d   :  { %7671 = shalt.err (!%p7668_p12)
}
  0x3e   :  { %s7672_s20 = scalar_lea.vmem %s53_s17, 64  ;;  %p7677_p0 = scmp.lt.s32.totalorder %s53_s17, %s53_s17 }
  0x3f   :  { %p7673_p13 = scmp.ne.s32.totalorder %s53_s17, %s7672_s20  ;;  %p7678_p1 = scmp.lt.s32.totalorder %s7672_s20, %s7672_s20 }
  0x41   :  { %p7679_p2 = por %p7678_p1, %p7677_p0 }
  0x43   :  { %p7680_p3 = pnand %p7679_p2, %p7673_p13 }
  0x45   :  { %7683 = shalt.err (!%p7680_p3)
}
  0x46   :  { %55 = dma.hbm_to_vmem [thread:$0]  %s8090_s2, 64, %s53_s17, [#allocation6]  }
  0x47   :  { %s7792_s21 = smov [#allocation10]   ;;  %s7793_s24 = smov [#allocation11]  }
  0x48   :  { %s77_s23 = sshll.u32 %s7792_s21, 4  ;;  %s93_s25 = sshll.u32 %s7793_s24, 4  ;;  %s78_s23 = int_to_ptr.vmem [resolvable:$true] %s77_s23  ;;  %s7912_s25 = int_to_ptr.vmem [resolvable:$true] %s93_s25 }
  0x49   :  { %s7684_s18 = scalar_lea.hbm %s8094_s6, 32768 }
  0x4a   :  { %p7685_p4 = scmp.ne.s32.totalorder %s8094_s6, %s7684_s18  ;;  %p7688_p5 = scmp.lt.u32.totalorder %s7684_s18, %s8094_s6 }
  0x4c   :  { %p7690_p6 = pnand %p7688_p5, %p7685_p4 }
  0x4e   :  { %7693 = shalt.err (!%p7690_p6)
}
  0x4f   :  { %s7694_s2 = scalar_lea.vmem %s78_s23, 32768  ;;  %p7699_p8 = scmp.lt.s32.totalorder %s78_s23, %s78_s23 }
  0x50   :  { %p7695_p7 = scmp.ne.s32.totalorder %s78_s23, %s7694_s2  ;;  %p7700_p9 = scmp.lt.s32.totalorder %s7694_s2, %s7694_s2 }
  0x52   :  { %p7701_p10 = por %p7700_p9, %p7699_p8 }
  0x54   :  { %p7702_p11 = pnand %p7701_p10, %p7695_p7 }
  0x56   :  { %7705 = shalt.err (!%p7702_p11)
}
  0x57   :  { %83 = dma.hbm_to_vmem [thread:$0]  %s8094_s6, 32768, %s78_s23, [#allocation9], %s7785_s13, %s7785_s13, %s7786_s14  }
  0x58   :  { %s7706_s19 = scalar_lea.hbm %s8097_s9, 16384 }
  0x59   :  { %p7707_p12 = scmp.ne.s32.totalorder %s8097_s9, %s7706_s19  ;;  %p7710_p13 = scmp.lt.u32.totalorder %s7706_s19, %s8097_s9 }
  0x5b   :  { %p7712_p0 = pnand %p7710_p13, %p7707_p12 }
  0x5d   :  { %7715 = shalt.err (!%p7712_p0)
}
  0x5e   :  { %s7716_s24 = scalar_lea.vmem %s7912_s25, 16384  ;;  %p7721_p2 = scmp.lt.s32.totalorder %s7912_s25, %s7912_s25 }
  0x5f   :  { %p7717_p1 = scmp.ne.s32.totalorder %s7912_s25, %s7716_s24  ;;  %p7722_p3 = scmp.lt.s32.totalorder %s7716_s24, %s7716_s24 }
  0x61   :  { %p7723_p4 = por %p7722_p3, %p7721_p2 }
  0x63   :  { %p7724_p5 = pnand %p7723_p4, %p7717_p1 }
  0x65   :  { %7727 = shalt.err (!%p7724_p5)
}
  0x66   :  { %99 = dma.hbm_to_vmem [thread:$0]  %s8097_s9, 16384, %s7912_s25, [#allocation12], %s7785_s13, %s7785_s13, %s7786_s14  }
  0x67   :  { %7772 = dma.done.wait [#allocation3], 512  }
  0x68   :  { %7773 = vsyncadd [#allocation3], 4294966784 }
  0x69   :  { %7774 = dma.done.wait [#allocation6], 16448  }
  0x6a   :  { %7775 = vsyncadd [#allocation6], 4294950848 }
  0x6b   :  { %7776 = dma.done.wait [#allocation9], 65536  }
  0x6c   :  { %7777 = vsyncadd [#allocation9], 4294901760 }
  0x6d   :  { %7778 = dma.done.wait [#allocation12], 16384  }
  0x6e   :  { %7779 = vsyncadd [#allocation12], 4294950912  ;;  %v6828_v0 = vld [vmem:[#allocation5 + $0x4] ss:$16 sps:$4 sm:$0xff]   ;;  %v6830_v1 = vld [vmem:[#allocation5 + $0xc] ss:$16 sps:$4 sm:$0xff]  }
  0x6f   :  { %918 = vmatprep.subr.bf16.mxu0 %v6828_v0  ;;  %v6832_v2 = vld [vmem:[#allocation5] ss:$16 sps:$4 sm:$0xff]   ;;  %v6833_v3 = vld [vmem:[#allocation5 + $0x8] ss:$16 sps:$4 sm:$0xff]   ;;  %1000 = vmatprep.subr.bf16.mxu1 %v6830_v1  ;;  %v6834_v4 = vld [vmem:[#allocation5 + $0x24] ss:$16 sps:$4 sm:$0xff]  }
  0x70   :  { %919 = vmatpush1.bf16.msra.mxu0 %v6832_v2  ;;  %1001 = vmatpush1.bf16.msra.mxu1 %v6833_v3  ;;  %v6836_v5 = vld [vmem:[#allocation5 + $0x2c] ss:$16 sps:$4 sm:$0xff]   ;;  %v6838_v6 = vld [vmem:[#allocation5 + $0x20] ss:$16 sps:$4 sm:$0xff]   ;;  %v6839_v7 = vld [vmem:[#allocation5 + $0x28] ss:$16 sps:$4 sm:$0xff]  }
  0x71   :  { %920 = vmatprep.subr.bf16.mxu0 %v6834_v4  ;;  %1002 = vmatprep.subr.bf16.mxu1 %v6836_v5  ;;  %v6840_v8 = vld [vmem:[#allocation5 + $0x44] ss:$16 sps:$4 sm:$0xff]   ;;  %v6842_v9 = vld [vmem:[#allocation5 + $0x4c] ss:$16 sps:$4 sm:$0xff]   ;;  %v6844_v10 = vld [vmem:[#allocation5 + $0x40] ss:$16 sps:$4 sm:$0xff]  }
  0x72   :  { %v6845_v11 = vld [vmem:[#allocation5 + $0x48] ss:$16 sps:$4 sm:$0xff]   ;;  %v6846_v12 = vld [vmem:[#allocation5 + $0x64] ss:$16 sps:$4 sm:$0xff]   ;;  %v6848_v13 = vld [vmem:[#allocation5 + $0x6c] ss:$16 sps:$4 sm:$0xff]  }
  0x73   :  { %v6850_v14 = vld [vmem:[#allocation5 + $0x60] ss:$16 sps:$4 sm:$0xff]   ;;  %v6851_v15 = vld [vmem:[#allocation5 + $0x68] ss:$16 sps:$4 sm:$0xff]   ;;  %v6852_v16 = vld [vmem:[#allocation5 + $0x84] ss:$16 sps:$4 sm:$0xff]  }
  0x74   :  { %921 = vmatpush1.bf16.msra.mxu0 %v6838_v6  ;;  %1003 = vmatpush1.bf16.msra.mxu1 %v6839_v7  ;;  %v6854_v17 = vld [vmem:[#allocation5 + $0x8c] ss:$16 sps:$4 sm:$0xff]   ;;  %v6856_v18 = vld [vmem:[#allocation5 + $0x80] ss:$16 sps:$4 sm:$0xff]   ;;  %v6857_v19 = vld [vmem:[#allocation5 + $0x88] ss:$16 sps:$4 sm:$0xff]  }
  0x75   :  { %922 = vmatprep.subr.bf16.mxu0 %v6840_v8  ;;  %1004 = vmatprep.subr.bf16.mxu1 %v6842_v9  ;;  %v6858_v20 = vld [vmem:[#allocation5 + $0xa4] ss:$16 sps:$4 sm:$0xff]   ;;  %v6860_v21 = vld [vmem:[#allocation5 + $0xac] ss:$16 sps:$4 sm:$0xff]   ;;  %v6862_v22 = vld [vmem:[#allocation5 + $0xa0] ss:$16 sps:$4 sm:$0xff]  }
  0x76   :  { %v6863_v23 = vld [vmem:[#allocation5 + $0xa8] ss:$16 sps:$4 sm:$0xff]   ;;  %v6864_v24 = vld [vmem:[#allocation5 + $0xc4] ss:$16 sps:$4 sm:$0xff]   ;;  %v6866_v25 = vld [vmem:[#allocation5 + $0xcc] ss:$16 sps:$4 sm:$0xff]  }
  0x77   :  { %v6868_v26 = vld [vmem:[#allocation5 + $0xc0] ss:$16 sps:$4 sm:$0xff]   ;;  %v6869_v27 = vld [vmem:[#allocation5 + $0xc8] ss:$16 sps:$4 sm:$0xff]   ;;  %v6870_v28 = vld [vmem:[#allocation5 + $0xe4] ss:$16 sps:$4 sm:$0xff]  }
  0x78   :  { %923 = vmatpush1.bf16.msra.mxu0 %v6844_v10  ;;  %1005 = vmatpush1.bf16.msra.mxu1 %v6845_v11  ;;  %v6872_v29 = vld [vmem:[#allocation5 + $0xec] ss:$16 sps:$4 sm:$0xff]   ;;  %v6874_v30 = vld [vmem:[#allocation5 + $0xe0] ss:$16 sps:$4 sm:$0xff]   ;;  %v6875_v31 = vld [vmem:[#allocation5 + $0xe8] ss:$16 sps:$4 sm:$0xff]  }
  0x79   :  { %924 = vmatprep.subr.bf16.mxu0 %v6846_v12  ;;  %1006 = vmatprep.subr.bf16.mxu1 %v6848_v13  ;;  %v6876_v32 = vld [vmem:[#allocation5 + $0x104] ss:$16 sps:$4 sm:$0xff]   ;;  %v6878_v33 = vld [vmem:[#allocation5 + $0x10c] ss:$16 sps:$4 sm:$0xff]   ;;  %v6880_v34 = vld [vmem:[#allocation5 + $0x100] ss:$16 sps:$4 sm:$0xff]  }
  0x7a   :  { %v6881_v35 = vld [vmem:[#allocation5 + $0x108] ss:$16 sps:$4 sm:$0xff]   ;;  %v6882_v36 = vld [vmem:[#allocation5 + $0x124] ss:$16 sps:$4 sm:$0xff]   ;;  %v6884_v37 = vld [vmem:[#allocation5 + $0x12c] ss:$16 sps:$4 sm:$0xff]  }
  0x7b   :  { %v6886_v38 = vld [vmem:[#allocation5 + $0x120] ss:$16 sps:$4 sm:$0xff]   ;;  %v6887_v39 = vld [vmem:[#allocation5 + $0x128] ss:$16 sps:$4 sm:$0xff]   ;;  %v6888_v40 = vld [vmem:[#allocation5 + $0x144] ss:$16 sps:$4 sm:$0xff]  }
  0x7c   :  { %925 = vmatpush1.bf16.msra.mxu0 %v6850_v14  ;;  %1007 = vmatpush1.bf16.msra.mxu1 %v6851_v15  ;;  %v6890_v41 = vld [vmem:[#allocation5 + $0x14c] ss:$16 sps:$4 sm:$0xff]   ;;  %v6892_v42 = vld [vmem:[#allocation5 + $0x140] ss:$16 sps:$4 sm:$0xff]   ;;  %v6893_v43 = vld [vmem:[#allocation5 + $0x148] ss:$16 sps:$4 sm:$0xff]  }
  0x7d   :  { %926 = vmatprep.subr.bf16.mxu0 %v6852_v16  ;;  %1008 = vmatprep.subr.bf16.mxu1 %v6854_v17  ;;  %v6894_v44 = vld [vmem:[#allocation5 + $0x164] ss:$16 sps:$4 sm:$0xff]   ;;  %v6896_v45 = vld [vmem:[#allocation5 + $0x16c] ss:$16 sps:$4 sm:$0xff]   ;;  %v6898_v47 = vld [vmem:[#allocation5 + $0x160] ss:$16 sps:$4 sm:$0xff]  }
  0x7e   :  { %v121_v46 = vld [vmem:[#allocation2 + $0x8] sm:$0xff]  ;;  %v6900_v50 = vld [vmem:[#allocation5 + $0x184] ss:$16 sps:$4 sm:$0xff]   ;;  %v6904_v52 = vld [vmem:[#allocation5 + $0x180] ss:$16 sps:$4 sm:$0xff]  }
  0x7f   :  { %v125_v48 = vpack.c.bf16 %v121_v46, %v121_v46  ;;  %v6899_v49 = vld [vmem:[#allocation5 + $0x168] ss:$16 sps:$4 sm:$0xff]   ;;  %v6902_v51 = vld [vmem:[#allocation5 + $0x18c] ss:$16 sps:$4 sm:$0xff]   ;;  %v6906_v54 = vld [vmem:[#allocation5 + $0x1a4] ss:$16 sps:$4 sm:$0xff]  }
  0x80   :  { %927 = vmatpush1.bf16.msra.mxu0 %v6856_v18  ;;  %1009 = vmatpush1.bf16.msra.mxu1 %v6857_v19  ;;  %v6905_v53 = vld [vmem:[#allocation5 + $0x188] ss:$16 sps:$4 sm:$0xff]   ;;  %v6908_v55 = vld [vmem:[#allocation5 + $0x1ac] ss:$16 sps:$4 sm:$0xff]   ;;  %v6910_v56 = vld [vmem:[#allocation5 + $0x1a0] ss:$16 sps:$4 sm:$0xff]  }
  0x81   :  { %928 = vmatprep.subr.bf16.mxu0 %v6858_v20  ;;  %1010 = vmatprep.subr.bf16.mxu1 %v6860_v21  ;;  %v6911_v57 = vld [vmem:[#allocation5 + $0x1a8] ss:$16 sps:$4 sm:$0xff]   ;;  %v6912_v58 = vld [vmem:[#allocation5 + $0x1c4] ss:$16 sps:$4 sm:$0xff]   ;;  %v6914_v59 = vld [vmem:[#allocation5 + $0x1cc] ss:$16 sps:$4 sm:$0xff]  }
  0x82   :  { %950 = vmatprep.mubr.bf16.mxu0 %v125_v48  ;;  %1032 = vmatprep.mubr.bf16.mxu1 %v125_v48  ;;  %v6916_v60 = vld [vmem:[#allocation5 + $0x1c0] ss:$16 sps:$4 sm:$0xff]   ;;  %v6917_v61 = vld [vmem:[#allocation5 + $0x1c8] ss:$16 sps:$4 sm:$0xff]   ;;  %v6918_v62 = vld [vmem:[#allocation5 + $0x1e4] ss:$16 sps:$4 sm:$0xff]  }
  0x83   :  { %v6920_v63 = vld [vmem:[#allocation5 + $0x1ec] ss:$16 sps:$4 sm:$0xff]   ;;  %v6922_v0 = vld [vmem:[#allocation5 + $0x1e0] ss:$16 sps:$4 sm:$0xff]   ;;  %v6923_v1 = vld [vmem:[#allocation5 + $0x1e8] ss:$16 sps:$4 sm:$0xff]  }
  0x84   :  { %929 = vmatpush1.bf16.msra.mxu0 %v6862_v22  ;;  %1011 = vmatpush1.bf16.msra.mxu1 %v6863_v23  ;;  %v120_v2 = vld [vmem:[#allocation2] sm:$0xff]  ;;  %v6929_v4 = vld [vmem:[#allocation5 + $0x20c] ss:$16 sps:$4 sm:$0xff]   ;;  %v6927_v7 = vld [vmem:[#allocation5 + $0x208] ss:$16 sps:$4 sm:$0xff]  }
  0x85   :  { %930 = vmatprep.subr.bf16.mxu0 %v6864_v24  ;;  %1012 = vmatprep.subr.bf16.mxu1 %v6866_v25  ;;  %v6926_v3 = vld [vmem:[#allocation5 + $0x204] ss:$16 sps:$4 sm:$0xff]   ;;  %v124_v5 = vpack.c.bf16 %v120_v2, %v120_v2  ;;  %v6924_v6 = vld [vmem:[#allocation5 + $0x200] ss:$16 sps:$4 sm:$0xff]   ;;  %v6935_v9 = vld [vmem:[#allocation5 + $0x22c] ss:$16 sps:$4 sm:$0xff]  }
  0x86   :  { %v6932_v8 = vld [vmem:[#allocation5 + $0x224] ss:$16 sps:$4 sm:$0xff]   ;;  %v6930_v10 = vld [vmem:[#allocation5 + $0x220] ss:$16 sps:$4 sm:$0xff]   ;;  %v6933_v11 = vld [vmem:[#allocation5 + $0x228] ss:$16 sps:$4 sm:$0xff]  }
  0x87   :  { %v6938_v12 = vld [vmem:[#allocation5 + $0x244] ss:$16 sps:$4 sm:$0xff]   ;;  %v6941_v13 = vld [vmem:[#allocation5 + $0x24c] ss:$16 sps:$4 sm:$0xff]   ;;  %v6936_v14 = vld [vmem:[#allocation5 + $0x240] ss:$16 sps:$4 sm:$0xff]  }
  0x88   :  { %931 = vmatpush1.bf16.msra.mxu0 %v6868_v26  ;;  %1013 = vmatpush1.bf16.msra.mxu1 %v6869_v27  ;;  %v6939_v15 = vld [vmem:[#allocation5 + $0x248] ss:$16 sps:$4 sm:$0xff]   ;;  %v6944_v16 = vld [vmem:[#allocation5 + $0x264] ss:$16 sps:$4 sm:$0xff]   ;;  %v6947_v17 = vld [vmem:[#allocation5 + $0x26c] ss:$16 sps:$4 sm:$0xff]  }
  0x89   :  { %932 = vmatprep.subr.bf16.mxu0 %v6870_v28  ;;  %1014 = vmatprep.subr.bf16.mxu1 %v6872_v29  ;;  %v6942_v18 = vld [vmem:[#allocation5 + $0x260] ss:$16 sps:$4 sm:$0xff]   ;;  %v6945_v19 = vld [vmem:[#allocation5 + $0x268] ss:$16 sps:$4 sm:$0xff]   ;;  %v6950_v20 = vld [vmem:[#allocation5 + $0x284] ss:$16 sps:$4 sm:$0xff]  }
  0x8a   :  { %v6953_v21 = vld [vmem:[#allocation5 + $0x28c] ss:$16 sps:$4 sm:$0xff]   ;;  %v6948_v22 = vld [vmem:[#allocation5 + $0x280] ss:$16 sps:$4 sm:$0xff]   ;;  %v6951_v23 = vld [vmem:[#allocation5 + $0x288] ss:$16 sps:$4 sm:$0xff]  }
  0x8b   :  { %v6956_v24 = vld [vmem:[#allocation5 + $0x2a4] ss:$16 sps:$4 sm:$0xff]   ;;  %v6959_v25 = vld [vmem:[#allocation5 + $0x2ac] ss:$16 sps:$4 sm:$0xff]   ;;  %v6954_v26 = vld [vmem:[#allocation5 + $0x2a0] ss:$16 sps:$4 sm:$0xff]  }
  0x8c   :  { %933 = vmatpush1.bf16.msra.mxu0 %v6874_v30  ;;  %1015 = vmatpush1.bf16.msra.mxu1 %v6875_v31  ;;  %v6957_v27 = vld [vmem:[#allocation5 + $0x2a8] ss:$16 sps:$4 sm:$0xff]   ;;  %v6962_v28 = vld [vmem:[#allocation5 + $0x2c4] ss:$16 sps:$4 sm:$0xff]   ;;  %v6965_v29 = vld [vmem:[#allocation5 + $0x2cc] ss:$16 sps:$4 sm:$0xff]  }
  0x8d   :  { %934 = vmatprep.subr.bf16.mxu0 %v6876_v32  ;;  %1016 = vmatprep.subr.bf16.mxu1 %v6878_v33  ;;  %v123_v30 = vld [vmem:[#allocation2 + $0x18] sm:$0xff]  ;;  %v6960_v32 = vld [vmem:[#allocation5 + $0x2c0] ss:$16 sps:$4 sm:$0xff]   ;;  %v6986_v46 = vld [vmem:[#allocation5 + $0x344] ss:$16 sps:$4 sm:$0xff]  }
  0x8e   :  { %v127_v31 = vpack.c.bf16 %v123_v30, %v123_v30  ;;  %v6963_v33 = vld [vmem:[#allocation5 + $0x2c8] ss:$16 sps:$4 sm:$0xff]   ;;  %v6984_v48 = vld [vmem:[#allocation5 + $0x340] ss:$16 sps:$4 sm:$0xff]   ;;  %v7016_v2 = vld [vmem:[#allocation5 + $0x3e4] ss:$16 sps:$4 sm:$0xff]  }
  0x8f   :  { %v1115_v30 = vld [vmem:[#allocation8 + $0xc8] sm:$0xff] }
  0x90   :  { %935 = vmatpush1.bf16.msra.mxu0 %v6880_v34  ;;  %1017 = vmatpush1.bf16.msra.mxu1 %v6881_v35  ;;  %v6968_v34 = vld [vmem:[#allocation5 + $0x2e4] ss:$16 sps:$4 sm:$0xff]   ;;  %v6971_v35 = vld [vmem:[#allocation5 + $0x2ec] ss:$16 sps:$4 sm:$0xff]  }
  0x91   :  { %936 = vmatprep.subr.bf16.mxu0 %v6882_v36  ;;  %1018 = vmatprep.subr.bf16.mxu1 %v6884_v37  ;;  %v6966_v36 = vld [vmem:[#allocation5 + $0x2e0] ss:$16 sps:$4 sm:$0xff]   ;;  %v6969_v37 = vld [vmem:[#allocation5 + $0x2e8] ss:$16 sps:$4 sm:$0xff]  }
  0x94   :  { %937 = vmatpush1.bf16.msra.mxu0 %v6886_v38  ;;  %1019 = vmatpush1.bf16.msra.mxu1 %v6887_v39  ;;  %v6974_v38 = vld [vmem:[#allocation5 + $0x304] ss:$16 sps:$4 sm:$0xff]   ;;  %v6977_v39 = vld [vmem:[#allocation5 + $0x30c] ss:$16 sps:$4 sm:$0xff]  }
  0x95   :  { %938 = vmatprep.subr.bf16.mxu0 %v6888_v40  ;;  %1020 = vmatprep.subr.bf16.mxu1 %v6890_v41  ;;  %v6972_v40 = vld [vmem:[#allocation5 + $0x300] ss:$16 sps:$4 sm:$0xff]   ;;  %v6975_v41 = vld [vmem:[#allocation5 + $0x308] ss:$16 sps:$4 sm:$0xff]  }
  0x98   :  { %939 = vmatpush1.bf16.msra.mxu0 %v6892_v42  ;;  %1021 = vmatpush1.bf16.msra.mxu1 %v6893_v43  ;;  %v6980_v42 = vld [vmem:[#allocation5 + $0x324] ss:$16 sps:$4 sm:$0xff]   ;;  %v6983_v43 = vld [vmem:[#allocation5 + $0x32c] ss:$16 sps:$4 sm:$0xff]  }
  0x99   :  { %940 = vmatprep.subr.bf16.mxu0 %v6894_v44  ;;  %1022 = vmatprep.subr.bf16.mxu1 %v6896_v45  ;;  %v6978_v44 = vld [vmem:[#allocation5 + $0x320] ss:$16 sps:$4 sm:$0xff]   ;;  %v6981_v45 = vld [vmem:[#allocation5 + $0x328] ss:$16 sps:$4 sm:$0xff]  }
  0x9c   :  { %941 = vmatpush1.bf16.msra.mxu0 %v6898_v47  ;;  %1023 = vmatpush1.bf16.msra.mxu1 %v6899_v49  ;;  %v6989_v47 = vld [vmem:[#allocation5 + $0x34c] ss:$16 sps:$4 sm:$0xff]   ;;  %v6987_v49 = vld [vmem:[#allocation5 + $0x348] ss:$16 sps:$4 sm:$0xff]  }
  0x9d   :  { %942 = vmatprep.subr.bf16.mxu0 %v6900_v50  ;;  %1024 = vmatprep.subr.bf16.mxu1 %v6902_v51  ;;  %v6992_v50 = vld [vmem:[#allocation5 + $0x364] ss:$16 sps:$4 sm:$0xff]   ;;  %v6995_v51 = vld [vmem:[#allocation5 + $0x36c] ss:$16 sps:$4 sm:$0xff]  }
  0xa0   :  { %943 = vmatpush1.bf16.msra.mxu0 %v6904_v52  ;;  %1025 = vmatpush1.bf16.msra.mxu1 %v6905_v53  ;;  %v6990_v52 = vld [vmem:[#allocation5 + $0x360] ss:$16 sps:$4 sm:$0xff]   ;;  %v6993_v53 = vld [vmem:[#allocation5 + $0x368] ss:$16 sps:$4 sm:$0xff]  }
  0xa1   :  { %944 = vmatprep.subr.bf16.mxu0 %v6906_v54  ;;  %1026 = vmatprep.subr.bf16.mxu1 %v6908_v55  ;;  %v6998_v54 = vld [vmem:[#allocation5 + $0x384] ss:$16 sps:$4 sm:$0xff]   ;;  %v7001_v55 = vld [vmem:[#allocation5 + $0x38c] ss:$16 sps:$4 sm:$0xff]  }
  0xa4   :  { %945 = vmatpush1.bf16.msra.mxu0 %v6910_v56  ;;  %1027 = vmatpush1.bf16.msra.mxu1 %v6911_v57  ;;  %v6996_v56 = vld [vmem:[#allocation5 + $0x380] ss:$16 sps:$4 sm:$0xff]   ;;  %v6999_v57 = vld [vmem:[#allocation5 + $0x388] ss:$16 sps:$4 sm:$0xff]  }
  0xa5   :  { %946 = vmatprep.subr.bf16.mxu0 %v6912_v58  ;;  %1028 = vmatprep.subr.bf16.mxu1 %v6914_v59  ;;  %v7004_v58 = vld [vmem:[#allocation5 + $0x3a4] ss:$16 sps:$4 sm:$0xff]   ;;  %v7007_v59 = vld [vmem:[#allocation5 + $0x3ac] ss:$16 sps:$4 sm:$0xff]  }
  0xa8   :  { %947 = vmatpush1.bf16.msra.mxu0 %v6916_v60  ;;  %1029 = vmatpush1.bf16.msra.mxu1 %v6917_v61  ;;  %v7002_v60 = vld [vmem:[#allocation5 + $0x3a0] ss:$16 sps:$4 sm:$0xff]   ;;  %v7005_v61 = vld [vmem:[#allocation5 + $0x3a8] ss:$16 sps:$4 sm:$0xff]  }
  0xa9   :  { %948 = vmatprep.subr.bf16.mxu0 %v6918_v62  ;;  %1030 = vmatprep.subr.bf16.mxu1 %v6920_v63  ;;  %v7010_v62 = vld [vmem:[#allocation5 + $0x3c4] ss:$16 sps:$4 sm:$0xff]   ;;  %v7013_v63 = vld [vmem:[#allocation5 + $0x3cc] ss:$16 sps:$4 sm:$0xff]  }
  0xac   :  { %949 = vmatpush1.bf16.msra.mxu0 %v6922_v0  ;;  %1031 = vmatpush1.bf16.msra.mxu1 %v6923_v1  ;;  %v7008_v0 = vld [vmem:[#allocation5 + $0x3c0] ss:$16 sps:$4 sm:$0xff]   ;;  %v7011_v1 = vld [vmem:[#allocation5 + $0x3c8] ss:$16 sps:$4 sm:$0xff]  }
  0xad   :  { %959 = vmatprep.subr.bf16.mxu0 %v6926_v3  ;;  %1041 = vmatprep.subr.bf16.mxu1 %v6929_v4  ;;  %v7019_v3 = vld [vmem:[#allocation5 + $0x3ec] ss:$16 sps:$4 sm:$0xff]   ;;  %v1090_v4 = vld [vmem:[#allocation8] sm:$0xff] }
  0xaf   :  { %951 = vmatmul.mubr.bf16.vlgmr.msra.gmra.mrb[0].mxu0 %v124_v5  ;;  %1033 = vmatmul.mubr.bf16.vlgmr.msra.gmra.mrb[0].mxu1 %v124_v5  ;;  %v1094_v5 = vld [vmem:[#allocation8 + $0x20] sm:$0xff] }
  0xb0   :  { %960 = vmatpush1.bf16.msra.mxu0 %v6924_v6  ;;  %1042 = vmatpush1.bf16.msra.mxu1 %v6927_v7  ;;  %v1091_v6 = vld [vmem:[#allocation8 + $0x8] sm:$0xff] }
  0xb1   :  { %961 = vmatprep.subr.bf16.mxu0 %v6932_v8  ;;  %1043 = vmatprep.subr.bf16.mxu1 %v6935_v9  ;;  %v1095_v7 = vld [vmem:[#allocation8 + $0x28] sm:$0xff]  ;;  %v7017_v9 = vld [vmem:[#allocation5 + $0x3e8] ss:$16 sps:$4 sm:$0xff]  }
  0xb2   :  { %991 = vmatprep.mubr.bf16.mxu0 %v127_v31  ;;  %1073 = vmatprep.mubr.bf16.mxu1 %v127_v31  ;;  %v7014_v8 = vld [vmem:[#allocation5 + $0x3e0] ss:$16 sps:$4 sm:$0xff]  }
  0xb3   :  { %v1119_v31 = vld [vmem:[#allocation8 + $0xe8] sm:$0xff] }
  0xb4   :  { %962 = vmatpush1.bf16.msra.mxu0 %v6930_v10  ;;  %1044 = vmatpush1.bf16.msra.mxu1 %v6933_v11  ;;  %v122_v10 = vld [vmem:[#allocation2 + $0x10] sm:$0xff]  ;;  %v1098_v11 = vld [vmem:[#allocation8 + $0x40] sm:$0xff] }
  0xb5   :  { %963 = vmatprep.subr.bf16.mxu0 %v6938_v12  ;;  %1045 = vmatprep.subr.bf16.mxu1 %v6941_v13  ;;  %v1102_v12 = vld [vmem:[#allocation8 + $0x60] sm:$0xff]  ;;  %v1099_v13 = vld [vmem:[#allocation8 + $0x48] sm:$0xff] }
  0xb8   :  { %964 = vmatpush1.bf16.msra.mxu0 %v6936_v14  ;;  %1046 = vmatpush1.bf16.msra.mxu1 %v6939_v15  ;;  %v1103_v14 = vld [vmem:[#allocation8 + $0x68] sm:$0xff]  ;;  %v6113_v15 = vcombine.high %v1090_v4, %v1094_v5 }
  0xb9   :  { %965 = vmatprep.subr.bf16.mxu0 %v6944_v16  ;;  %1047 = vmatprep.subr.bf16.mxu1 %v6947_v17  ;;  %v6115_v16 = vcombine.high %v1091_v6, %v1095_v7  ;;  %v126_v17 = vpack.c.bf16 %v122_v10, %v122_v10 }
  0xbc   :  { %966 = vmatpush1.bf16.msra.mxu0 %v6942_v18  ;;  %1048 = vmatpush1.bf16.msra.mxu1 %v6945_v19  ;;  %v6112_v18 = vcombine.low %v1090_v4, %v1094_v5  ;;  %v6114_v19 = vcombine.low %v1091_v6, %v1095_v7  ;;  %v1154_v4 = vld [vmem:[#allocation8 + $0x200] sm:$0xff]  ;;  %v1155_v6 = vld [vmem:[#allocation8 + $0x208] sm:$0xff] }
  0xbd   :  { %967 = vmatprep.subr.bf16.mxu0 %v6950_v20  ;;  %1049 = vmatprep.subr.bf16.mxu1 %v6953_v21  ;;  %v1106_v20 = vld [vmem:[#allocation8 + $0x80] sm:$0xff]  ;;  %v1159_v7 = vld [vmem:[#allocation8 + $0x228] sm:$0xff] }
  0xbe   :  { %v1110_v21 = vld [vmem:[#allocation8 + $0xa0] sm:$0xff] }
  0xbf   :  { %v1158_v5 = vld [vmem:[#allocation8 + $0x220] sm:$0xff] }
  0xc0   :  { %968 = vmatpush1.bf16.msra.mxu0 %v6948_v22  ;;  %1050 = vmatpush1.bf16.msra.mxu1 %v6951_v23  ;;  %v1107_v22 = vld [vmem:[#allocation8 + $0x88] sm:$0xff] }
  0xc1   :  { %969 = vmatprep.subr.bf16.mxu0 %v6956_v24  ;;  %1051 = vmatprep.subr.bf16.mxu1 %v6959_v25  ;;  %v1111_v23 = vld [vmem:[#allocation8 + $0xa8] sm:$0xff]  ;;  %v6121_v24 = vcombine.high %v1098_v11, %v1102_v12  ;;  %v6123_v25 = vcombine.high %v1099_v13, %v1103_v14 }
  0xc4   :  { %970 = vmatpush1.bf16.msra.mxu0 %v6954_v26  ;;  %1052 = vmatpush1.bf16.msra.mxu1 %v6957_v27  ;;  %v6120_v26 = vcombine.low %v1098_v11, %v1102_v12  ;;  %v6122_v27 = vcombine.low %v1099_v13, %v1103_v14  ;;  %v1162_v12 = vld [vmem:[#allocation8 + $0x240] sm:$0xff]  ;;  %v1163_v14 = vld [vmem:[#allocation8 + $0x248] sm:$0xff] }
  0xc5   :  { %971 = vmatprep.subr.bf16.mxu0 %v6962_v28  ;;  %1053 = vmatprep.subr.bf16.mxu1 %v6965_v29  ;;  %v1114_v28 = vld [vmem:[#allocation8 + $0xc0] sm:$0xff] }
  0xc6   :  { %v1118_v29 = vld [vmem:[#allocation8 + $0xe0] sm:$0xff] }
  0xc7   :  { %v1166_v13 = vld [vmem:[#allocation8 + $0x260] sm:$0xff] }
  0xc8   :  { %972 = vmatpush1.bf16.msra.mxu0 %v6960_v32  ;;  %1054 = vmatpush1.bf16.msra.mxu1 %v6963_v33  ;;  %v6129_v32 = vcombine.high %v1106_v20, %v1110_v21  ;;  %v6131_v33 = vcombine.high %v1107_v22, %v1111_v23 }
  0xc9   :  { %973 = vmatprep.subr.bf16.mxu0 %v6968_v34  ;;  %1055 = vmatprep.subr.bf16.mxu1 %v6971_v35  ;;  %v6128_v34 = vcombine.low %v1106_v20, %v1110_v21  ;;  %v6130_v35 = vcombine.low %v1107_v22, %v1111_v23  ;;  %v1170_v20 = vld [vmem:[#allocation8 + $0x280] sm:$0xff]  ;;  %v1171_v22 = vld [vmem:[#allocation8 + $0x288] sm:$0xff] }
  0xca   :  { %v1174_v21 = vld [vmem:[#allocation8 + $0x2a0] sm:$0xff]  ;;  %v1175_v23 = vld [vmem:[#allocation8 + $0x2a8] sm:$0xff] }
  0xcc   :  { %974 = vmatpush1.bf16.msra.mxu0 %v6966_v36  ;;  %1056 = vmatpush1.bf16.msra.mxu1 %v6969_v37  ;;  %v1122_v36 = vld [vmem:[#allocation8 + $0x100] sm:$0xff] }
  0xcd   :  { %975 = vmatprep.subr.bf16.mxu0 %v6974_v38  ;;  %1057 = vmatprep.subr.bf16.mxu1 %v6977_v39  ;;  %v1126_v37 = vld [vmem:[#allocation8 + $0x120] sm:$0xff]  ;;  %v1123_v38 = vld [vmem:[#allocation8 + $0x108] sm:$0xff] }
  0xce   :  { %v1127_v39 = vld [vmem:[#allocation8 + $0x128] sm:$0xff] }
  0xd0   :  { %976 = vmatpush1.bf16.msra.mxu0 %v6972_v40  ;;  %1058 = vmatpush1.bf16.msra.mxu1 %v6975_v41  ;;  %v6137_v40 = vcombine.high %v1114_v28, %v1118_v29  ;;  %v6139_v41 = vcombine.high %v1115_v30, %v1119_v31 }
  0xd1   :  { %977 = vmatprep.subr.bf16.mxu0 %v6980_v42  ;;  %1059 = vmatprep.subr.bf16.mxu1 %v6983_v43  ;;  %v6136_v42 = vcombine.low %v1114_v28, %v1118_v29  ;;  %v6138_v43 = vcombine.low %v1115_v30, %v1119_v31  ;;  %v1178_v28 = vld [vmem:[#allocation8 + $0x2c0] sm:$0xff]  ;;  %v1179_v30 = vld [vmem:[#allocation8 + $0x2c8] sm:$0xff] }
  0xd2   :  { %v1182_v29 = vld [vmem:[#allocation8 + $0x2e0] sm:$0xff]  ;;  %v1183_v31 = vld [vmem:[#allocation8 + $0x2e8] sm:$0xff] }
  0xd4   :  { %978 = vmatpush1.bf16.msra.mxu0 %v6978_v44  ;;  %1060 = vmatpush1.bf16.msra.mxu1 %v6981_v45  ;;  %v1130_v44 = vld [vmem:[#allocation8 + $0x140] sm:$0xff] }
  0xd5   :  { %979 = vmatprep.subr.bf16.mxu0 %v6986_v46  ;;  %1061 = vmatprep.subr.bf16.mxu1 %v6989_v47  ;;  %v1134_v45 = vld [vmem:[#allocation8 + $0x160] sm:$0xff]  ;;  %v1131_v46 = vld [vmem:[#allocation8 + $0x148] sm:$0xff] }
  0xd6   :  { %v1135_v47 = vld [vmem:[#allocation8 + $0x168] sm:$0xff] }
  0xd8   :  { %980 = vmatpush1.bf16.msra.mxu0 %v6984_v48  ;;  %1062 = vmatpush1.bf16.msra.mxu1 %v6987_v49  ;;  %v6145_v48 = vcombine.high %v1122_v36, %v1126_v37  ;;  %v6147_v49 = vcombine.high %v1123_v38, %v1127_v39 }
  0xd9   :  { %981 = vmatprep.subr.bf16.mxu0 %v6992_v50  ;;  %1063 = vmatprep.subr.bf16.mxu1 %v6995_v51  ;;  %v6144_v50 = vcombine.low %v1122_v36, %v1126_v37  ;;  %v6146_v51 = vcombine.low %v1123_v38, %v1127_v39  ;;  %v1186_v36 = vld [vmem:[#allocation8 + $0x300] sm:$0xff]  ;;  %v1187_v38 = vld [vmem:[#allocation8 + $0x308] sm:$0xff] }
  0xda   :  { %v1190_v37 = vld [vmem:[#allocation8 + $0x320] sm:$0xff]  ;;  %v1191_v39 = vld [vmem:[#allocation8 + $0x328] sm:$0xff] }
  0xdc   :  { %982 = vmatpush1.bf16.msra.mxu0 %v6990_v52  ;;  %1064 = vmatpush1.bf16.msra.mxu1 %v6993_v53  ;;  %v1138_v52 = vld [vmem:[#allocation8 + $0x180] sm:$0xff] }
  0xdd   :  { %983 = vmatprep.subr.bf16.mxu0 %v6998_v54  ;;  %1065 = vmatprep.subr.bf16.mxu1 %v7001_v55  ;;  %v1142_v53 = vld [vmem:[#allocation8 + $0x1a0] sm:$0xff]  ;;  %v1139_v54 = vld [vmem:[#allocation8 + $0x188] sm:$0xff] }
  0xde   :  { %v1143_v55 = vld [vmem:[#allocation8 + $0x1a8] sm:$0xff] }
  0xe0   :  { %984 = vmatpush1.bf16.msra.mxu0 %v6996_v56  ;;  %1066 = vmatpush1.bf16.msra.mxu1 %v6999_v57  ;;  %v6153_v56 = vcombine.high %v1130_v44, %v1134_v45  ;;  %v6155_v57 = vcombine.high %v1131_v46, %v1135_v47 }
  0xe1   :  { %985 = vmatprep.subr.bf16.mxu0 %v7004_v58  ;;  %1067 = vmatprep.subr.bf16.mxu1 %v7007_v59  ;;  %v6152_v58 = vcombine.low %v1130_v44, %v1134_v45  ;;  %v6154_v59 = vcombine.low %v1131_v46, %v1135_v47  ;;  %v1194_v44 = vld [vmem:[#allocation8 + $0x340] sm:$0xff]  ;;  %v1195_v46 = vld [vmem:[#allocation8 + $0x348] sm:$0xff] }
  0xe2   :  { %v1198_v45 = vld [vmem:[#allocation8 + $0x360] sm:$0xff]  ;;  %v1199_v47 = vld [vmem:[#allocation8 + $0x368] sm:$0xff] }
  0xe4   :  { %986 = vmatpush1.bf16.msra.mxu0 %v7002_v60  ;;  %1068 = vmatpush1.bf16.msra.mxu1 %v7005_v61  ;;  %v1146_v60 = vld [vmem:[#allocation8 + $0x1c0] sm:$0xff] }
  0xe5   :  { %987 = vmatprep.subr.bf16.mxu0 %v7010_v62  ;;  %1069 = vmatprep.subr.bf16.mxu1 %v7013_v63  ;;  %v1150_v61 = vld [vmem:[#allocation8 + $0x1e0] sm:$0xff]  ;;  %v1147_v62 = vld [vmem:[#allocation8 + $0x1c8] sm:$0xff] }
  0xe6   :  { %v1151_v63 = vld [vmem:[#allocation8 + $0x1e8] sm:$0xff]  ;;  %v6168_v10 = vcombine.low %v1146_v60, %v1150_v61 }
  0xe7   :  { %v6170_v11 = vcombine.low %v1147_v62, %v1151_v63 }
  0xe8   :  { %988 = vmatpush1.bf16.msra.mxu0 %v7008_v0  ;;  %1070 = vmatpush1.bf16.msra.mxu1 %v7011_v1  ;;  %v6161_v0 = vcombine.high %v1138_v52, %v1142_v53  ;;  %v6163_v1 = vcombine.high %v1139_v54, %v1143_v55 }
  0xe9   :  { %989 = vmatprep.subr.bf16.mxu0 %v7016_v2  ;;  %1071 = vmatprep.subr.bf16.mxu1 %v7019_v3  ;;  %v6160_v2 = vcombine.low %v1138_v52, %v1142_v53  ;;  %v6162_v3 = vcombine.low %v1139_v54, %v1143_v55  ;;  %v1202_v52 = vld [vmem:[#allocation8 + $0x380] sm:$0xff]  ;;  %v1203_v54 = vld [vmem:[#allocation8 + $0x388] sm:$0xff] }
  0xea   :  { %v1206_v53 = vld [vmem:[#allocation8 + $0x3a0] sm:$0xff]  ;;  %v1207_v55 = vld [vmem:[#allocation8 + $0x3a8] sm:$0xff] }
  0xec   :  { %990 = vmatpush1.bf16.msra.mxu0 %v7014_v8  ;;  %1072 = vmatpush1.bf16.msra.mxu1 %v7017_v9  ;;  %v6169_v8 = vcombine.high %v1146_v60, %v1150_v61  ;;  %v6171_v9 = vcombine.high %v1147_v62, %v1151_v63  ;;  %v6225_v60 = vcombine.high %v1202_v52, %v1206_v53 }
  0xed   :  { %2626 = vmatprep.subr.bf16.mxu0 %v6113_v15  ;;  %2708 = vmatprep.subr.bf16.mxu1 %v6115_v16  ;;  %v1167_v15 = vld [vmem:[#allocation8 + $0x268] sm:$0xff]  ;;  %v6177_v16 = vcombine.high %v1154_v4, %v1158_v5  ;;  %v6227_v61 = vcombine.high %v1203_v54, %v1207_v55  ;;  %v6224_v62 = vcombine.low %v1202_v52, %v1206_v53 }
  0xee   :  { %v6226_v63 = vcombine.low %v1203_v54, %v1207_v55 }
  0xef   :  { %992 = vmatmul.mubr.bf16.vlgmr.msra.gmra.mrb[0].mxu0 %v126_v17  ;;  %1074 = vmatmul.mubr.bf16.vlgmr.msra.gmra.mrb[0].mxu1 %v126_v17  ;;  %v6179_v17 = vcombine.high %v1155_v6, %v1159_v7 }
  0xf0   :  { %2627 = vmatpush1.bf16.msra.mxu0 %v6112_v18  ;;  %2709 = vmatpush1.bf16.msra.mxu1 %v6114_v19  ;;  %v6176_v18 = vcombine.low %v1154_v4, %v1158_v5  ;;  %v6178_v19 = vcombine.low %v1155_v6, %v1159_v7  ;;  %v1215_v4 = vld [vmem:[#allocation8 + $0x3e8] sm:$0xff] }
  0xf1   :  { %2628 = vmatprep.subr.bf16.mxu0 %v6121_v24  ;;  %2710 = vmatprep.subr.bf16.mxu1 %v6123_v25  ;;  %v6185_v24 = vcombine.high %v1162_v12, %v1166_v13  ;;  %v6187_v25 = vcombine.high %v1163_v14, %v1167_v15 }
  0xf4   :  { %2629 = vmatpush1.bf16.msra.mxu0 %v6120_v26  ;;  %2711 = vmatpush1.bf16.msra.mxu1 %v6122_v27  ;;  %v6184_v26 = vcombine.low %v1162_v12, %v1166_v13  ;;  %v6186_v27 = vcombine.low %v1163_v14, %v1167_v15  ;;  %v1223_v12 = vld [vmem:[#allocation8 + $0x428] sm:$0xff] }
  0xf5   :  { %2630 = vmatprep.subr.bf16.mxu0 %v6129_v32  ;;  %2712 = vmatprep.subr.bf16.mxu1 %v6131_v33  ;;  %v6193_v32 = vcombine.high %v1170_v20, %v1174_v21  ;;  %v6195_v33 = vcombine.high %v1171_v22, %v1175_v23 }
  0xf8   :  { %2631 = vmatpush1.bf16.msra.mxu0 %v6128_v34  ;;  %2713 = vmatpush1.bf16.msra.mxu1 %v6130_v35  ;;  %v6192_v34 = vcombine.low %v1170_v20, %v1174_v21  ;;  %v6194_v35 = vcombine.low %v1171_v22, %v1175_v23  ;;  %v256_v20 = vld [vmem:[#allocation7] sm:$0xf] }
  0xf9   :  { %2632 = vmatprep.subr.bf16.mxu0 %v6137_v40  ;;  %2714 = vmatprep.subr.bf16.mxu1 %v6139_v41  ;;  %v6201_v40 = vcombine.high %v1178_v28, %v1182_v29  ;;  %v6203_v41 = vcombine.high %v1179_v30, %v1183_v31 }
  0xfc   :  { %2633 = vmatpush1.bf16.msra.mxu0 %v6136_v42  ;;  %2715 = vmatpush1.bf16.msra.mxu1 %v6138_v43  ;;  %v6200_v42 = vcombine.low %v1178_v28, %v1182_v29  ;;  %v6202_v43 = vcombine.low %v1179_v30, %v1183_v31 }
  0xfd   :  { %2634 = vmatprep.subr.bf16.mxu0 %v6145_v48  ;;  %2716 = vmatprep.subr.bf16.mxu1 %v6147_v49  ;;  %v6209_v48 = vcombine.high %v1186_v36, %v1190_v37  ;;  %v6211_v49 = vcombine.high %v1187_v38, %v1191_v39 }
 0x100   :  { %2635 = vmatpush1.bf16.msra.mxu0 %v6144_v50  ;;  %2717 = vmatpush1.bf16.msra.mxu1 %v6146_v51  ;;  %v6208_v50 = vcombine.low %v1186_v36, %v1190_v37  ;;  %v6210_v51 = vcombine.low %v1187_v38, %v1191_v39  ;;  %v1226_v37 = vld [vmem:[#allocation8 + $0x440] sm:$0xff] }
 0x101   :  { %2636 = vmatprep.subr.bf16.mxu0 %v6153_v56  ;;  %2718 = vmatprep.subr.bf16.mxu1 %v6155_v57  ;;  %v6217_v56 = vcombine.high %v1194_v44, %v1198_v45  ;;  %v6219_v57 = vcombine.high %v1195_v46, %v1199_v47 }
 0x104   :  { %2637 = vmatpush1.bf16.msra.mxu0 %v6152_v58  ;;  %2719 = vmatpush1.bf16.msra.mxu1 %v6154_v59  ;;  %v6216_v58 = vcombine.low %v1194_v44, %v1198_v45  ;;  %v6218_v59 = vcombine.low %v1195_v46, %v1199_v47  ;;  %v1234_v45 = vld [vmem:[#allocation8 + $0x480] sm:$0xff] }
 0x105   :  { %2638 = vmatprep.subr.bf16.mxu0 %v6161_v0  ;;  %2720 = vmatprep.subr.bf16.mxu1 %v6163_v1  ;;  %v1210_v0 = vld [vmem:[#allocation8 + $0x3c0] sm:$0xff] }
 0x106   :  { %v1214_v1 = vld [vmem:[#allocation8 + $0x3e0] sm:$0xff] }
 0x107   :  { %v6232_v5 = vcombine.low %v1210_v0, %v1214_v1 }
 0x108   :  { %2639 = vmatpush1.bf16.msra.mxu0 %v6160_v2  ;;  %2721 = vmatpush1.bf16.msra.mxu1 %v6162_v3  ;;  %v1211_v2 = vld [vmem:[#allocation8 + $0x3c8] sm:$0xff]  ;;  %v6233_v3 = vcombine.high %v1210_v0, %v1214_v1  ;;  %v1250_v0 = vld [vmem:[#allocation8 + $0x500] sm:$0xff] }
 0x109   :  { %2640 = vmatprep.subr.bf16.mxu0 %v6169_v8  ;;  %2722 = vmatprep.subr.bf16.mxu1 %v6171_v9  ;;  %v6234_v6 = vcombine.low %v1211_v2, %v1215_v4  ;;  %v6235_v7 = vcombine.high %v1211_v2, %v1215_v4  ;;  %v1218_v8 = vld [vmem:[#allocation8 + $0x400] sm:$0xff]  ;;  %v1251_v2 = vld [vmem:[#allocation8 + $0x508] sm:$0xff] }
 0x10a   :  { %v1222_v9 = vld [vmem:[#allocation8 + $0x420] sm:$0xff] }
 0x10b   :  { %v6240_v13 = vcombine.low %v1218_v8, %v1222_v9  ;;  %v1254_v1 = vld [vmem:[#allocation8 + $0x520] sm:$0xff] }
 0x10c   :  { %2641 = vmatpush1.bf16.msra.mxu0 %v6168_v10  ;;  %2723 = vmatpush1.bf16.msra.mxu1 %v6170_v11  ;;  %v1219_v10 = vld [vmem:[#allocation8 + $0x408] sm:$0xff]  ;;  %v6241_v11 = vcombine.high %v1218_v8, %v1222_v9  ;;  %v1258_v8 = vld [vmem:[#allocation8 + $0x540] sm:$0xff] }
 0x10d   :  { %2642 = vmatprep.subr.bf16.mxu0 %v6177_v16  ;;  %2724 = vmatprep.subr.bf16.mxu1 %v6179_v17  ;;  %v6242_v14 = vcombine.low %v1219_v10, %v1223_v12  ;;  %v6243_v15 = vcombine.high %v1219_v10, %v1223_v12  ;;  %v258_v16 = vlaneseq  ;;  %v1262_v9 = vld [vmem:[#allocation8 + $0x560] sm:$0xff]  ;;  %v1259_v10 = vld [vmem:[#allocation8 + $0x548] sm:$0xff]  ;;  %v6272_v12 = vcombine.low %v1250_v0, %v1254_v1 }
 0x10f   :  { %v7949_v17 = vshrl.u32 %v258_v16, 7  ;;  %v1266_v16 = vld [vmem:[#allocation8 + $0x580] sm:$0xff] }
 0x110   :  { %2643 = vmatpush1.bf16.msra.mxu0 %v6176_v18  ;;  %2725 = vmatpush1.bf16.msra.mxu1 %v6178_v19 }
 0x111   :  { %2644 = vmatprep.subr.bf16.mxu0 %v6185_v24  ;;  %2726 = vmatprep.subr.bf16.mxu1 %v6187_v25  ;;  %v7952_v18 = vsub.s32 0, %v7949_v17  ;;  %v7955_v19 = vsub.s32 2, %v7949_v17  ;;  %v7958_v21 = vsub.s32 1, %v7949_v17  ;;  %v7961_v22 = vsub.s32 3, %v7949_v17 }
 0x113   :  { %v261_v23 = vrot.slane %v256_v20, %v7952_v18  ;;  %v269_v24 = vrot.slane %v256_v20, %v7955_v19  ;;  %v265_v25 = vrot.slane %v256_v20, %v7958_v21 }
 0x114   :  { %2645 = vmatpush1.bf16.msra.mxu0 %v6184_v26  ;;  %2727 = vmatpush1.bf16.msra.mxu1 %v6186_v27  ;;  %v273_v26 = vrot.slane %v256_v20, %v7961_v22  ;;  %v1270_v20 = vld [vmem:[#allocation8 + $0x5a0] sm:$0xff] }
 0x115   :  { %2646 = vmatprep.subr.bf16.mxu0 %v6193_v32  ;;  %2728 = vmatprep.subr.bf16.mxu1 %v6195_v33 }
 0x118   :  { %2647 = vmatpush1.bf16.msra.mxu0 %v6192_v34  ;;  %2729 = vmatpush1.bf16.msra.mxu1 %v6194_v35 }
 0x119   :  { %2648 = vmatprep.subr.bf16.mxu0 %v6201_v40  ;;  %2730 = vmatprep.subr.bf16.mxu1 %v6203_v41  ;;  %v1230_v40 = vld [vmem:[#allocation8 + $0x460] sm:$0xff]  ;;  %v1227_v41 = vld [vmem:[#allocation8 + $0x448] sm:$0xff] }
 0x11a   :  { %v6249_v46 = vcombine.high %v1226_v37, %v1230_v40  ;;  %v6248_v52 = vcombine.low %v1226_v37, %v1230_v40  ;;  %v1283_v40 = vld [vmem:[#allocation8 + $0x608] sm:$0xff] }
 0x11c   :  { %2649 = vmatpush1.bf16.msra.mxu0 %v6200_v42  ;;  %2731 = vmatpush1.bf16.msra.mxu1 %v6202_v43  ;;  %v1231_v42 = vld [vmem:[#allocation8 + $0x468] sm:$0xff] }
 0x11d   :  { %2650 = vmatprep.subr.bf16.mxu0 %v6209_v48  ;;  %2732 = vmatprep.subr.bf16.mxu1 %v6211_v49  ;;  %v6251_v47 = vcombine.high %v1227_v41, %v1231_v42  ;;  %v1238_v48 = vld [vmem:[#allocation8 + $0x4a0] sm:$0xff]  ;;  %v1235_v49 = vld [vmem:[#allocation8 + $0x488] sm:$0xff]  ;;  %v6250_v53 = vcombine.low %v1227_v41, %v1231_v42 }
 0x11e   :  { %v6257_v54 = vcombine.high %v1234_v45, %v1238_v48  ;;  %v1287_v41 = vld [vmem:[#allocation8 + $0x628] sm:$0xff] }
 0x120   :  { %2651 = vmatpush1.bf16.msra.mxu0 %v6208_v50  ;;  %2733 = vmatpush1.bf16.msra.mxu1 %v6210_v51  ;;  %v1239_v50 = vld [vmem:[#allocation8 + $0x4a8] sm:$0xff] }
 0x121   :  { %2652 = vmatprep.subr.bf16.mxu0 %v6217_v56  ;;  %2734 = vmatprep.subr.bf16.mxu1 %v6219_v57  ;;  %v6259_v55 = vcombine.high %v1235_v49, %v1239_v50  ;;  %v1242_v56 = vld [vmem:[#allocation8 + $0x4c0] sm:$0xff] }
 0x122   :  { %v1246_v57 = vld [vmem:[#allocation8 + $0x4e0] sm:$0xff] }
 0x123   :  { %v6264_v4 = vcombine.low %v1242_v56, %v1246_v57 }
 0x124   :  { %2653 = vmatpush1.bf16.msra.mxu0 %v6216_v58  ;;  %2735 = vmatpush1.bf16.msra.mxu1 %v6218_v59  ;;  %v1243_v58 = vld [vmem:[#allocation8 + $0x4c8] sm:$0xff] }
 0x125   :  { %2654 = vmatprep.subr.bf16.mxu0 %v6225_v60  ;;  %2736 = vmatprep.subr.bf16.mxu1 %v6227_v61  ;;  %v1247_v59 = vld [vmem:[#allocation8 + $0x4e8] sm:$0xff]  ;;  %v6256_v60 = vcombine.low %v1234_v45, %v1238_v48  ;;  %v6258_v61 = vcombine.low %v1235_v49, %v1239_v50  ;;  %v1290_v48 = vld [vmem:[#allocation8 + $0x640] sm:$0xff] }
 0x126   :  { %v1294_v49 = vld [vmem:[#allocation8 + $0x660] sm:$0xff]  ;;  %v1291_v50 = vld [vmem:[#allocation8 + $0x648] sm:$0xff] }
 0x128   :  { %2655 = vmatpush1.bf16.msra.mxu0 %v6224_v62  ;;  %2737 = vmatpush1.bf16.msra.mxu1 %v6226_v63  ;;  %v6265_v62 = vcombine.high %v1242_v56, %v1246_v57  ;;  %v6267_v63 = vcombine.high %v1243_v58, %v1247_v59  ;;  %v1298_v57 = vld [vmem:[#allocation8 + $0x680] sm:$0xff] }
 0x129   :  { %2656 = vmatprep.subr.bf16.mxu0 %v6233_v3  ;;  %2738 = vmatprep.subr.bf16.mxu1 %v6235_v7  ;;  %v1255_v3 = vld [vmem:[#allocation8 + $0x528] sm:$0xff] }
 0x12a   :  { %v6275_v7 = vcombine.high %v1251_v2, %v1255_v3 }
 0x12c   :  { %2657 = vmatpush1.bf16.msra.mxu0 %v6232_v5  ;;  %2739 = vmatpush1.bf16.msra.mxu1 %v6234_v6  ;;  %v6266_v5 = vcombine.low %v1243_v58, %v1247_v59  ;;  %v6273_v6 = vcombine.high %v1250_v0, %v1254_v1  ;;  %v1302_v58 = vld [vmem:[#allocation8 + $0x6a0] sm:$0xff]  ;;  %v1299_v59 = vld [vmem:[#allocation8 + $0x688] sm:$0xff] }
 0x12d   :  { %2667 = vmatprep.subr.bf16.mxu0 %v6241_v11  ;;  %2749 = vmatprep.subr.bf16.mxu1 %v6243_v15  ;;  %v1263_v11 = vld [vmem:[#allocation8 + $0x568] sm:$0xff]  ;;  %v1306_v1 = vld [vmem:[#allocation8 + $0x6c0] sm:$0xff] }
 0x12e   :  { %v6283_v15 = vcombine.high %v1259_v10, %v1263_v11 }
 0x1c2   :  { %v993_v27 = vpop.f32.mrb[0].mxu0  ;;  %v1075_v28 = vpop.f32.mrb[0].mxu1 }
 0x1c3   :  { %v6752_v29 = vadd.f32 %v993_v27, %v261_v23  ;;  %v7967_v30 = vadd.f32 %v1075_v28, %v269_v24  ;;  %v995_v31 = vpop.f32.mrb[1].mxu0  ;;  %v1077_v32 = vpop.f32.mrb[1].mxu1  ;;  %v1267_v23 = vld [vmem:[#allocation8 + $0x588] sm:$0xff]  ;;  %v6289_v27 = vcombine.high %v1266_v16, %v1270_v20 }
 0x1c4   :  { %v6753_v33 = vadd.f32 %v995_v31, %v265_v25  ;;  %v6755_v34 = vadd.f32 %v1077_v32, %v273_v26  ;;  %v997_v35 = vpop.f32.mrb[2].mxu0  ;;  %v1079_v36 = vpop.f32.mrb[2].mxu1  ;;  %v1271_v24 = vld [vmem:[#allocation8 + $0x5a8] sm:$0xff]  ;;  %v6280_v25 = vcombine.low %v1258_v8, %v1262_v9  ;;  %v6282_v26 = vcombine.low %v1259_v10, %v1263_v11  ;;  %v1278_v31 = vld [vmem:[#allocation8 + $0x5e0] sm:$0xff] }
 0x1c5   :  { %1082 = vst [vmem:[#allocation13] sm:$0xff] %v6752_v29  ;;  %1084 = vst [vmem:[#allocation13 + $0x10] sm:$0xff] %v7967_v30  ;;  %v998_v38 = vpop.f32.mrb[3].mxu0  ;;  %v1080_v39 = vpop.f32.mrb[3].mxu1  ;;  %v7972_v44 = vpack.c.bf16 %v6752_v29, %v6752_v29  ;;  %v6291_v28 = vcombine.high %v1267_v23, %v1271_v24  ;;  %v1274_v29 = vld [vmem:[#allocation8 + $0x5c0] sm:$0xff]  ;;  %v1275_v32 = vld [vmem:[#allocation8 + $0x5c8] sm:$0xff]  ;;  %v6290_v35 = vcombine.low %v1267_v23, %v1271_v24 }
 0x1c6   :  { %1083 = vst [vmem:[#allocation13 + $0x8] sm:$0xff] %v6753_v33  ;;  %v7970_v43 = vpack.c.bf16 %v6753_v33, %v6753_v33  ;;  %1085 = vst [vmem:[#allocation13 + $0x18] sm:$0xff] %v6755_v34  ;;  %v7976_v51 = vpack.c.bf16 %v6755_v34, %v6755_v34  ;;  %v1279_v33 = vld [vmem:[#allocation8 + $0x5e8] sm:$0xff]  ;;  %v6288_v34 = vcombine.low %v1266_v16, %v1270_v20  ;;  %v1282_v38 = vld [vmem:[#allocation8 + $0x600] sm:$0xff] }
 0x1c7   :  { %v6297_v36 = vcombine.high %v1274_v29, %v1278_v31  ;;  %v6299_v37 = vcombine.high %v1275_v32, %v1279_v33  ;;  %v1286_v39 = vld [vmem:[#allocation8 + $0x620] sm:$0xff]  ;;  %v6296_v42 = vcombine.low %v1274_v29, %v1278_v31  ;;  %v6298_v45 = vcombine.low %v1275_v32, %v1279_v33  ;;  %v1315_v11 = vld [vmem:[#allocation8 + $0x708] sm:$0xff] }
 0x1c8   :  { %2658 = vmatprep.mubr.bf16.mxu0 %v7970_v43  ;;  %2740 = vmatprep.mubr.bf16.mxu1 %v7970_v43  ;;  %v1318_v10 = vld [vmem:[#allocation8 + $0x720] sm:$0xff]  ;;  %v1323_v24 = vld [vmem:[#allocation8 + $0x748] sm:$0xff] }
 0x1c9   :  { %2659 = vmatmul.mubr.bf16.vlgmr.msra.gmra.mrb[4].mxu0 %v7972_v44  ;;  %2741 = vmatmul.mubr.bf16.vlgmr.msra.gmra.mrb[4].mxu1 %v7972_v44  ;;  %v1322_v20 = vld [vmem:[#allocation8 + $0x740] sm:$0xff]  ;;  %v1331_v33 = vld [vmem:[#allocation8 + $0x788] sm:$0xff] }
 0x1ca   :  { %2668 = vmatpush1.bf16.msra.mxu0 %v6240_v13  ;;  %2750 = vmatpush1.bf16.msra.mxu1 %v6242_v14  ;;  %v6274_v13 = vcombine.low %v1251_v2, %v1255_v3  ;;  %v6281_v14 = vcombine.high %v1258_v8, %v1262_v9  ;;  %v1310_v2 = vld [vmem:[#allocation8 + $0x6e0] sm:$0xff]  ;;  %v1307_v3 = vld [vmem:[#allocation8 + $0x6c8] sm:$0xff] }
 0x1cb   :  { %2699 = vmatprep.mubr.bf16.mxu0 %v7976_v51  ;;  %2781 = vmatprep.mubr.bf16.mxu1 %v7976_v51  ;;  %v1314_v9 = vld [vmem:[#allocation8 + $0x700] sm:$0xff] }
 0x1cc   :  { %2669 = vmatprep.subr.bf16.mxu0 %v6249_v46  ;;  %2751 = vmatprep.subr.bf16.mxu1 %v6251_v47  ;;  %v6305_v46 = vcombine.high %v1282_v38, %v1286_v39  ;;  %v6307_v47 = vcombine.high %v1283_v40, %v1287_v41  ;;  %v1326_v23 = vld [vmem:[#allocation8 + $0x760] sm:$0xff] }
 0x1cd   :  { %v1330_v31 = vld [vmem:[#allocation8 + $0x780] sm:$0xff] }
 0x1ce   :  { %2670 = vmatpush1.bf16.msra.mxu0 %v6248_v52  ;;  %2752 = vmatpush1.bf16.msra.mxu1 %v6250_v53  ;;  %v1295_v52 = vld [vmem:[#allocation8 + $0x668] sm:$0xff]  ;;  %v6304_v53 = vcombine.low %v1282_v38, %v1286_v39  ;;  %v1334_v32 = vld [vmem:[#allocation8 + $0x7a0] sm:$0xff] }
 0x1cf   :  { %2671 = vmatprep.subr.bf16.mxu0 %v6257_v54  ;;  %2753 = vmatprep.subr.bf16.mxu1 %v6259_v55  ;;  %v6306_v54 = vcombine.low %v1283_v40, %v1287_v41  ;;  %v6313_v55 = vcombine.high %v1290_v48, %v1294_v49  ;;  %v6315_v56 = vcombine.high %v1291_v50, %v1295_v52  ;;  %v1338_v39 = vld [vmem:[#allocation8 + $0x7c0] sm:$0xff]  ;;  %v1339_v41 = vld [vmem:[#allocation8 + $0x7c8] sm:$0xff] }
 0x1d0   :  { %v1342_v40 = vld [vmem:[#allocation8 + $0x7e0] sm:$0xff] }
 0x1d2   :  { %2672 = vmatpush1.bf16.msra.mxu0 %v6256_v60  ;;  %2754 = vmatpush1.bf16.msra.mxu1 %v6258_v61  ;;  %v1303_v60 = vld [vmem:[#allocation8 + $0x6a8] sm:$0xff]  ;;  %v6312_v61 = vcombine.low %v1290_v48, %v1294_v49  ;;  %v1092_v49 = vld [vmem:[#allocation8 + $0x10] sm:$0xff] }
 0x1d3   :  { %2673 = vmatprep.subr.bf16.mxu0 %v6265_v62  ;;  %2755 = vmatprep.subr.bf16.mxu1 %v6267_v63  ;;  %v6314_v62 = vcombine.low %v1291_v50, %v1295_v52  ;;  %v6321_v63 = vcombine.high %v1298_v57, %v1302_v58  ;;  %v6323_v0 = vcombine.high %v1299_v59, %v1303_v60  ;;  %v1096_v50 = vld [vmem:[#allocation8 + $0x30] sm:$0xff]  ;;  %v1093_v52 = vld [vmem:[#allocation8 + $0x18] sm:$0xff] }
 0x1d6   :  { %2674 = vmatpush1.bf16.msra.mxu0 %v6264_v4  ;;  %2756 = vmatpush1.bf16.msra.mxu1 %v6266_v5  ;;  %v1311_v4 = vld [vmem:[#allocation8 + $0x6e8] sm:$0xff]  ;;  %v6320_v5 = vcombine.low %v1298_v57, %v1302_v58  ;;  %v1100_v58 = vld [vmem:[#allocation8 + $0x50] sm:$0xff] }
 0x1d7   :  { %2675 = vmatprep.subr.bf16.mxu0 %v6273_v6  ;;  %2757 = vmatprep.subr.bf16.mxu1 %v6275_v7  ;;  %v6322_v6 = vcombine.low %v1299_v59, %v1303_v60  ;;  %v6329_v7 = vcombine.high %v1306_v1, %v1310_v2  ;;  %v6331_v8 = vcombine.high %v1307_v3, %v1311_v4  ;;  %v1104_v59 = vld [vmem:[#allocation8 + $0x70] sm:$0xff]  ;;  %v1101_v60 = vld [vmem:[#allocation8 + $0x58] sm:$0xff] }
 0x1da   :  { %2676 = vmatpush1.bf16.msra.mxu0 %v6272_v12  ;;  %2758 = vmatpush1.bf16.msra.mxu1 %v6274_v13  ;;  %v1319_v12 = vld [vmem:[#allocation8 + $0x728] sm:$0xff]  ;;  %v6328_v13 = vcombine.low %v1306_v1, %v1310_v2  ;;  %v6125_v1 = vcombine.high %v1100_v58, %v1104_v59 }
 0x1db   :  { %2677 = vmatprep.subr.bf16.mxu0 %v6281_v14  ;;  %2759 = vmatprep.subr.bf16.mxu1 %v6283_v15  ;;  %v6330_v14 = vcombine.low %v1307_v3, %v1311_v4  ;;  %v6337_v15 = vcombine.high %v1314_v9, %v1318_v10  ;;  %v6339_v16 = vcombine.high %v1315_v11, %v1319_v12  ;;  %v1108_v3 = vld [vmem:[#allocation8 + $0x90] sm:$0xff] }
 0x1dc   :  { %v1112_v4 = vld [vmem:[#allocation8 + $0xb0] sm:$0xff] }
 0x1de   :  { %2678 = vmatpush1.bf16.msra.mxu0 %v6280_v25  ;;  %2760 = vmatpush1.bf16.msra.mxu1 %v6282_v26  ;;  %v1327_v25 = vld [vmem:[#allocation8 + $0x768] sm:$0xff]  ;;  %v6336_v26 = vcombine.low %v1314_v9, %v1318_v10  ;;  %v1116_v10 = vld [vmem:[#allocation8 + $0xd0] sm:$0xff] }
 0x1df   :  { %2679 = vmatprep.subr.bf16.mxu0 %v6289_v27  ;;  %2761 = vmatprep.subr.bf16.mxu1 %v6291_v28  ;;  %v6338_v27 = vcombine.low %v1315_v11, %v1319_v12  ;;  %v6345_v28 = vcombine.high %v1322_v20, %v1326_v23  ;;  %v6347_v29 = vcombine.high %v1323_v24, %v1327_v25  ;;  %v1120_v11 = vld [vmem:[#allocation8 + $0xf0] sm:$0xff]  ;;  %v1117_v12 = vld [vmem:[#allocation8 + $0xd8] sm:$0xff] }
 0x1e2   :  { %2680 = vmatpush1.bf16.msra.mxu0 %v6288_v34  ;;  %2762 = vmatpush1.bf16.msra.mxu1 %v6290_v35  ;;  %v1335_v34 = vld [vmem:[#allocation8 + $0x7a8] sm:$0xff]  ;;  %v6344_v35 = vcombine.low %v1322_v20, %v1326_v23  ;;  %v1124_v23 = vld [vmem:[#allocation8 + $0x110] sm:$0xff] }
 0x1e3   :  { %2681 = vmatprep.subr.bf16.mxu0 %v6297_v36  ;;  %2763 = vmatprep.subr.bf16.mxu1 %v6299_v37  ;;  %v6346_v36 = vcombine.low %v1323_v24, %v1327_v25  ;;  %v6353_v37 = vcombine.high %v1330_v31, %v1334_v32  ;;  %v6355_v38 = vcombine.high %v1331_v33, %v1335_v34  ;;  %v1128_v24 = vld [vmem:[#allocation8 + $0x130] sm:$0xff]  ;;  %v1129_v25 = vld [vmem:[#allocation8 + $0x138] sm:$0xff] }
 0x1e6   :  { %2682 = vmatpush1.bf16.msra.mxu0 %v6296_v42  ;;  %2764 = vmatpush1.bf16.msra.mxu1 %v6298_v45  ;;  %v1343_v42 = vld [vmem:[#allocation8 + $0x7e8] sm:$0xff]  ;;  %v6352_v45 = vcombine.low %v1330_v31, %v1334_v32  ;;  %v1132_v31 = vld [vmem:[#allocation8 + $0x150] sm:$0xff] }
 0x1e7   :  { %2683 = vmatprep.subr.bf16.mxu0 %v6305_v46  ;;  %2765 = vmatprep.subr.bf16.mxu1 %v6307_v47  ;;  %v6354_v46 = vcombine.low %v1331_v33, %v1335_v34  ;;  %v6361_v47 = vcombine.high %v1338_v39, %v1342_v40  ;;  %v6363_v48 = vcombine.high %v1339_v41, %v1343_v42  ;;  %v1136_v32 = vld [vmem:[#allocation8 + $0x170] sm:$0xff]  ;;  %v1133_v33 = vld [vmem:[#allocation8 + $0x158] sm:$0xff] }
 0x1e8   :  { %v1137_v34 = vld [vmem:[#allocation8 + $0x178] sm:$0xff] }
 0x1ea   :  { %2684 = vmatpush1.bf16.msra.mxu0 %v6304_v53  ;;  %2766 = vmatpush1.bf16.msra.mxu1 %v6306_v54  ;;  %v1097_v53 = vld [vmem:[#allocation8 + $0x38] sm:$0xff]  ;;  %v6360_v54 = vcombine.low %v1338_v39, %v1342_v40  ;;  %v1140_v39 = vld [vmem:[#allocation8 + $0x190] sm:$0xff] }
 0x1eb   :  { %2685 = vmatprep.subr.bf16.mxu0 %v6313_v55  ;;  %2767 = vmatprep.subr.bf16.mxu1 %v6315_v56  ;;  %v6362_v55 = vcombine.low %v1339_v41, %v1343_v42  ;;  %v6117_v56 = vcombine.high %v1092_v49, %v1096_v50  ;;  %v6119_v57 = vcombine.high %v1093_v52, %v1097_v53  ;;  %v1144_v40 = vld [vmem:[#allocation8 + $0x1b0] sm:$0xff]  ;;  %v1141_v41 = vld [vmem:[#allocation8 + $0x198] sm:$0xff] }
 0x1ec   :  { %v1145_v42 = vld [vmem:[#allocation8 + $0x1b8] sm:$0xff] }
 0x1ee   :  { %2686 = vmatpush1.bf16.msra.mxu0 %v6312_v61  ;;  %2768 = vmatpush1.bf16.msra.mxu1 %v6314_v62  ;;  %v1105_v61 = vld [vmem:[#allocation8 + $0x78] sm:$0xff]  ;;  %v6116_v62 = vcombine.low %v1092_v49, %v1096_v50  ;;  %v1148_v49 = vld [vmem:[#allocation8 + $0x1d0] sm:$0xff] }
 0x1ef   :  { %2687 = vmatprep.subr.bf16.mxu0 %v6321_v63  ;;  %2769 = vmatprep.subr.bf16.mxu1 %v6323_v0  ;;  %v7984_v63 = vpack.c.bf16 %v7967_v30, %v7967_v30  ;;  %v6118_v0 = vcombine.low %v1093_v52, %v1097_v53  ;;  %v6127_v2 = vcombine.high %v1101_v60, %v1105_v61  ;;  %v1152_v50 = vld [vmem:[#allocation8 + $0x1f0] sm:$0xff]  ;;  %v1149_v52 = vld [vmem:[#allocation8 + $0x1d8] sm:$0xff] }
 0x1f0   :  { %v6126_v30 = vcombine.low %v1101_v60, %v1105_v61  ;;  %v1153_v53 = vld [vmem:[#allocation8 + $0x1f8] sm:$0xff] }
 0x1f1   :  { %v1157_v60 = vld [vmem:[#allocation8 + $0x218] sm:$0xff] }
 0x1f2   :  { %2688 = vmatpush1.bf16.msra.mxu0 %v6320_v5  ;;  %2770 = vmatpush1.bf16.msra.mxu1 %v6322_v6  ;;  %v1109_v5 = vld [vmem:[#allocation8 + $0x98] sm:$0xff] }
 0x1f3   :  { %2689 = vmatprep.subr.bf16.mxu0 %v6329_v7  ;;  %2771 = vmatprep.subr.bf16.mxu1 %v6331_v8  ;;  %v1113_v6 = vld [vmem:[#allocation8 + $0xb8] sm:$0xff]  ;;  %v6124_v7 = vcombine.low %v1100_v58, %v1104_v59  ;;  %v6133_v8 = vcombine.high %v1108_v3, %v1112_v4  ;;  %v1156_v58 = vld [vmem:[#allocation8 + $0x210] sm:$0xff] }
 0x1f4   :  { %v6135_v9 = vcombine.high %v1109_v5, %v1113_v6  ;;  %v1160_v59 = vld [vmem:[#allocation8 + $0x230] sm:$0xff]  ;;  %v1161_v61 = vld [vmem:[#allocation8 + $0x238] sm:$0xff] }
 0x1f6   :  { %2690 = vmatpush1.bf16.msra.mxu0 %v6328_v13  ;;  %2772 = vmatpush1.bf16.msra.mxu1 %v6330_v14  ;;  %v1121_v13 = vld [vmem:[#allocation8 + $0xf8] sm:$0xff]  ;;  %v6132_v14 = vcombine.low %v1108_v3, %v1112_v4  ;;  %v1164_v3 = vld [vmem:[#allocation8 + $0x250] sm:$0xff] }
 0x1f7   :  { %2691 = vmatprep.subr.bf16.mxu0 %v6337_v15  ;;  %2773 = vmatprep.subr.bf16.mxu1 %v6339_v16  ;;  %v6134_v15 = vcombine.low %v1109_v5, %v1113_v6  ;;  %v6141_v16 = vcombine.high %v1116_v10, %v1120_v11  ;;  %v6143_v20 = vcombine.high %v1117_v12, %v1121_v13  ;;  %v1168_v4 = vld [vmem:[#allocation8 + $0x270] sm:$0xff]  ;;  %v1165_v5 = vld [vmem:[#allocation8 + $0x258] sm:$0xff] }
 0x1f8   :  { %v1169_v6 = vld [vmem:[#allocation8 + $0x278] sm:$0xff] }
 0x1fa   :  { %2692 = vmatpush1.bf16.msra.mxu0 %v6336_v26  ;;  %2774 = vmatpush1.bf16.msra.mxu1 %v6338_v27  ;;  %v6140_v26 = vcombine.low %v1116_v10, %v1120_v11  ;;  %v6142_v27 = vcombine.low %v1117_v12, %v1121_v13  ;;  %v1172_v10 = vld [vmem:[#allocation8 + $0x290] sm:$0xff]  ;;  %v1173_v12 = vld [vmem:[#allocation8 + $0x298] sm:$0xff] }
 0x1fb   :  { %2693 = vmatprep.subr.bf16.mxu0 %v6345_v28  ;;  %2775 = vmatprep.subr.bf16.mxu1 %v6347_v29  ;;  %v6149_v28 = vcombine.high %v1124_v23, %v1128_v24  ;;  %v1176_v11 = vld [vmem:[#allocation8 + $0x2b0] sm:$0xff]  ;;  %v1177_v13 = vld [vmem:[#allocation8 + $0x2b8] sm:$0xff] }
 0x1fe   :  { %2694 = vmatpush1.bf16.msra.mxu0 %v6344_v35  ;;  %2776 = vmatpush1.bf16.msra.mxu1 %v6346_v36  ;;  %v6148_v35 = vcombine.low %v1124_v23, %v1128_v24  ;;  %v1180_v23 = vld [vmem:[#allocation8 + $0x2d0] sm:$0xff] }
 0x1ff   :  { %2695 = vmatprep.subr.bf16.mxu0 %v6353_v37  ;;  %2777 = vmatprep.subr.bf16.mxu1 %v6355_v38  ;;  %v6157_v37 = vcombine.high %v1132_v31, %v1136_v32  ;;  %v6159_v38 = vcombine.high %v1133_v33, %v1137_v34  ;;  %v1184_v24 = vld [vmem:[#allocation8 + $0x2f0] sm:$0xff] }
 0x202   :  { %2696 = vmatpush1.bf16.msra.mxu0 %v6352_v45  ;;  %2778 = vmatpush1.bf16.msra.mxu1 %v6354_v46  ;;  %v6156_v45 = vcombine.low %v1132_v31, %v1136_v32  ;;  %v6158_v46 = vcombine.low %v1133_v33, %v1137_v34  ;;  %v1188_v31 = vld [vmem:[#allocation8 + $0x310] sm:$0xff]  ;;  %v1189_v33 = vld [vmem:[#allocation8 + $0x318] sm:$0xff] }
 0x203   :  { %2697 = vmatprep.subr.bf16.mxu0 %v6361_v47  ;;  %2779 = vmatprep.subr.bf16.mxu1 %v6363_v48  ;;  %v6165_v47 = vcombine.high %v1140_v39, %v1144_v40  ;;  %v6167_v48 = vcombine.high %v1141_v41, %v1145_v42  ;;  %v1192_v32 = vld [vmem:[#allocation8 + $0x330] sm:$0xff]  ;;  %v1193_v34 = vld [vmem:[#allocation8 + $0x338] sm:$0xff] }
 0x206   :  { %2698 = vmatpush1.bf16.msra.mxu0 %v6360_v54  ;;  %2780 = vmatpush1.bf16.msra.mxu1 %v6362_v55  ;;  %v6164_v54 = vcombine.low %v1140_v39, %v1144_v40  ;;  %v6166_v55 = vcombine.low %v1141_v41, %v1145_v42  ;;  %v1196_v39 = vld [vmem:[#allocation8 + $0x350] sm:$0xff]  ;;  %v1197_v41 = vld [vmem:[#allocation8 + $0x358] sm:$0xff] }
 0x207   :  { %2790 = vmatprep.subr.bf16.mxu0 %v6117_v56  ;;  %2872 = vmatprep.subr.bf16.mxu1 %v6119_v57  ;;  %v6173_v56 = vcombine.high %v1148_v49, %v1152_v50  ;;  %v6175_v57 = vcombine.high %v1149_v52, %v1153_v53  ;;  %v1200_v40 = vld [vmem:[#allocation8 + $0x370] sm:$0xff]  ;;  %v1201_v42 = vld [vmem:[#allocation8 + $0x378] sm:$0xff] }
 0x209   :  { %2700 = vmatmul.mubr.bf16.vlgmr.msra.gmra.mrb[4].mxu0 %v7984_v63  ;;  %2782 = vmatmul.mubr.bf16.vlgmr.msra.gmra.mrb[4].mxu1 %v7984_v63 }
 0x20a   :  { %2791 = vmatpush1.bf16.msra.mxu0 %v6116_v62  ;;  %2822 = vmatprep.mubr.bf16.mxu0 %v7970_v43  ;;  %v6172_v62 = vcombine.low %v1148_v49, %v1152_v50  ;;  %v1204_v49 = vld [vmem:[#allocation8 + $0x390] sm:$0xff] }
 0x20b   :  { %2873 = vmatpush1.bf16.msra.mxu1 %v6118_v0  ;;  %2904 = vmatprep.mubr.bf16.mxu1 %v7970_v43  ;;  %v1125_v43 = vld [vmem:[#allocation8 + $0x118] sm:$0xff]  ;;  %v6174_v0 = vcombine.low %v1149_v52, %v1153_v53  ;;  %v1208_v50 = vld [vmem:[#allocation8 + $0x3b0] sm:$0xff] }
 0x20c   :  { %2792 = vmatprep.subr.bf16.mxu0 %v6125_v1  ;;  %2874 = vmatprep.subr.bf16.mxu1 %v6127_v2  ;;  %v6151_v29 = vcombine.high %v1125_v43, %v1129_v25  ;;  %v6150_v36 = vcombine.low %v1125_v43, %v1129_v25  ;;  %v6181_v1 = vcombine.high %v1156_v58, %v1160_v59  ;;  %v1181_v43 = vld [vmem:[#allocation8 + $0x2d8] sm:$0xff] }
 0x20d   :  { %v6183_v2 = vcombine.high %v1157_v60, %v1161_v61  ;;  %v1185_v25 = vld [vmem:[#allocation8 + $0x2f8] sm:$0xff] }
 0x20e   :  { %2793 = vmatpush1.bf16.msra.mxu0 %v6124_v7  ;;  %v6180_v7 = vcombine.low %v1156_v58, %v1160_v59  ;;  %v1205_v52 = vld [vmem:[#allocation8 + $0x398] sm:$0xff]  ;;  %v1212_v58 = vld [vmem:[#allocation8 + $0x3d0] sm:$0xff] }
 0x20f   :  { %2875 = vmatpush1.bf16.msra.mxu1 %v6126_v30  ;;  %2794 = vmatprep.subr.bf16.mxu0 %v6133_v8  ;;  %v6182_v30 = vcombine.low %v1157_v60, %v1161_v61  ;;  %v6189_v8 = vcombine.high %v1164_v3, %v1168_v4  ;;  %v1209_v53 = vld [vmem:[#allocation8 + $0x3b8] sm:$0xff]  ;;  %v1216_v59 = vld [vmem:[#allocation8 + $0x3f0] sm:$0xff] }
 0x210   :  { %2876 = vmatprep.subr.bf16.mxu1 %v6135_v9  ;;  %v6191_v9 = vcombine.high %v1165_v5, %v1169_v6  ;;  %v1213_v60 = vld [vmem:[#allocation8 + $0x3d8] sm:$0xff] }
 0x211   :  { %v1217_v61 = vld [vmem:[#allocation8 + $0x3f8] sm:$0xff] }
 0x212   :  { %2795 = vmatpush1.bf16.msra.mxu0 %v6132_v14  ;;  %v6188_v14 = vcombine.low %v1164_v3, %v1168_v4  ;;  %v1220_v3 = vld [vmem:[#allocation8 + $0x410] sm:$0xff] }
 0x213   :  { %2877 = vmatpush1.bf16.msra.mxu1 %v6134_v15  ;;  %2796 = vmatprep.subr.bf16.mxu0 %v6141_v16  ;;  %v6190_v15 = vcombine.low %v1165_v5, %v1169_v6  ;;  %v6197_v16 = vcombine.high %v1172_v10, %v1176_v11  ;;  %v1224_v4 = vld [vmem:[#allocation8 + $0x430] sm:$0xff]  ;;  %v1221_v5 = vld [vmem:[#allocation8 + $0x418] sm:$0xff] }
 0x214   :  { %2878 = vmatprep.subr.bf16.mxu1 %v6143_v20  ;;  %v6199_v20 = vcombine.high %v1173_v12, %v1177_v13  ;;  %v1225_v6 = vld [vmem:[#allocation8 + $0x438] sm:$0xff] }
 0x216   :  { %2797 = vmatpush1.bf16.msra.mxu0 %v6140_v26  ;;  %v6196_v26 = vcombine.low %v1172_v10, %v1176_v11  ;;  %v1228_v10 = vld [vmem:[#allocation8 + $0x450] sm:$0xff] }
 0x217   :  { %2879 = vmatpush1.bf16.msra.mxu1 %v6142_v27  ;;  %2798 = vmatprep.subr.bf16.mxu0 %v6149_v28  ;;  %v6198_v27 = vcombine.low %v1173_v12, %v1177_v13  ;;  %v6205_v28 = vcombine.high %v1180_v23, %v1184_v24  ;;  %v1232_v11 = vld [vmem:[#allocation8 + $0x470] sm:$0xff]  ;;  %v6244_v12 = vcombine.low %v1220_v3, %v1224_v4  ;;  %v1229_v13 = vld [vmem:[#allocation8 + $0x458] sm:$0xff] }
 0x218   :  { %2880 = vmatprep.subr.bf16.mxu1 %v6151_v29  ;;  %v6207_v29 = vcombine.high %v1181_v43, %v1185_v25 }
 0x21a   :  { %2799 = vmatpush1.bf16.msra.mxu0 %v6148_v35  ;;  %v6204_v35 = vcombine.low %v1180_v23, %v1184_v24  ;;  %v1240_v23 = vld [vmem:[#allocation8 + $0x4b0] sm:$0xff] }
 0x21b   :  { %2881 = vmatpush1.bf16.msra.mxu1 %v6150_v36  ;;  %2800 = vmatprep.subr.bf16.mxu0 %v6157_v37  ;;  %v6206_v36 = vcombine.low %v1181_v43, %v1185_v25  ;;  %v6213_v37 = vcombine.high %v1188_v31, %v1192_v32  ;;  %v1237_v43 = vld [vmem:[#allocation8 + $0x498] sm:$0xff] }
 0x21c   :  { %2882 = vmatprep.subr.bf16.mxu1 %v6159_v38  ;;  %v6215_v38 = vcombine.high %v1189_v33, %v1193_v34  ;;  %v1241_v25 = vld [vmem:[#allocation8 + $0x4b8] sm:$0xff] }
 0x21e   :  { %2801 = vmatpush1.bf16.msra.mxu0 %v6156_v45  ;;  %v6212_v45 = vcombine.low %v1188_v31, %v1192_v32  ;;  %v1244_v31 = vld [vmem:[#allocation8 + $0x4d0] sm:$0xff] }
 0x21f   :  { %2883 = vmatpush1.bf16.msra.mxu1 %v6158_v46  ;;  %2802 = vmatprep.subr.bf16.mxu0 %v6165_v47  ;;  %v6214_v46 = vcombine.low %v1189_v33, %v1193_v34  ;;  %v6221_v47 = vcombine.high %v1196_v39, %v1200_v40  ;;  %v1248_v32 = vld [vmem:[#allocation8 + $0x4f0] sm:$0xff]  ;;  %v1245_v33 = vld [vmem:[#allocation8 + $0x4d8] sm:$0xff] }
 0x220   :  { %2884 = vmatprep.subr.bf16.mxu1 %v6167_v48  ;;  %v6223_v48 = vcombine.high %v1197_v41, %v1201_v42  ;;  %v1249_v34 = vld [vmem:[#allocation8 + $0x4f8] sm:$0xff] }
 0x222   :  { %2803 = vmatpush1.bf16.msra.mxu0 %v6164_v54  ;;  %v6220_v54 = vcombine.low %v1196_v39, %v1200_v40  ;;  %v1256_v39 = vld [vmem:[#allocation8 + $0x530] sm:$0xff]  ;;  %v1253_v40 = vld [vmem:[#allocation8 + $0x518] sm:$0xff] }
 0x223   :  { %2885 = vmatpush1.bf16.msra.mxu1 %v6166_v55  ;;  %2804 = vmatprep.subr.bf16.mxu0 %v6173_v56  ;;  %v6222_v55 = vcombine.low %v1197_v41, %v1201_v42  ;;  %v6229_v56 = vcombine.high %v1204_v49, %v1208_v50  ;;  %v1257_v41 = vld [vmem:[#allocation8 + $0x538] sm:$0xff]  ;;  %v6270_v42 = vcombine.low %v1245_v33, %v1249_v34 }
 0x224   :  { %2886 = vmatprep.subr.bf16.mxu1 %v6175_v57  ;;  %v6231_v57 = vcombine.high %v1205_v52, %v1209_v53 }
 0x226   :  { %2805 = vmatpush1.bf16.msra.mxu0 %v6172_v62  ;;  %v6228_v62 = vcombine.low %v1204_v49, %v1208_v50  ;;  %v1261_v49 = vld [vmem:[#allocation8 + $0x558] sm:$0xff] }
 0x227   :  { %2887 = vmatpush1.bf16.msra.mxu1 %v6174_v0  ;;  %2806 = vmatprep.subr.bf16.mxu0 %v6181_v1  ;;  %v6230_v0 = vcombine.low %v1205_v52, %v1209_v53  ;;  %v6237_v1 = vcombine.high %v1212_v58, %v1216_v59  ;;  %v1265_v50 = vld [vmem:[#allocation8 + $0x578] sm:$0xff]  ;;  %v6278_v53 = vcombine.low %v1253_v40, %v1257_v41 }
 0x228   :  { %2888 = vmatprep.subr.bf16.mxu1 %v6183_v2  ;;  %v6239_v2 = vcombine.high %v1213_v60, %v1217_v61 }
 0x22a   :  { %2807 = vmatpush1.bf16.msra.mxu0 %v6180_v7  ;;  %v6236_v7 = vcombine.low %v1212_v58, %v1216_v59  ;;  %v1269_v58 = vld [vmem:[#allocation8 + $0x598] sm:$0xff] }
 0x22b   :  { %2889 = vmatpush1.bf16.msra.mxu1 %v6182_v30  ;;  %2808 = vmatprep.subr.bf16.mxu0 %v6189_v8  ;;  %v6238_v30 = vcombine.low %v1213_v60, %v1217_v61  ;;  %v6245_v8 = vcombine.high %v1220_v3, %v1224_v4  ;;  %v1273_v59 = vld [vmem:[#allocation8 + $0x5b8] sm:$0xff]  ;;  %v6286_v61 = vcombine.low %v1261_v49, %v1265_v50 }
 0x22c   :  { %2890 = vmatprep.subr.bf16.mxu1 %v6191_v9  ;;  %v6247_v9 = vcombine.high %v1221_v5, %v1225_v6  ;;  %v1277_v3 = vld [vmem:[#allocation8 + $0x5d8] sm:$0xff] }
 0x22d   :  { %v1281_v4 = vld [vmem:[#allocation8 + $0x5f8] sm:$0xff] }
 0x22e   :  { %2809 = vmatpush1.bf16.msra.mxu0 %v6188_v14  ;;  %v1233_v14 = vld [vmem:[#allocation8 + $0x478] sm:$0xff] }
 0x22f   :  { %2891 = vmatpush1.bf16.msra.mxu1 %v6190_v15  ;;  %2810 = vmatprep.subr.bf16.mxu0 %v6197_v16  ;;  %v6246_v15 = vcombine.low %v1221_v5, %v1225_v6  ;;  %v6253_v16 = vcombine.high %v1228_v10, %v1232_v11  ;;  %v6255_v24 = vcombine.high %v1229_v13, %v1233_v14 }
 0x230   :  { %2892 = vmatprep.subr.bf16.mxu1 %v6199_v20  ;;  %v1236_v20 = vld [vmem:[#allocation8 + $0x490] sm:$0xff]  ;;  %v6294_v6 = vcombine.low %v1269_v58, %v1273_v59 }
 0x232   :  { %2811 = vmatpush1.bf16.msra.mxu0 %v6196_v26  ;;  %v6252_v26 = vcombine.low %v1228_v10, %v1232_v11  ;;  %v1285_v10 = vld [vmem:[#allocation8 + $0x618] sm:$0xff] }
 0x233   :  { %2893 = vmatpush1.bf16.msra.mxu1 %v6198_v27  ;;  %2812 = vmatprep.subr.bf16.mxu0 %v6205_v28  ;;  %v6254_v27 = vcombine.low %v1229_v13, %v1233_v14  ;;  %v6261_v28 = vcombine.high %v1236_v20, %v1240_v23  ;;  %v1289_v11 = vld [vmem:[#allocation8 + $0x638] sm:$0xff]  ;;  %v6302_v13 = vcombine.low %v1277_v3, %v1281_v4 }
 0x234   :  { %2894 = vmatprep.subr.bf16.mxu1 %v6207_v29  ;;  %v6263_v29 = vcombine.high %v1237_v43, %v1241_v25 }
 0x236   :  { %2813 = vmatpush1.bf16.msra.mxu0 %v6204_v35  ;;  %v6260_v35 = vcombine.low %v1236_v20, %v1240_v23  ;;  %v1296_v20 = vld [vmem:[#allocation8 + $0x670] sm:$0xff]  ;;  %v1293_v23 = vld [vmem:[#allocation8 + $0x658] sm:$0xff] }
 0x237   :  { %2895 = vmatpush1.bf16.msra.mxu1 %v6206_v36  ;;  %2814 = vmatprep.subr.bf16.mxu0 %v6213_v37  ;;  %v6269_v36 = vcombine.high %v1244_v31, %v1248_v32  ;;  %v6271_v37 = vcombine.high %v1245_v33, %v1249_v34 }
 0x238   :  { %2896 = vmatprep.subr.bf16.mxu1 %v6215_v38  ;;  %v1252_v38 = vld [vmem:[#allocation8 + $0x510] sm:$0xff] }
 0x239   :  { %v6276_v52 = vcombine.low %v1252_v38, %v1256_v39 }
 0x23a   :  { %2815 = vmatpush1.bf16.msra.mxu0 %v6212_v45  ;;  %v6277_v45 = vcombine.high %v1252_v38, %v1256_v39  ;;  %v1309_v38 = vld [vmem:[#allocation8 + $0x6d8] sm:$0xff] }
 0x23b   :  { %2897 = vmatpush1.bf16.msra.mxu1 %v6214_v46  ;;  %2816 = vmatprep.subr.bf16.mxu0 %v6221_v47  ;;  %v6279_v46 = vcombine.high %v1253_v40, %v1257_v41  ;;  %v1260_v47 = vld [vmem:[#allocation8 + $0x550] sm:$0xff]  ;;  %v1313_v39 = vld [vmem:[#allocation8 + $0x6f8] sm:$0xff] }
 0x23c   :  { %2898 = vmatprep.subr.bf16.mxu1 %v6223_v48  ;;  %v1264_v48 = vld [vmem:[#allocation8 + $0x570] sm:$0xff] }
 0x23d   :  { %v6284_v60 = vcombine.low %v1260_v47, %v1264_v48 }
 0x23e   :  { %2817 = vmatpush1.bf16.msra.mxu0 %v6220_v54  ;;  %v6285_v54 = vcombine.high %v1260_v47, %v1264_v48  ;;  %v1317_v47 = vld [vmem:[#allocation8 + $0x718] sm:$0xff] }
 0x23f   :  { %2899 = vmatpush1.bf16.msra.mxu1 %v6222_v55  ;;  %2818 = vmatprep.subr.bf16.mxu0 %v6229_v56  ;;  %v6287_v55 = vcombine.high %v1261_v49, %v1265_v50  ;;  %v1268_v56 = vld [vmem:[#allocation8 + $0x590] sm:$0xff]  ;;  %v1321_v48 = vld [vmem:[#allocation8 + $0x738] sm:$0xff]  ;;  %v6334_v50 = vcombine.low %v1309_v38, %v1313_v39 }
 0x240   :  { %2900 = vmatprep.subr.bf16.mxu1 %v6231_v57  ;;  %v1272_v57 = vld [vmem:[#allocation8 + $0x5b0] sm:$0xff] }
 0x241   :  { %v6292_v5 = vcombine.low %v1268_v56, %v1272_v57 }
 0x242   :  { %2819 = vmatpush1.bf16.msra.mxu0 %v6228_v62  ;;  %v6293_v62 = vcombine.high %v1268_v56, %v1272_v57  ;;  %v1325_v56 = vld [vmem:[#allocation8 + $0x758] sm:$0xff] }
 0x243   :  { %2901 = vmatpush1.bf16.msra.mxu1 %v6230_v0  ;;  %2820 = vmatprep.subr.bf16.mxu0 %v6237_v1  ;;  %v6295_v0 = vcombine.high %v1269_v58, %v1273_v59  ;;  %v1276_v1 = vld [vmem:[#allocation8 + $0x5d0] sm:$0xff]  ;;  %v1329_v57 = vld [vmem:[#allocation8 + $0x778] sm:$0xff]  ;;  %v6342_v59 = vcombine.low %v1317_v47, %v1321_v48 }
 0x244   :  { %2902 = vmatprep.subr.bf16.mxu1 %v6239_v2  ;;  %v1280_v2 = vld [vmem:[#allocation8 + $0x5f0] sm:$0xff] }
 0x246   :  { %2821 = vmatpush1.bf16.msra.mxu0 %v6236_v7  ;;  %v6301_v7 = vcombine.high %v1276_v1, %v1280_v2 }
 0x247   :  { %2903 = vmatpush1.bf16.msra.mxu1 %v6238_v30  ;;  %2831 = vmatprep.subr.bf16.mxu0 %v6245_v8  ;;  %v6303_v30 = vcombine.high %v1277_v3, %v1281_v4  ;;  %v1284_v8 = vld [vmem:[#allocation8 + $0x610] sm:$0xff]  ;;  %v6350_v4 = vcombine.low %v1325_v56, %v1329_v57 }
 0x248   :  { %2913 = vmatprep.subr.bf16.mxu1 %v6247_v9  ;;  %v1288_v9 = vld [vmem:[#allocation8 + $0x630] sm:$0xff] }
 0x249   :  { %2823 = vmatmul.mubr.bf16.vlgmr.msra.gmra.mrb[8].mxu0 %v7972_v44  ;;  %v6309_v14 = vcombine.high %v1284_v8, %v1288_v9 }
 0x24a   :  { %2905 = vmatmul.mubr.bf16.vlgmr.msra.gmra.mrb[8].mxu1 %v7972_v44  ;;  %2832 = vmatpush1.bf16.msra.mxu0 %v6244_v12  ;;  %v6262_v44 = vcombine.low %v1237_v43, %v1241_v25  ;;  %v6300_v12 = vcombine.low %v1276_v1, %v1280_v2  ;;  %v6308_v43 = vcombine.low %v1284_v8, %v1288_v9  ;;  %v1333_v1 = vld [vmem:[#allocation8 + $0x798] sm:$0xff] }
 0x24b   :  { %2863 = vmatprep.mubr.bf16.mxu0 %v7976_v51  ;;  %2914 = vmatpush1.bf16.msra.mxu1 %v6246_v15  ;;  %v6311_v15 = vcombine.high %v1285_v10, %v1289_v11  ;;  %v6310_v25 = vcombine.low %v1285_v10, %v1289_v11  ;;  %v1337_v2 = vld [vmem:[#allocation8 + $0x7b8] sm:$0xff] }
 0x24c   :  { %2945 = vmatprep.mubr.bf16.mxu1 %v7976_v51  ;;  %2833 = vmatprep.subr.bf16.mxu0 %v6253_v16  ;;  %v6268_v51 = vcombine.low %v1244_v31, %v1248_v32  ;;  %v1292_v16 = vld [vmem:[#allocation8 + $0x650] sm:$0xff]  ;;  %v1301_v31 = vld [vmem:[#allocation8 + $0x698] sm:$0xff]  ;;  %v6358_v11 = vcombine.low %v1333_v1, %v1337_v2 }
 0x24d   :  { %2915 = vmatprep.subr.bf16.mxu1 %v6255_v24  ;;  %v1297_v24 = vld [vmem:[#allocation8 + $0x678] sm:$0xff]  ;;  %v6316_v33 = vcombine.low %v1292_v16, %v1296_v20 }
 0x24e   :  { %2834 = vmatpush1.bf16.msra.mxu0 %v6252_v26  ;;  %v6317_v26 = vcombine.high %v1292_v16, %v1296_v20  ;;  %v1305_v32 = vld [vmem:[#allocation8 + $0x6b8] sm:$0xff]  ;;  %v6318_v34 = vcombine.low %v1293_v23, %v1297_v24  ;;  %v7022_v16 = vld [vmem:[#allocation10 + $0x4] ss:$16 sps:$4 sm:$0xff]  }
 0x24f   :  { %2916 = vmatpush1.bf16.msra.mxu1 %v6254_v27  ;;  %2835 = vmatprep.subr.bf16.mxu0 %v6261_v28  ;;  %v6319_v27 = vcombine.high %v1293_v23, %v1297_v24  ;;  %v1300_v28 = vld [vmem:[#allocation8 + $0x690] sm:$0xff]  ;;  %v6326_v41 = vcombine.low %v1301_v31, %v1305_v32  ;;  %v1341_v8 = vld [vmem:[#allocation8 + $0x7d8] sm:$0xff] }
 0x250   :  { %2917 = vmatprep.subr.bf16.mxu1 %v6263_v29  ;;  %v1304_v29 = vld [vmem:[#allocation8 + $0x6b0] sm:$0xff]  ;;  %v1345_v9 = vld [vmem:[#allocation8 + $0x7f8] sm:$0xff] }
 0x251   :  { %v6324_v40 = vcombine.low %v1300_v28, %v1304_v29  ;;  %v7025_v20 = vld [vmem:[#allocation10 + $0xc] ss:$16 sps:$4 sm:$0xff]   ;;  %v7020_v23 = vld [vmem:[#allocation10] ss:$16 sps:$4 sm:$0xff]   ;;  %v7023_v24 = vld [vmem:[#allocation10 + $0x8] ss:$16 sps:$4 sm:$0xff]  }
 0x252   :  { %2836 = vmatpush1.bf16.msra.mxu0 %v6260_v35  ;;  %v6325_v35 = vcombine.high %v1300_v28, %v1304_v29  ;;  %v7034_v28 = vld [vmem:[#allocation10 + $0x44] ss:$16 sps:$4 sm:$0xff]   ;;  %v7037_v29 = vld [vmem:[#allocation10 + $0x4c] ss:$16 sps:$4 sm:$0xff]  }
 0x253   :  { %2918 = vmatpush1.bf16.msra.mxu1 %v6262_v44  ;;  %2837 = vmatprep.subr.bf16.mxu0 %v6269_v36  ;;  %v6327_v44 = vcombine.high %v1301_v31, %v1305_v32  ;;  %v1308_v36 = vld [vmem:[#allocation8 + $0x6d0] sm:$0xff]  ;;  %v7035_v32 = vld [vmem:[#allocation10 + $0x48] ss:$16 sps:$4 sm:$0xff]  }
 0x254   :  { %2919 = vmatprep.subr.bf16.mxu1 %v6271_v37  ;;  %v1312_v37 = vld [vmem:[#allocation8 + $0x6f0] sm:$0xff] }
 0x255   :  { %v6332_v49 = vcombine.low %v1308_v36, %v1312_v37  ;;  %v7032_v31 = vld [vmem:[#allocation10 + $0x40] ss:$16 sps:$4 sm:$0xff]  }
 0x256   :  { %2838 = vmatpush1.bf16.msra.mxu0 %v6268_v51  ;;  %v6333_v51 = vcombine.high %v1308_v36, %v1312_v37  ;;  %v7049_v36 = vld [vmem:[#allocation10 + $0x8c] ss:$16 sps:$4 sm:$0xff]   ;;  %v7044_v37 = vld [vmem:[#allocation10 + $0x80] ss:$16 sps:$4 sm:$0xff]  }
 0x257   :  { %2920 = vmatpush1.bf16.msra.mxu1 %v6270_v42  ;;  %2839 = vmatprep.subr.bf16.mxu0 %v6277_v45  ;;  %v6335_v42 = vcombine.high %v1309_v38, %v1313_v39  ;;  %v1316_v45 = vld [vmem:[#allocation8 + $0x710] sm:$0xff]  ;;  %v7047_v38 = vld [vmem:[#allocation10 + $0x88] ss:$16 sps:$4 sm:$0xff]  }
 0x258   :  { %2921 = vmatprep.subr.bf16.mxu1 %v6279_v46  ;;  %v1320_v46 = vld [vmem:[#allocation8 + $0x730] sm:$0xff] }
 0x259   :  { %v6340_v58 = vcombine.low %v1316_v45, %v1320_v46  ;;  %v7052_v39 = vld [vmem:[#allocation10 + $0xa4] ss:$16 sps:$4 sm:$0xff]  }
 0x25a   :  { %2840 = vmatpush1.bf16.msra.mxu0 %v6276_v52  ;;  %v6341_v52 = vcombine.high %v1316_v45, %v1320_v46  ;;  %v7061_v45 = vld [vmem:[#allocation10 + $0xcc] ss:$16 sps:$4 sm:$0xff]   ;;  %v7056_v46 = vld [vmem:[#allocation10 + $0xc0] ss:$16 sps:$4 sm:$0xff]  }
 0x25b   :  { %2922 = vmatpush1.bf16.msra.mxu1 %v6278_v53  ;;  %2841 = vmatprep.subr.bf16.mxu0 %v6285_v54  ;;  %v6343_v53 = vcombine.high %v1317_v47, %v1321_v48  ;;  %v1324_v54 = vld [vmem:[#allocation8 + $0x750] sm:$0xff]  ;;  %v7059_v47 = vld [vmem:[#allocation10 + $0xc8] ss:$16 sps:$4 sm:$0xff]  }
 0x25c   :  { %2923 = vmatprep.subr.bf16.mxu1 %v6287_v55  ;;  %v1328_v55 = vld [vmem:[#allocation8 + $0x770] sm:$0xff] }
 0x25d   :  { %v6348_v3 = vcombine.low %v1324_v54, %v1328_v55  ;;  %v7064_v48 = vld [vmem:[#allocation10 + $0xe4] ss:$16 sps:$4 sm:$0xff]  }
 0x25e   :  { %2842 = vmatpush1.bf16.msra.mxu0 %v6284_v60  ;;  %v6349_v60 = vcombine.high %v1324_v54, %v1328_v55  ;;  %v7073_v54 = vld [vmem:[#allocation10 + $0x10c] ss:$16 sps:$4 sm:$0xff]   ;;  %v7068_v55 = vld [vmem:[#allocation10 + $0x100] ss:$16 sps:$4 sm:$0xff]  }
 0x25f   :  { %2924 = vmatpush1.bf16.msra.mxu1 %v6286_v61  ;;  %2843 = vmatprep.subr.bf16.mxu0 %v6293_v62  ;;  %v6351_v61 = vcombine.high %v1325_v56, %v1329_v57  ;;  %v1332_v62 = vld [vmem:[#allocation8 + $0x790] sm:$0xff]  ;;  %v7071_v56 = vld [vmem:[#allocation10 + $0x108] ss:$16 sps:$4 sm:$0xff]  }
 0x260   :  { %2925 = vmatprep.subr.bf16.mxu1 %v6295_v0  ;;  %v1336_v0 = vld [vmem:[#allocation8 + $0x7b0] sm:$0xff] }
 0x261   :  { %v6356_v10 = vcombine.low %v1332_v62, %v1336_v0  ;;  %v7076_v57 = vld [vmem:[#allocation10 + $0x124] ss:$16 sps:$4 sm:$0xff]  }
 0x262   :  { %2844 = vmatpush1.bf16.msra.mxu0 %v6292_v5  ;;  %v6357_v5 = vcombine.high %v1332_v62, %v1336_v0  ;;  %v7085_v62 = vld [vmem:[#allocation10 + $0x14c] ss:$16 sps:$4 sm:$0xff]   ;;  %v7080_v0 = vld [vmem:[#allocation10 + $0x140] ss:$16 sps:$4 sm:$0xff]  }
 0x263   :  { %2926 = vmatpush1.bf16.msra.mxu1 %v6294_v6  ;;  %2845 = vmatprep.subr.bf16.mxu0 %v6301_v7  ;;  %v6359_v6 = vcombine.high %v1333_v1, %v1337_v2  ;;  %v1340_v7 = vld [vmem:[#allocation8 + $0x7d0] sm:$0xff]  ;;  %v7083_v1 = vld [vmem:[#allocation10 + $0x148] ss:$16 sps:$4 sm:$0xff]  }
 0x264   :  { %2927 = vmatprep.subr.bf16.mxu1 %v6303_v30  ;;  %v1344_v30 = vld [vmem:[#allocation8 + $0x7f0] sm:$0xff] }
 0x265   :  { %v7088_v2 = vld [vmem:[#allocation10 + $0x164] ss:$16 sps:$4 sm:$0xff]  }
 0x266   :  { %2846 = vmatpush1.bf16.msra.mxu0 %v6300_v12  ;;  %v6365_v12 = vcombine.high %v1340_v7, %v1344_v30 }
 0x267   :  { %2928 = vmatpush1.bf16.msra.mxu1 %v6302_v13  ;;  %2847 = vmatprep.subr.bf16.mxu0 %v6309_v14  ;;  %v6367_v13 = vcombine.high %v1341_v8, %v1345_v9  ;;  %v6364_v14 = vcombine.low %v1340_v7, %v1344_v30  ;;  %v7097_v7 = vld [vmem:[#allocation10 + $0x18c] ss:$16 sps:$4 sm:$0xff]   ;;  %v7092_v30 = vld [vmem:[#allocation10 + $0x180] ss:$16 sps:$4 sm:$0xff]  }
 0x268   :  { %2929 = vmatprep.subr.bf16.mxu1 %v6311_v15  ;;  %v6366_v15 = vcombine.low %v1341_v8, %v1345_v9  ;;  %v7095_v8 = vld [vmem:[#allocation10 + $0x188] ss:$16 sps:$4 sm:$0xff]   ;;  %v7100_v9 = vld [vmem:[#allocation10 + $0x1a4] ss:$16 sps:$4 sm:$0xff]  }
 0x26a   :  { %2848 = vmatpush1.bf16.msra.mxu0 %v6308_v43  ;;  %v7028_v43 = vld [vmem:[#allocation10 + $0x24] ss:$16 sps:$4 sm:$0xff]  }
 0x26b   :  { %2930 = vmatpush1.bf16.msra.mxu1 %v6310_v25  ;;  %2849 = vmatprep.subr.bf16.mxu0 %v6317_v26  ;;  %v7031_v25 = vld [vmem:[#allocation10 + $0x2c] ss:$16 sps:$4 sm:$0xff]   ;;  %v7026_v26 = vld [vmem:[#allocation10 + $0x20] ss:$16 sps:$4 sm:$0xff]  }
 0x26c   :  { %2931 = vmatprep.subr.bf16.mxu1 %v6319_v27  ;;  %v7029_v27 = vld [vmem:[#allocation10 + $0x28] ss:$16 sps:$4 sm:$0xff]  }
 0x26e   :  { %2850 = vmatpush1.bf16.msra.mxu0 %v6316_v33  ;;  %v7040_v33 = vld [vmem:[#allocation10 + $0x64] ss:$16 sps:$4 sm:$0xff]  }
 0x26f   :  { %2932 = vmatpush1.bf16.msra.mxu1 %v6318_v34  ;;  %2851 = vmatprep.subr.bf16.mxu0 %v6325_v35  ;;  %v7043_v34 = vld [vmem:[#allocation10 + $0x6c] ss:$16 sps:$4 sm:$0xff]   ;;  %v7038_v35 = vld [vmem:[#allocation10 + $0x60] ss:$16 sps:$4 sm:$0xff]  }
 0x270   :  { %2933 = vmatprep.subr.bf16.mxu1 %v6327_v44  ;;  %v7046_v44 = vld [vmem:[#allocation10 + $0x84] ss:$16 sps:$4 sm:$0xff]  }
 0x272   :  { %2852 = vmatpush1.bf16.msra.mxu0 %v6324_v40  ;;  %v7055_v40 = vld [vmem:[#allocation10 + $0xac] ss:$16 sps:$4 sm:$0xff]  }
 0x273   :  { %2934 = vmatpush1.bf16.msra.mxu1 %v6326_v41  ;;  %2853 = vmatprep.subr.bf16.mxu0 %v6333_v51  ;;  %v7050_v41 = vld [vmem:[#allocation10 + $0xa0] ss:$16 sps:$4 sm:$0xff]   ;;  %v7053_v51 = vld [vmem:[#allocation10 + $0xa8] ss:$16 sps:$4 sm:$0xff]  }
 0x274   :  { %2935 = vmatprep.subr.bf16.mxu1 %v6335_v42  ;;  %v7058_v42 = vld [vmem:[#allocation10 + $0xc4] ss:$16 sps:$4 sm:$0xff]  }
 0x276   :  { %2854 = vmatpush1.bf16.msra.mxu0 %v6332_v49  ;;  %v7067_v49 = vld [vmem:[#allocation10 + $0xec] ss:$16 sps:$4 sm:$0xff]  }
 0x277   :  { %2936 = vmatpush1.bf16.msra.mxu1 %v6334_v50  ;;  %2855 = vmatprep.subr.bf16.mxu0 %v6341_v52  ;;  %v7062_v50 = vld [vmem:[#allocation10 + $0xe0] ss:$16 sps:$4 sm:$0xff]   ;;  %v7065_v52 = vld [vmem:[#allocation10 + $0xe8] ss:$16 sps:$4 sm:$0xff]  }
 0x278   :  { %2937 = vmatprep.subr.bf16.mxu1 %v6343_v53  ;;  %v7070_v53 = vld [vmem:[#allocation10 + $0x104] ss:$16 sps:$4 sm:$0xff]  }
 0x27a   :  { %2856 = vmatpush1.bf16.msra.mxu0 %v6340_v58  ;;  %v7079_v58 = vld [vmem:[#allocation10 + $0x12c] ss:$16 sps:$4 sm:$0xff]  }
 0x27b   :  { %2938 = vmatpush1.bf16.msra.mxu1 %v6342_v59  ;;  %2857 = vmatprep.subr.bf16.mxu0 %v6349_v60  ;;  %v7074_v59 = vld [vmem:[#allocation10 + $0x120] ss:$16 sps:$4 sm:$0xff]   ;;  %v7077_v60 = vld [vmem:[#allocation10 + $0x128] ss:$16 sps:$4 sm:$0xff]  }
 0x27c   :  { %2939 = vmatprep.subr.bf16.mxu1 %v6351_v61  ;;  %v7082_v61 = vld [vmem:[#allocation10 + $0x144] ss:$16 sps:$4 sm:$0xff]  }
 0x27e   :  { %2858 = vmatpush1.bf16.msra.mxu0 %v6348_v3  ;;  %v7091_v3 = vld [vmem:[#allocation10 + $0x16c] ss:$16 sps:$4 sm:$0xff]  }
 0x27f   :  { %2940 = vmatpush1.bf16.msra.mxu1 %v6350_v4  ;;  %2859 = vmatprep.subr.bf16.mxu0 %v6357_v5  ;;  %v7086_v4 = vld [vmem:[#allocation10 + $0x160] ss:$16 sps:$4 sm:$0xff]   ;;  %v7089_v5 = vld [vmem:[#allocation10 + $0x168] ss:$16 sps:$4 sm:$0xff]  }
 0x280   :  { %2941 = vmatprep.subr.bf16.mxu1 %v6359_v6  ;;  %v7094_v6 = vld [vmem:[#allocation10 + $0x184] ss:$16 sps:$4 sm:$0xff]  }
 0x282   :  { %2860 = vmatpush1.bf16.msra.mxu0 %v6356_v10  ;;  %v7103_v10 = vld [vmem:[#allocation10 + $0x1ac] ss:$16 sps:$4 sm:$0xff]  }
 0x283   :  { %2942 = vmatpush1.bf16.msra.mxu1 %v6358_v11  ;;  %2861 = vmatprep.subr.bf16.mxu0 %v6365_v12  ;;  %v7098_v11 = vld [vmem:[#allocation10 + $0x1a0] ss:$16 sps:$4 sm:$0xff]   ;;  %v7101_v12 = vld [vmem:[#allocation10 + $0x1a8] ss:$16 sps:$4 sm:$0xff]  }
 0x284   :  { %2943 = vmatprep.subr.bf16.mxu1 %v6367_v13  ;;  %v7106_v13 = vld [vmem:[#allocation10 + $0x1c4] ss:$16 sps:$4 sm:$0xff]  }
 0x286   :  { %2862 = vmatpush1.bf16.msra.mxu0 %v6364_v14  ;;  %v7109_v14 = vld [vmem:[#allocation10 + $0x1cc] ss:$16 sps:$4 sm:$0xff]  }
 0x287   :  { %2944 = vmatpush1.bf16.msra.mxu1 %v6366_v15  ;;  %4606 = vmatprep.subr.bf16.mxu0 %v7022_v16  ;;  %v7104_v15 = vld [vmem:[#allocation10 + $0x1c0] ss:$16 sps:$4 sm:$0xff]   ;;  %v7107_v16 = vld [vmem:[#allocation10 + $0x1c8] ss:$16 sps:$4 sm:$0xff]  }
 0x288   :  { %4770 = vmatprep.subr.bf16.mxu1 %v7025_v20  ;;  %v7112_v20 = vld [vmem:[#allocation10 + $0x1e4] ss:$16 sps:$4 sm:$0xff]  }
 0x289   :  { %2864 = vmatmul.mubr.bf16.vlgmr.msra.gmra.mrb[8].mxu0 %v7984_v63 }
 0x28a   :  { %2946 = vmatmul.mubr.bf16.vlgmr.msra.gmra.mrb[8].mxu1 %v7984_v63  ;;  %4607 = vmatpush1.bf16.msra.mxu0 %v7020_v23  ;;  %v7041_v63 = vld [vmem:[#allocation10 + $0x68] ss:$16 sps:$4 sm:$0xff]   ;;  %v7115_v23 = vld [vmem:[#allocation10 + $0x1ec] ss:$16 sps:$4 sm:$0xff]  }
 0x28b   :  { %4771 = vmatpush1.bf16.msra.mxu1 %v7023_v24  ;;  %4608 = vmatprep.subr.bf16.mxu0 %v7028_v43  ;;  %v7110_v24 = vld [vmem:[#allocation10 + $0x1e0] ss:$16 sps:$4 sm:$0xff]   ;;  %v7113_v43 = vld [vmem:[#allocation10 + $0x1e8] ss:$16 sps:$4 sm:$0xff]  }
 0x28c   :  { %4772 = vmatprep.subr.bf16.mxu1 %v7031_v25  ;;  %v7118_v25 = vld [vmem:[#allocation10 + $0x204] ss:$16 sps:$4 sm:$0xff]  }
 0x28e   :  { %4609 = vmatpush1.bf16.msra.mxu0 %v7026_v26  ;;  %v7121_v26 = vld [vmem:[#allocation10 + $0x20c] ss:$16 sps:$4 sm:$0xff]  }
 0x28f   :  { %4773 = vmatpush1.bf16.msra.mxu1 %v7029_v27  ;;  %4610 = vmatprep.subr.bf16.mxu0 %v7034_v28  ;;  %v7999_v27 = vld [vmem:[%s8092_s4] sm:$0xff] }
 0x290   :  { %4774 = vmatprep.subr.bf16.mxu1 %v7037_v29  ;;  %v8004_v28 = vld [vmem:[%s8093_s5] sm:$0xff]  ;;  %v2959_v29 = vrot.slane %v7999_v27, %v7952_v18 }
 0x292   :  { %4611 = vmatpush1.bf16.msra.mxu0 %v7032_v31  ;;  %v2963_v31 = vrot.slane %v7999_v27, %v7958_v21 }
 0x293   :  { %4775 = vmatpush1.bf16.msra.mxu1 %v7035_v32  ;;  %4612 = vmatprep.subr.bf16.mxu0 %v7040_v33  ;;  %v2971_v32 = vrot.slane %v7999_v27, %v7961_v22  ;;  %v3009_v33 = vrot.slane %v8004_v28, %v7952_v18 }
 0x294   :  { %4776 = vmatprep.subr.bf16.mxu1 %v7043_v34 }
 0x296   :  { %4613 = vmatpush1.bf16.msra.mxu0 %v7038_v35 }
 0x297   :  { %4777 = vmatpush1.bf16.msra.mxu1 %v7041_v63  ;;  %4614 = vmatprep.subr.bf16.mxu0 %v7046_v44  ;;  %v3013_v63 = vrot.slane %v8004_v28, %v7958_v21  ;;  %v3021_v44 = vrot.slane %v8004_v28, %v7961_v22 }
 0x298   :  { %4778 = vmatprep.subr.bf16.mxu1 %v7049_v36 }
 0x29a   :  { %4615 = vmatpush1.bf16.msra.mxu0 %v7044_v37 }
 0x29b   :  { %4779 = vmatpush1.bf16.msra.mxu1 %v7047_v38  ;;  %4616 = vmatprep.subr.bf16.mxu0 %v7052_v39 }
 0x29c   :  { %4780 = vmatprep.subr.bf16.mxu1 %v7055_v40 }
 0x29e   :  { %4617 = vmatpush1.bf16.msra.mxu0 %v7050_v41 }
 0x29f   :  { %4781 = vmatpush1.bf16.msra.mxu1 %v7053_v51  ;;  %4618 = vmatprep.subr.bf16.mxu0 %v7058_v42 }
 0x2a0   :  { %4782 = vmatprep.subr.bf16.mxu1 %v7061_v45 }
 0x2a2   :  { %4619 = vmatpush1.bf16.msra.mxu0 %v7056_v46 }
 0x2a3   :  { %4783 = vmatpush1.bf16.msra.mxu1 %v7059_v47  ;;  %4620 = vmatprep.subr.bf16.mxu0 %v7064_v48 }
 0x2a4   :  { %4784 = vmatprep.subr.bf16.mxu1 %v7067_v49 }
 0x2a6   :  { %4621 = vmatpush1.bf16.msra.mxu0 %v7062_v50 }
 0x2a7   :  { %4785 = vmatpush1.bf16.msra.mxu1 %v7065_v52  ;;  %4622 = vmatprep.subr.bf16.mxu0 %v7070_v53 }
 0x2a8   :  { %4786 = vmatprep.subr.bf16.mxu1 %v7073_v54  ;;  %v7116_v54 = vld [vmem:[#allocation10 + $0x200] ss:$16 sps:$4 sm:$0xff]  }
 0x2aa   :  { %4623 = vmatpush1.bf16.msra.mxu0 %v7068_v55  ;;  %v7119_v55 = vld [vmem:[#allocation10 + $0x208] ss:$16 sps:$4 sm:$0xff]  }
 0x2ab   :  { %4787 = vmatpush1.bf16.msra.mxu1 %v7071_v56  ;;  %4624 = vmatprep.subr.bf16.mxu0 %v7076_v57  ;;  %v7124_v57 = vld [vmem:[#allocation10 + $0x224] ss:$16 sps:$4 sm:$0xff]  }
 0x2ac   :  { %4788 = vmatprep.subr.bf16.mxu1 %v7079_v58  ;;  %v7127_v58 = vld [vmem:[#allocation10 + $0x22c] ss:$16 sps:$4 sm:$0xff]  }
 0x2ae   :  { %4625 = vmatpush1.bf16.msra.mxu0 %v7074_v59 }
 0x2af   :  { %4789 = vmatpush1.bf16.msra.mxu1 %v7077_v60  ;;  %4626 = vmatprep.subr.bf16.mxu0 %v7082_v61  ;;  %v7122_v60 = vld [vmem:[#allocation10 + $0x220] ss:$16 sps:$4 sm:$0xff]   ;;  %v7125_v61 = vld [vmem:[#allocation10 + $0x228] ss:$16 sps:$4 sm:$0xff]  }
 0x2b0   :  { %4790 = vmatprep.subr.bf16.mxu1 %v7085_v62  ;;  %v7130_v62 = vld [vmem:[#allocation10 + $0x244] ss:$16 sps:$4 sm:$0xff]  }
 0x2b2   :  { %4627 = vmatpush1.bf16.msra.mxu0 %v7080_v0  ;;  %v7133_v0 = vld [vmem:[#allocation10 + $0x24c] ss:$16 sps:$4 sm:$0xff]  }
 0x2b3   :  { %4791 = vmatpush1.bf16.msra.mxu1 %v7083_v1  ;;  %4628 = vmatprep.subr.bf16.mxu0 %v7088_v2  ;;  %v7128_v1 = vld [vmem:[#allocation10 + $0x240] ss:$16 sps:$4 sm:$0xff]   ;;  %v7131_v2 = vld [vmem:[#allocation10 + $0x248] ss:$16 sps:$4 sm:$0xff]  }
 0x2b4   :  { %4792 = vmatprep.subr.bf16.mxu1 %v7091_v3  ;;  %v7136_v3 = vld [vmem:[#allocation10 + $0x264] ss:$16 sps:$4 sm:$0xff]  }
 0x2b6   :  { %4629 = vmatpush1.bf16.msra.mxu0 %v7086_v4  ;;  %v7139_v4 = vld [vmem:[#allocation10 + $0x26c] ss:$16 sps:$4 sm:$0xff]  }
 0x2b7   :  { %4793 = vmatpush1.bf16.msra.mxu1 %v7089_v5  ;;  %4630 = vmatprep.subr.bf16.mxu0 %v7094_v6  ;;  %v7134_v5 = vld [vmem:[#allocation10 + $0x260] ss:$16 sps:$4 sm:$0xff]   ;;  %v7137_v6 = vld [vmem:[#allocation10 + $0x268] ss:$16 sps:$4 sm:$0xff]  }
 0x2b8   :  { %4794 = vmatprep.subr.bf16.mxu1 %v7097_v7  ;;  %v7142_v7 = vld [vmem:[#allocation10 + $0x284] ss:$16 sps:$4 sm:$0xff]  }
 0x2ba   :  { %4631 = vmatpush1.bf16.msra.mxu0 %v7092_v30  ;;  %v7145_v30 = vld [vmem:[#allocation10 + $0x28c] ss:$16 sps:$4 sm:$0xff]  }
 0x2bb   :  { %4795 = vmatpush1.bf16.msra.mxu1 %v7095_v8  ;;  %4632 = vmatprep.subr.bf16.mxu0 %v7100_v9  ;;  %v7140_v8 = vld [vmem:[#allocation10 + $0x280] ss:$16 sps:$4 sm:$0xff]   ;;  %v7143_v9 = vld [vmem:[#allocation10 + $0x288] ss:$16 sps:$4 sm:$0xff]  }
 0x2bc   :  { %4796 = vmatprep.subr.bf16.mxu1 %v7103_v10  ;;  %v7148_v10 = vld [vmem:[#allocation10 + $0x2a4] ss:$16 sps:$4 sm:$0xff]  }
 0x2be   :  { %4633 = vmatpush1.bf16.msra.mxu0 %v7098_v11  ;;  %v7151_v11 = vld [vmem:[#allocation10 + $0x2ac] ss:$16 sps:$4 sm:$0xff]  }
 0x2bf   :  { %4797 = vmatpush1.bf16.msra.mxu1 %v7101_v12  ;;  %4634 = vmatprep.subr.bf16.mxu0 %v7106_v13  ;;  %v7146_v12 = vld [vmem:[#allocation10 + $0x2a0] ss:$16 sps:$4 sm:$0xff]   ;;  %v7149_v13 = vld [vmem:[#allocation10 + $0x2a8] ss:$16 sps:$4 sm:$0xff]  }
 0x2c0   :  { %4798 = vmatprep.subr.bf16.mxu1 %v7109_v14  ;;  %v7154_v14 = vld [vmem:[#allocation10 + $0x2c4] ss:$16 sps:$4 sm:$0xff]  }
 0x2c2   :  { %4635 = vmatpush1.bf16.msra.mxu0 %v7104_v15  ;;  %v7157_v15 = vld [vmem:[#allocation10 + $0x2cc] ss:$16 sps:$4 sm:$0xff]  }
 0x2c3   :  { %4799 = vmatpush1.bf16.msra.mxu1 %v7107_v16  ;;  %4636 = vmatprep.subr.bf16.mxu0 %v7112_v20  ;;  %v7152_v16 = vld [vmem:[#allocation10 + $0x2c0] ss:$16 sps:$4 sm:$0xff]   ;;  %v7155_v20 = vld [vmem:[#allocation10 + $0x2c8] ss:$16 sps:$4 sm:$0xff]  }
 0x2c4   :  { %4800 = vmatprep.subr.bf16.mxu1 %v7115_v23  ;;  %v7160_v23 = vld [vmem:[#allocation10 + $0x2e4] ss:$16 sps:$4 sm:$0xff]  }
 0x2c6   :  { %4637 = vmatpush1.bf16.msra.mxu0 %v7110_v24  ;;  %v7163_v24 = vld [vmem:[#allocation10 + $0x2ec] ss:$16 sps:$4 sm:$0xff]  }
 0x2c7   :  { %4801 = vmatpush1.bf16.msra.mxu1 %v7113_v43  ;;  %4647 = vmatprep.subr.bf16.mxu0 %v7118_v25  ;;  %v7158_v43 = vld [vmem:[#allocation10 + $0x2e0] ss:$16 sps:$4 sm:$0xff]   ;;  %v7161_v25 = vld [vmem:[#allocation10 + $0x2e8] ss:$16 sps:$4 sm:$0xff]  }
 0x2c8   :  { %4811 = vmatprep.subr.bf16.mxu1 %v7121_v26  ;;  %v7166_v26 = vld [vmem:[#allocation10 + $0x304] ss:$16 sps:$4 sm:$0xff]  }
 0x2dc   :  { %v2701_v34 = vpop.f32.mrb[4].mxu0  ;;  %v8014_v35 = vpop.f32.mrb[4].mxu1 }
 0x2dd   :  { %v2996_v36 = vmul.f32 %v2959_v29, %v2701_v34  ;;  %v2703_v37 = vpop.f32.mrb[5].mxu0  ;;  %v2785_v38 = vpop.f32.mrb[5].mxu1  ;;  %v7169_v29 = vld [vmem:[#allocation10 + $0x30c] ss:$16 sps:$4 sm:$0xff]  }
 0x2de   :  { %v2997_v39 = vmul.f32 %v2963_v31, %v2703_v37  ;;  %v2999_v40 = vmul.f32 %v2971_v32, %v2785_v38  ;;  %v2705_v41 = vpop.f32.mrb[6].mxu0  ;;  %v2787_v51 = vpop.f32.mrb[6].mxu1  ;;  %v7164_v31 = vld [vmem:[#allocation10 + $0x300] ss:$16 sps:$4 sm:$0xff]   ;;  %v7167_v32 = vld [vmem:[#allocation10 + $0x308] ss:$16 sps:$4 sm:$0xff]  }
 0x2df   :  { %v3046_v42 = vadd.f32 %v3009_v33, %v2996_v36  ;;  %v2706_v45 = vpop.f32.mrb[7].mxu0  ;;  %v2788_v46 = vpop.f32.mrb[7].mxu1  ;;  %v7172_v33 = vld [vmem:[#allocation10 + $0x324] ss:$16 sps:$4 sm:$0xff]   ;;  %v7175_v34 = vld [vmem:[#allocation10 + $0x32c] ss:$16 sps:$4 sm:$0xff]  }
 0x2e0   :  { %v3047_v47 = vadd.f32 %v3013_v63, %v2997_v39  ;;  %v3049_v48 = vadd.f32 %v3021_v44, %v2999_v40  ;;  %v7170_v63 = vld [vmem:[#allocation10 + $0x320] ss:$16 sps:$4 sm:$0xff]   ;;  %v7173_v44 = vld [vmem:[#allocation10 + $0x328] ss:$16 sps:$4 sm:$0xff]   ;;  %v7178_v36 = vld [vmem:[#allocation10 + $0x344] ss:$16 sps:$4 sm:$0xff]  }
 0x2e1   :  { %v3054_v49 = vmax.f32 %v3046_v42, 0.0  ;;  %v7181_v37 = vld [vmem:[#allocation10 + $0x34c] ss:$16 sps:$4 sm:$0xff]   ;;  %v7176_v38 = vld [vmem:[#allocation10 + $0x340] ss:$16 sps:$4 sm:$0xff]  }
 0x2e2   :  { %v3055_v50 = vmax.f32 %v3047_v47, 0.0  ;;  %v3057_v52 = vmax.f32 %v3049_v48, 0.0  ;;  %v7179_v39 = vld [vmem:[#allocation10 + $0x348] ss:$16 sps:$4 sm:$0xff]   ;;  %v7184_v40 = vld [vmem:[#allocation10 + $0x364] ss:$16 sps:$4 sm:$0xff]  }
 0x2e3   :  { %v3062_v56 = vpack.c.bf16 %v3054_v49, %v3054_v49  ;;  %v7187_v41 = vld [vmem:[#allocation10 + $0x36c] ss:$16 sps:$4 sm:$0xff]   ;;  %v7182_v51 = vld [vmem:[#allocation10 + $0x360] ss:$16 sps:$4 sm:$0xff]   ;;  %v7185_v42 = vld [vmem:[#allocation10 + $0x368] ss:$16 sps:$4 sm:$0xff]   ;;  %v2967_v49 = vrot.slane %v7999_v27, %v7955_v19 }
 0x2e4   :  { %v3063_v53 = vpack.c.bf16 %v3055_v50, %v3055_v50  ;;  %v3065_v59 = vpack.c.bf16 %v3057_v52, %v3057_v52  ;;  %v7190_v45 = vld [vmem:[#allocation10 + $0x384] ss:$16 sps:$4 sm:$0xff]   ;;  %v7193_v46 = vld [vmem:[#allocation10 + $0x38c] ss:$16 sps:$4 sm:$0xff]   ;;  %v7188_v47 = vld [vmem:[#allocation10 + $0x380] ss:$16 sps:$4 sm:$0xff]  }
 0x2e5   :  { %v7191_v48 = vld [vmem:[#allocation10 + $0x388] ss:$16 sps:$4 sm:$0xff]   ;;  %v7196_v50 = vld [vmem:[#allocation10 + $0x3a4] ss:$16 sps:$4 sm:$0xff]   ;;  %v7199_v52 = vld [vmem:[#allocation10 + $0x3ac] ss:$16 sps:$4 sm:$0xff]  }
 0x2e6   :  { %4638 = vmatprep.mubr.bf16.mxu0 %v3063_v53  ;;  %4802 = vmatprep.mubr.bf16.mxu1 %v3063_v53  ;;  %v7194_v53 = vld [vmem:[#allocation10 + $0x3a0] ss:$16 sps:$4 sm:$0xff]  }
 0x2e7   :  { %4639 = vmatmul.mubr.bf16.vlgmr.msra.gmra.mrb[12].mxu0 %v3062_v56  ;;  %4803 = vmatmul.mubr.bf16.vlgmr.msra.gmra.mrb[12].mxu1 %v3062_v56  ;;  %v3017_v56 = vrot.slane %v8004_v28, %v7955_v19 }
 0x2e8   :  { %4648 = vmatpush1.bf16.msra.mxu0 %v7116_v54  ;;  %4812 = vmatpush1.bf16.msra.mxu1 %v7119_v55  ;;  %v7197_v54 = vld [vmem:[#allocation10 + $0x3a8] ss:$16 sps:$4 sm:$0xff]   ;;  %v2998_v55 = vmul.f32 %v2967_v49, %v8014_v35 }
 0x2e9   :  { %4679 = vmatprep.mubr.bf16.mxu0 %v3065_v59  ;;  %4843 = vmatprep.mubr.bf16.mxu1 %v3065_v59  ;;  %v7200_v59 = vld [vmem:[#allocation10 + $0x3c0] ss:$16 sps:$4 sm:$0xff]   ;;  %v7209_v35 = vld [vmem:[#allocation10 + $0x3e8] ss:$16 sps:$4 sm:$0xff]  }
 0x2ea   :  { %4649 = vmatprep.subr.bf16.mxu0 %v7124_v57  ;;  %4813 = vmatprep.subr.bf16.mxu1 %v7127_v58  ;;  %v7202_v57 = vld [vmem:[#allocation10 + $0x3c4] ss:$16 sps:$4 sm:$0xff]   ;;  %v7205_v58 = vld [vmem:[#allocation10 + $0x3cc] ss:$16 sps:$4 sm:$0xff]   ;;  %v7269_v49 = vld [vmem:[#allocation10 + $0x528] ss:$16 sps:$4 sm:$0xff]  }
 0x2ec   :  { %4650 = vmatpush1.bf16.msra.mxu0 %v7122_v60  ;;  %4814 = vmatpush1.bf16.msra.mxu1 %v7125_v61  ;;  %v7203_v60 = vld [vmem:[#allocation10 + $0x3c8] ss:$16 sps:$4 sm:$0xff]   ;;  %v3048_v61 = vadd.f32 %v3017_v56, %v2998_v55  ;;  %v7280_v55 = vld [vmem:[#allocation10 + $0x564] ss:$16 sps:$4 sm:$0xff]   ;;  %v7283_v56 = vld [vmem:[#allocation10 + $0x56c] ss:$16 sps:$4 sm:$0xff]  }
 0x2ed   :  { %4651 = vmatprep.subr.bf16.mxu0 %v7130_v62  ;;  %4815 = vmatprep.subr.bf16.mxu1 %v7133_v0  ;;  %v7208_v62 = vld [vmem:[#allocation10 + $0x3e4] ss:$16 sps:$4 sm:$0xff]   ;;  %v7211_v0 = vld [vmem:[#allocation10 + $0x3ec] ss:$16 sps:$4 sm:$0xff]  }
 0x2f0   :  { %4652 = vmatpush1.bf16.msra.mxu0 %v7128_v1  ;;  %4816 = vmatpush1.bf16.msra.mxu1 %v7131_v2  ;;  %v7206_v1 = vld [vmem:[#allocation10 + $0x3e0] ss:$16 sps:$4 sm:$0xff]   ;;  %v3056_v2 = vmax.f32 %v3048_v61, 0.0 }
 0x2f1   :  { %4653 = vmatprep.subr.bf16.mxu0 %v7136_v3  ;;  %4817 = vmatprep.subr.bf16.mxu1 %v7139_v4  ;;  %v7214_v3 = vld [vmem:[#allocation10 + $0x404] ss:$16 sps:$4 sm:$0xff]   ;;  %v7217_v4 = vld [vmem:[#allocation10 + $0x40c] ss:$16 sps:$4 sm:$0xff]   ;;  %v7284_v61 = vld [vmem:[#allocation10 + $0x580] ss:$16 sps:$4 sm:$0xff]  }
 0x2f4   :  { %4654 = vmatpush1.bf16.msra.mxu0 %v7134_v5  ;;  %4818 = vmatpush1.bf16.msra.mxu1 %v7137_v6  ;;  %v7212_v5 = vld [vmem:[#allocation10 + $0x400] ss:$16 sps:$4 sm:$0xff]   ;;  %v7215_v6 = vld [vmem:[#allocation10 + $0x408] ss:$16 sps:$4 sm:$0xff]  }
 0x2f5   :  { %4655 = vmatprep.subr.bf16.mxu0 %v7142_v7  ;;  %4819 = vmatprep.subr.bf16.mxu1 %v7145_v30  ;;  %v3064_v7 = vpack.c.bf16 %v3056_v2, %v3056_v2  ;;  %v7220_v30 = vld [vmem:[#allocation10 + $0x424] ss:$16 sps:$4 sm:$0xff]   ;;  %v2978_v2 = vsub.s32 5, %v7949_v17 }
 0x2f8   :  { %4656 = vmatpush1.bf16.msra.mxu0 %v7140_v8  ;;  %4820 = vmatpush1.bf16.msra.mxu1 %v7143_v9  ;;  %v7223_v8 = vld [vmem:[#allocation10 + $0x42c] ss:$16 sps:$4 sm:$0xff]   ;;  %v7218_v9 = vld [vmem:[#allocation10 + $0x420] ss:$16 sps:$4 sm:$0xff]  }
 0x2f9   :  { %4657 = vmatprep.subr.bf16.mxu0 %v7148_v10  ;;  %4821 = vmatprep.subr.bf16.mxu1 %v7151_v11  ;;  %v7221_v10 = vld [vmem:[#allocation10 + $0x428] ss:$16 sps:$4 sm:$0xff]   ;;  %v7226_v11 = vld [vmem:[#allocation10 + $0x444] ss:$16 sps:$4 sm:$0xff]  }
 0x2fc   :  { %4658 = vmatpush1.bf16.msra.mxu0 %v7146_v12  ;;  %4822 = vmatpush1.bf16.msra.mxu1 %v7149_v13  ;;  %v7229_v12 = vld [vmem:[#allocation10 + $0x44c] ss:$16 sps:$4 sm:$0xff]   ;;  %v7224_v13 = vld [vmem:[#allocation10 + $0x440] ss:$16 sps:$4 sm:$0xff]  }
 0x2fd   :  { %4659 = vmatprep.subr.bf16.mxu0 %v7154_v14  ;;  %4823 = vmatprep.subr.bf16.mxu1 %v7157_v15  ;;  %v7227_v14 = vld [vmem:[#allocation10 + $0x448] ss:$16 sps:$4 sm:$0xff]   ;;  %v7232_v15 = vld [vmem:[#allocation10 + $0x464] ss:$16 sps:$4 sm:$0xff]  }
 0x300   :  { %4660 = vmatpush1.bf16.msra.mxu0 %v7152_v16  ;;  %4824 = vmatpush1.bf16.msra.mxu1 %v7155_v20  ;;  %v7235_v16 = vld [vmem:[#allocation10 + $0x46c] ss:$16 sps:$4 sm:$0xff]   ;;  %v7230_v20 = vld [vmem:[#allocation10 + $0x460] ss:$16 sps:$4 sm:$0xff]  }
 0x301   :  { %4661 = vmatprep.subr.bf16.mxu0 %v7160_v23  ;;  %4825 = vmatprep.subr.bf16.mxu1 %v7163_v24  ;;  %v7233_v23 = vld [vmem:[#allocation10 + $0x468] ss:$16 sps:$4 sm:$0xff]   ;;  %v7238_v24 = vld [vmem:[#allocation10 + $0x484] ss:$16 sps:$4 sm:$0xff]  }
 0x304   :  { %4662 = vmatpush1.bf16.msra.mxu0 %v7158_v43  ;;  %4826 = vmatpush1.bf16.msra.mxu1 %v7161_v25  ;;  %v7241_v43 = vld [vmem:[#allocation10 + $0x48c] ss:$16 sps:$4 sm:$0xff]   ;;  %v7236_v25 = vld [vmem:[#allocation10 + $0x480] ss:$16 sps:$4 sm:$0xff]  }
 0x305   :  { %4663 = vmatprep.subr.bf16.mxu0 %v7166_v26  ;;  %4827 = vmatprep.subr.bf16.mxu1 %v7169_v29  ;;  %v7239_v26 = vld [vmem:[#allocation10 + $0x488] ss:$16 sps:$4 sm:$0xff]   ;;  %v7244_v29 = vld [vmem:[#allocation10 + $0x4a4] ss:$16 sps:$4 sm:$0xff]  }
 0x308   :  { %4664 = vmatpush1.bf16.msra.mxu0 %v7164_v31  ;;  %4828 = vmatpush1.bf16.msra.mxu1 %v7167_v32  ;;  %v7247_v31 = vld [vmem:[#allocation10 + $0x4ac] ss:$16 sps:$4 sm:$0xff]   ;;  %v7242_v32 = vld [vmem:[#allocation10 + $0x4a0] ss:$16 sps:$4 sm:$0xff]  }
 0x309   :  { %4665 = vmatprep.subr.bf16.mxu0 %v7172_v33  ;;  %4829 = vmatprep.subr.bf16.mxu1 %v7175_v34  ;;  %v7245_v33 = vld [vmem:[#allocation10 + $0x4a8] ss:$16 sps:$4 sm:$0xff]   ;;  %v7250_v34 = vld [vmem:[#allocation10 + $0x4c4] ss:$16 sps:$4 sm:$0xff]  }
 0x30c   :  { %4666 = vmatpush1.bf16.msra.mxu0 %v7170_v63  ;;  %4830 = vmatpush1.bf16.msra.mxu1 %v7173_v44  ;;  %v7253_v63 = vld [vmem:[#allocation10 + $0x4cc] ss:$16 sps:$4 sm:$0xff]   ;;  %v7248_v44 = vld [vmem:[#allocation10 + $0x4c0] ss:$16 sps:$4 sm:$0xff]  }
 0x30d   :  { %4667 = vmatprep.subr.bf16.mxu0 %v7178_v36  ;;  %4831 = vmatprep.subr.bf16.mxu1 %v7181_v37  ;;  %v7251_v36 = vld [vmem:[#allocation10 + $0x4c8] ss:$16 sps:$4 sm:$0xff]   ;;  %v7256_v37 = vld [vmem:[#allocation10 + $0x4e4] ss:$16 sps:$4 sm:$0xff]  }
 0x310   :  { %4668 = vmatpush1.bf16.msra.mxu0 %v7176_v38  ;;  %4832 = vmatpush1.bf16.msra.mxu1 %v7179_v39  ;;  %v7259_v38 = vld [vmem:[#allocation10 + $0x4ec] ss:$16 sps:$4 sm:$0xff]   ;;  %v7254_v39 = vld [vmem:[#allocation10 + $0x4e0] ss:$16 sps:$4 sm:$0xff]  }
 0x311   :  { %4669 = vmatprep.subr.bf16.mxu0 %v7184_v40  ;;  %4833 = vmatprep.subr.bf16.mxu1 %v7187_v41  ;;  %v7257_v40 = vld [vmem:[#allocation10 + $0x4e8] ss:$16 sps:$4 sm:$0xff]   ;;  %v7262_v41 = vld [vmem:[#allocation10 + $0x504] ss:$16 sps:$4 sm:$0xff]  }
 0x314   :  { %4670 = vmatpush1.bf16.msra.mxu0 %v7182_v51  ;;  %4834 = vmatpush1.bf16.msra.mxu1 %v7185_v42  ;;  %v7265_v51 = vld [vmem:[#allocation10 + $0x50c] ss:$16 sps:$4 sm:$0xff]   ;;  %v7260_v42 = vld [vmem:[#allocation10 + $0x500] ss:$16 sps:$4 sm:$0xff]  }
 0x315   :  { %4671 = vmatprep.subr.bf16.mxu0 %v7190_v45  ;;  %4835 = vmatprep.subr.bf16.mxu1 %v7193_v46  ;;  %v7263_v45 = vld [vmem:[#allocation10 + $0x508] ss:$16 sps:$4 sm:$0xff]   ;;  %v7268_v46 = vld [vmem:[#allocation10 + $0x524] ss:$16 sps:$4 sm:$0xff]  }
 0x318   :  { %4672 = vmatpush1.bf16.msra.mxu0 %v7188_v47  ;;  %4836 = vmatpush1.bf16.msra.mxu1 %v7191_v48  ;;  %v7271_v47 = vld [vmem:[#allocation10 + $0x52c] ss:$16 sps:$4 sm:$0xff]   ;;  %v7266_v48 = vld [vmem:[#allocation10 + $0x520] ss:$16 sps:$4 sm:$0xff]  }
 0x319   :  { %4673 = vmatprep.subr.bf16.mxu0 %v7196_v50  ;;  %4837 = vmatprep.subr.bf16.mxu1 %v7199_v52  ;;  %v7274_v50 = vld [vmem:[#allocation10 + $0x544] ss:$16 sps:$4 sm:$0xff]   ;;  %v7277_v52 = vld [vmem:[#allocation10 + $0x54c] ss:$16 sps:$4 sm:$0xff]  }
 0x31c   :  { %4674 = vmatpush1.bf16.msra.mxu0 %v7194_v53  ;;  %4838 = vmatpush1.bf16.msra.mxu1 %v7197_v54  ;;  %v7272_v53 = vld [vmem:[#allocation10 + $0x540] ss:$16 sps:$4 sm:$0xff]   ;;  %v7275_v54 = vld [vmem:[#allocation10 + $0x548] ss:$16 sps:$4 sm:$0xff]  }
 0x31d   :  { %4675 = vmatprep.subr.bf16.mxu0 %v7202_v57  ;;  %4839 = vmatprep.subr.bf16.mxu1 %v7205_v58  ;;  %v7278_v57 = vld [vmem:[#allocation10 + $0x560] ss:$16 sps:$4 sm:$0xff]   ;;  %v7281_v58 = vld [vmem:[#allocation10 + $0x568] ss:$16 sps:$4 sm:$0xff]  }
 0x320   :  { %4676 = vmatpush1.bf16.msra.mxu0 %v7200_v59  ;;  %4840 = vmatpush1.bf16.msra.mxu1 %v7203_v60  ;;  %v7286_v59 = vld [vmem:[#allocation10 + $0x584] ss:$16 sps:$4 sm:$0xff]   ;;  %v7289_v60 = vld [vmem:[#allocation10 + $0x58c] ss:$16 sps:$4 sm:$0xff]  }
 0x321   :  { %4677 = vmatprep.subr.bf16.mxu0 %v7208_v62  ;;  %4841 = vmatprep.subr.bf16.mxu1 %v7211_v0  ;;  %v7287_v62 = vld [vmem:[#allocation10 + $0x588] ss:$16 sps:$4 sm:$0xff]   ;;  %v7292_v0 = vld [vmem:[#allocation10 + $0x5a4] ss:$16 sps:$4 sm:$0xff]  }
 0x324   :  { %4678 = vmatpush1.bf16.msra.mxu0 %v7206_v1  ;;  %4842 = vmatpush1.bf16.msra.mxu1 %v7209_v35  ;;  %v7295_v1 = vld [vmem:[#allocation10 + $0x5ac] ss:$16 sps:$4 sm:$0xff]   ;;  %v2974_v35 = vsub.s32 4, %v7949_v17 }
 0x325   :  { %4688 = vmatprep.subr.bf16.mxu0 %v7214_v3  ;;  %4852 = vmatprep.subr.bf16.mxu1 %v7217_v4  ;;  %v2986_v3 = vsub.s32 7, %v7949_v17  ;;  %v7290_v4 = vld [vmem:[#allocation10 + $0x5a0] ss:$16 sps:$4 sm:$0xff]  }
 0x327   :  { %4680 = vmatmul.mubr.bf16.vlgmr.msra.gmra.mrb[12].mxu0 %v3064_v7  ;;  %4844 = vmatmul.mubr.bf16.vlgmr.msra.gmra.mrb[12].mxu1 %v3064_v7  ;;  %v7298_v7 = vld [vmem:[#allocation10 + $0x5c4] ss:$16 sps:$4 sm:$0xff]  }
 0x328   :  { %4689 = vmatpush1.bf16.msra.mxu0 %v7212_v5  ;;  %4853 = vmatpush1.bf16.msra.mxu1 %v7215_v6  ;;  %v7293_v5 = vld [vmem:[#allocation10 + $0x5a8] ss:$16 sps:$4 sm:$0xff]   ;;  %v2975_v6 = vrot.slane %v7999_v27, %v2974_v35 }
 0x329   :  { %4690 = vmatprep.subr.bf16.mxu0 %v7220_v30  ;;  %4854 = vmatprep.subr.bf16.mxu1 %v7223_v8  ;;  %v7301_v30 = vld [vmem:[#allocation10 + $0x5cc] ss:$16 sps:$4 sm:$0xff]   ;;  %v2979_v8 = vrot.slane %v7999_v27, %v2978_v2 }
 0x32c   :  { %4691 = vmatpush1.bf16.msra.mxu0 %v7218_v9  ;;  %4855 = vmatpush1.bf16.msra.mxu1 %v7221_v10  ;;  %v3025_v9 = vrot.slane %v8004_v28, %v2974_v35  ;;  %v2987_v10 = vrot.slane %v7999_v27, %v2986_v3  ;;  %v7332_v35 = vld [vmem:[#allocation10 + $0x680] ss:$16 sps:$4 sm:$0xff]  }
 0x32d   :  { %4692 = vmatprep.subr.bf16.mxu0 %v7226_v11  ;;  %4856 = vmatprep.subr.bf16.mxu1 %v7229_v12  ;;  %v3029_v12 = vrot.slane %v8004_v28, %v2978_v2  ;;  %v7335_v2 = vld [vmem:[#allocation10 + $0x688] ss:$16 sps:$4 sm:$0xff]  }
 0x330   :  { %4693 = vmatpush1.bf16.msra.mxu0 %v7224_v13  ;;  %4857 = vmatpush1.bf16.msra.mxu1 %v7227_v14  ;;  %v7296_v13 = vld [vmem:[#allocation10 + $0x5c0] ss:$16 sps:$4 sm:$0xff]   ;;  %v7299_v14 = vld [vmem:[#allocation10 + $0x5c8] ss:$16 sps:$4 sm:$0xff]  }
 0x331   :  { %4694 = vmatprep.subr.bf16.mxu0 %v7232_v15  ;;  %4858 = vmatprep.subr.bf16.mxu1 %v7235_v16 }
 0x334   :  { %4695 = vmatpush1.bf16.msra.mxu0 %v7230_v20  ;;  %4859 = vmatpush1.bf16.msra.mxu1 %v7233_v23  ;;  %v3037_v23 = vrot.slane %v8004_v28, %v2986_v3  ;;  %v7340_v3 = vld [vmem:[#allocation10 + $0x6a4] ss:$16 sps:$4 sm:$0xff]  }
 0x335   :  { %4696 = vmatprep.subr.bf16.mxu0 %v7238_v24  ;;  %4860 = vmatprep.subr.bf16.mxu1 %v7241_v43  ;;  %v7304_v24 = vld [vmem:[#allocation10 + $0x5e4] ss:$16 sps:$4 sm:$0xff]   ;;  %v7307_v43 = vld [vmem:[#allocation10 + $0x5ec] ss:$16 sps:$4 sm:$0xff]  }
 0x338   :  { %4697 = vmatpush1.bf16.msra.mxu0 %v7236_v25  ;;  %4861 = vmatpush1.bf16.msra.mxu1 %v7239_v26 }
 0x339   :  { %4698 = vmatprep.subr.bf16.mxu0 %v7244_v29  ;;  %4862 = vmatprep.subr.bf16.mxu1 %v7247_v31 }
 0x33c   :  { %4699 = vmatpush1.bf16.msra.mxu0 %v7242_v32  ;;  %4863 = vmatpush1.bf16.msra.mxu1 %v7245_v33 }
 0x33d   :  { %4700 = vmatprep.subr.bf16.mxu0 %v7250_v34  ;;  %4864 = vmatprep.subr.bf16.mxu1 %v7253_v63 }
 0x340   :  { %4701 = vmatpush1.bf16.msra.mxu0 %v7248_v44  ;;  %4865 = vmatpush1.bf16.msra.mxu1 %v7251_v36  ;;  %v7302_v36 = vld [vmem:[#allocation10 + $0x5e0] ss:$16 sps:$4 sm:$0xff]  }
 0x341   :  { %4702 = vmatprep.subr.bf16.mxu0 %v7256_v37  ;;  %4866 = vmatprep.subr.bf16.mxu1 %v7259_v38  ;;  %v7305_v37 = vld [vmem:[#allocation10 + $0x5e8] ss:$16 sps:$4 sm:$0xff]  }
 0x344   :  { %4703 = vmatpush1.bf16.msra.mxu0 %v7254_v39  ;;  %4867 = vmatpush1.bf16.msra.mxu1 %v7257_v40  ;;  %v7310_v40 = vld [vmem:[#allocation10 + $0x604] ss:$16 sps:$4 sm:$0xff]  }
 0x345   :  { %4704 = vmatprep.subr.bf16.mxu0 %v7262_v41  ;;  %4868 = vmatprep.subr.bf16.mxu1 %v7265_v51  ;;  %v7313_v41 = vld [vmem:[#allocation10 + $0x60c] ss:$16 sps:$4 sm:$0xff]  }
 0x348   :  { %4705 = vmatpush1.bf16.msra.mxu0 %v7260_v42  ;;  %4869 = vmatpush1.bf16.msra.mxu1 %v7263_v45 }
 0x349   :  { %4706 = vmatprep.subr.bf16.mxu0 %v7268_v46  ;;  %4870 = vmatprep.subr.bf16.mxu1 %v7271_v47  ;;  %v7308_v46 = vld [vmem:[#allocation10 + $0x600] ss:$16 sps:$4 sm:$0xff]   ;;  %v7311_v47 = vld [vmem:[#allocation10 + $0x608] ss:$16 sps:$4 sm:$0xff]  }
 0x34c   :  { %4707 = vmatpush1.bf16.msra.mxu0 %v7266_v48  ;;  %4871 = vmatpush1.bf16.msra.mxu1 %v7269_v49  ;;  %v7316_v49 = vld [vmem:[#allocation10 + $0x624] ss:$16 sps:$4 sm:$0xff]  }
 0x34d   :  { %4708 = vmatprep.subr.bf16.mxu0 %v7274_v50  ;;  %4872 = vmatprep.subr.bf16.mxu1 %v7277_v52  ;;  %v7319_v50 = vld [vmem:[#allocation10 + $0x62c] ss:$16 sps:$4 sm:$0xff]  }
 0x350   :  { %4709 = vmatpush1.bf16.msra.mxu0 %v7272_v53  ;;  %4873 = vmatpush1.bf16.msra.mxu1 %v7275_v54  ;;  %v7314_v53 = vld [vmem:[#allocation10 + $0x620] ss:$16 sps:$4 sm:$0xff]   ;;  %v7317_v54 = vld [vmem:[#allocation10 + $0x628] ss:$16 sps:$4 sm:$0xff]  }
 0x351   :  { %4710 = vmatprep.subr.bf16.mxu0 %v7280_v55  ;;  %4874 = vmatprep.subr.bf16.mxu1 %v7283_v56  ;;  %v7322_v55 = vld [vmem:[#allocation10 + $0x644] ss:$16 sps:$4 sm:$0xff]   ;;  %v7325_v56 = vld [vmem:[#allocation10 + $0x64c] ss:$16 sps:$4 sm:$0xff]  }
 0x354   :  { %4711 = vmatpush1.bf16.msra.mxu0 %v7278_v57  ;;  %4875 = vmatpush1.bf16.msra.mxu1 %v7281_v58  ;;  %v7320_v57 = vld [vmem:[#allocation10 + $0x640] ss:$16 sps:$4 sm:$0xff]   ;;  %v7323_v58 = vld [vmem:[#allocation10 + $0x648] ss:$16 sps:$4 sm:$0xff]  }
 0x355   :  { %4712 = vmatprep.subr.bf16.mxu0 %v7286_v59  ;;  %4876 = vmatprep.subr.bf16.mxu1 %v7289_v60  ;;  %v7328_v59 = vld [vmem:[#allocation10 + $0x664] ss:$16 sps:$4 sm:$0xff]   ;;  %v7331_v60 = vld [vmem:[#allocation10 + $0x66c] ss:$16 sps:$4 sm:$0xff]  }
 0x358   :  { %4713 = vmatpush1.bf16.msra.mxu0 %v7284_v61  ;;  %4877 = vmatpush1.bf16.msra.mxu1 %v7287_v62  ;;  %v7326_v61 = vld [vmem:[#allocation10 + $0x660] ss:$16 sps:$4 sm:$0xff]   ;;  %v7329_v62 = vld [vmem:[#allocation10 + $0x668] ss:$16 sps:$4 sm:$0xff]  }
 0x359   :  { %4714 = vmatprep.subr.bf16.mxu0 %v7292_v0  ;;  %4878 = vmatprep.subr.bf16.mxu1 %v7295_v1  ;;  %v7334_v0 = vld [vmem:[#allocation10 + $0x684] ss:$16 sps:$4 sm:$0xff]   ;;  %v7337_v1 = vld [vmem:[#allocation10 + $0x68c] ss:$16 sps:$4 sm:$0xff]  }
 0x35c   :  { %4715 = vmatpush1.bf16.msra.mxu0 %v7290_v4  ;;  %4879 = vmatpush1.bf16.msra.mxu1 %v7293_v5  ;;  %v2865_v11 = vpop.f32.mrb[8].mxu0  ;;  %v7343_v4 = vld [vmem:[#allocation10 + $0x6ac] ss:$16 sps:$4 sm:$0xff]   ;;  %v7338_v5 = vld [vmem:[#allocation10 + $0x6a0] ss:$16 sps:$4 sm:$0xff]  }
 0x35d   :  { %v3000_v15 = vmul.f32 %v2975_v6, %v2865_v11  ;;  %v8033_v16 = vpop.f32.mrb[8].mxu1  ;;  %v2867_v20 = vpop.f32.mrb[9].mxu0  ;;  %4716 = vmatprep.subr.bf16.mxu0 %v7298_v7  ;;  %4880 = vmatprep.subr.bf16.mxu1 %v7301_v30  ;;  %v7341_v6 = vld [vmem:[#allocation10 + $0x6a8] ss:$16 sps:$4 sm:$0xff]   ;;  %v7346_v7 = vld [vmem:[#allocation10 + $0x6c4] ss:$16 sps:$4 sm:$0xff]  }
 0x35e   :  { %v3001_v25 = vmul.f32 %v2979_v8, %v2867_v20  ;;  %v2949_v26 = vpop.f32.mrb[9].mxu1  ;;  %v2869_v29 = vpop.f32.mrb[10].mxu0  ;;  %v7349_v30 = vld [vmem:[#allocation10 + $0x6cc] ss:$16 sps:$4 sm:$0xff]   ;;  %v7344_v8 = vld [vmem:[#allocation10 + $0x6c0] ss:$16 sps:$4 sm:$0xff]  }
 0x35f   :  { %v3050_v31 = vadd.f32 %v3025_v9, %v3000_v15  ;;  %v3003_v32 = vmul.f32 %v2987_v10, %v2949_v26  ;;  %v2951_v33 = vpop.f32.mrb[10].mxu1  ;;  %v2870_v34 = vpop.f32.mrb[11].mxu0  ;;  %v7347_v9 = vld [vmem:[#allocation10 + $0x6c8] ss:$16 sps:$4 sm:$0xff]   ;;  %v7352_v10 = vld [vmem:[#allocation10 + $0x6e4] ss:$16 sps:$4 sm:$0xff]  }
 0x360   :  { %v3051_v63 = vadd.f32 %v3029_v12, %v3001_v25  ;;  %v2952_v44 = vpop.f32.mrb[11].mxu1  ;;  %4717 = vmatpush1.bf16.msra.mxu0 %v7296_v13  ;;  %4881 = vmatpush1.bf16.msra.mxu1 %v7299_v14  ;;  %v7355_v11 = vld [vmem:[#allocation10 + $0x6ec] ss:$16 sps:$4 sm:$0xff]   ;;  %v7350_v12 = vld [vmem:[#allocation10 + $0x6e0] ss:$16 sps:$4 sm:$0xff]  }
 0x361   :  { %v3058_v38 = vmax.f32 %v3050_v31, 0.0  ;;  %v3053_v39 = vadd.f32 %v3037_v23, %v3003_v32  ;;  %4718 = vmatprep.subr.bf16.mxu0 %v7304_v24  ;;  %4882 = vmatprep.subr.bf16.mxu1 %v7307_v43  ;;  %v7353_v13 = vld [vmem:[#allocation10 + $0x6e8] ss:$16 sps:$4 sm:$0xff]   ;;  %v7358_v14 = vld [vmem:[#allocation10 + $0x704] ss:$16 sps:$4 sm:$0xff]  }
 0x362   :  { %v3059_v51 = vmax.f32 %v3051_v63, 0.0  ;;  %v7361_v15 = vld [vmem:[#allocation10 + $0x70c] ss:$16 sps:$4 sm:$0xff]   ;;  %v7356_v20 = vld [vmem:[#allocation10 + $0x700] ss:$16 sps:$4 sm:$0xff]  }
 0x363   :  { %v3061_v42 = vmax.f32 %v3053_v39, 0.0  ;;  %v3066_v48 = vpack.c.bf16 %v3058_v38, %v3058_v38  ;;  %v7359_v23 = vld [vmem:[#allocation10 + $0x708] ss:$16 sps:$4 sm:$0xff]   ;;  %v7364_v24 = vld [vmem:[#allocation10 + $0x724] ss:$16 sps:$4 sm:$0xff]  }
 0x364   :  { %v3067_v45 = vpack.c.bf16 %v3059_v51, %v3059_v51  ;;  %4719 = vmatpush1.bf16.msra.mxu0 %v7302_v36  ;;  %4883 = vmatpush1.bf16.msra.mxu1 %v7305_v37  ;;  %v7367_v43 = vld [vmem:[#allocation10 + $0x72c] ss:$16 sps:$4 sm:$0xff]   ;;  %v7362_v25 = vld [vmem:[#allocation10 + $0x720] ss:$16 sps:$4 sm:$0xff]   ;;  %v7365_v26 = vld [vmem:[#allocation10 + $0x728] ss:$16 sps:$4 sm:$0xff]  }
 0x365   :  { %4729 = vmatprep.subr.bf16.mxu0 %v7310_v40  ;;  %4893 = vmatprep.subr.bf16.mxu1 %v7313_v41  ;;  %v3069_v52 = vpack.c.bf16 %v3061_v42, %v3061_v42  ;;  %v7370_v29 = vld [vmem:[#allocation10 + $0x744] ss:$16 sps:$4 sm:$0xff]   ;;  %v7373_v31 = vld [vmem:[#allocation10 + $0x74c] ss:$16 sps:$4 sm:$0xff]   ;;  %v7368_v32 = vld [vmem:[#allocation10 + $0x740] ss:$16 sps:$4 sm:$0xff]  }
 0x366   :  { %4720 = vmatprep.mubr.bf16.mxu0 %v3067_v45  ;;  %4884 = vmatprep.mubr.bf16.mxu1 %v3067_v45  ;;  %v7371_v33 = vld [vmem:[#allocation10 + $0x748] ss:$16 sps:$4 sm:$0xff]   ;;  %v7376_v34 = vld [vmem:[#allocation10 + $0x764] ss:$16 sps:$4 sm:$0xff]   ;;  %v7379_v63 = vld [vmem:[#allocation10 + $0x76c] ss:$16 sps:$4 sm:$0xff]  }
 0x367   :  { %4721 = vmatmul.mubr.bf16.vlgmr.msra.gmra.mrb[12].mxu0 %v3066_v48  ;;  %4885 = vmatmul.mubr.bf16.vlgmr.msra.gmra.mrb[12].mxu1 %v3066_v48  ;;  %v7374_v44 = vld [vmem:[#allocation10 + $0x760] ss:$16 sps:$4 sm:$0xff]   ;;  %v7377_v36 = vld [vmem:[#allocation10 + $0x768] ss:$16 sps:$4 sm:$0xff]   ;;  %v2982_v37 = vsub.s32 6, %v7949_v17 }
 0x368   :  { %4730 = vmatpush1.bf16.msra.mxu0 %v7308_v46  ;;  %4894 = vmatpush1.bf16.msra.mxu1 %v7311_v47  ;;  %v7382_v38 = vld [vmem:[#allocation10 + $0x784] ss:$16 sps:$4 sm:$0xff]   ;;  %v7385_v39 = vld [vmem:[#allocation10 + $0x78c] ss:$16 sps:$4 sm:$0xff]   ;;  %v7380_v40 = vld [vmem:[#allocation10 + $0x780] ss:$16 sps:$4 sm:$0xff]  }
 0x369   :  { %4761 = vmatprep.mubr.bf16.mxu0 %v3069_v52  ;;  %4925 = vmatprep.mubr.bf16.mxu1 %v3069_v52  ;;  %v7383_v41 = vld [vmem:[#allocation10 + $0x788] ss:$16 sps:$4 sm:$0xff]   ;;  %v2983_v51 = vrot.slane %v7999_v27, %v2982_v37  ;;  %v7388_v42 = vld [vmem:[#allocation10 + $0x7a4] ss:$16 sps:$4 sm:$0xff]   ;;  %v7391_v45 = vld [vmem:[#allocation10 + $0x7ac] ss:$16 sps:$4 sm:$0xff]   ;;  %v3033_v48 = vrot.slane %v8004_v28, %v2982_v37 }
 0x36a   :  { %4731 = vmatprep.subr.bf16.mxu0 %v7316_v49  ;;  %4895 = vmatprep.subr.bf16.mxu1 %v7319_v50  ;;  %v7386_v46 = vld [vmem:[#allocation10 + $0x7a0] ss:$16 sps:$4 sm:$0xff]   ;;  %v7389_v47 = vld [vmem:[#allocation10 + $0x7a8] ss:$16 sps:$4 sm:$0xff]   ;;  %v7394_v49 = vld [vmem:[#allocation10 + $0x7c4] ss:$16 sps:$4 sm:$0xff]  }
 0x36b   :  { %v3002_v17 = vmul.f32 %v2983_v51, %v8033_v16  ;;  %v7397_v50 = vld [vmem:[#allocation10 + $0x7cc] ss:$16 sps:$4 sm:$0xff]   ;;  %v7392_v52 = vld [vmem:[#allocation10 + $0x7c0] ss:$16 sps:$4 sm:$0xff]   ;;  %v7395_v27 = vld [vmem:[#allocation10 + $0x7c8] ss:$16 sps:$4 sm:$0xff]  }
 0x36c   :  { %4732 = vmatpush1.bf16.msra.mxu0 %v7314_v53  ;;  %4896 = vmatpush1.bf16.msra.mxu1 %v7317_v54  ;;  %v7400_v54 = vld [vmem:[#allocation10 + $0x7e4] ss:$16 sps:$4 sm:$0xff]   ;;  %v7463_v37 = vld [vmem:[#allocation11 + $0x12c] ss:$16 sps:$4 sm:$0xff]   ;;  %v7464_v51 = vld [vmem:[#allocation11 + $0x140] ss:$16 sps:$4 sm:$0xff]  }
 0x36d   :  { %4733 = vmatprep.subr.bf16.mxu0 %v7322_v55  ;;  %4897 = vmatprep.subr.bf16.mxu1 %v7325_v56  ;;  %v3052_v53 = vadd.f32 %v3033_v48, %v3002_v17  ;;  %v7403_v55 = vld [vmem:[#allocation10 + $0x7ec] ss:$16 sps:$4 sm:$0xff]   ;;  %v7398_v56 = vld [vmem:[#allocation10 + $0x7e0] ss:$16 sps:$4 sm:$0xff]   ;;  %v7406_v28 = vld [vmem:[#allocation11 + $0x4] ss:$16 sps:$4 sm:$0xff]  }
 0x36e   :  { %v7473_v17 = vld [vmem:[#allocation11 + $0x168] ss:$16 sps:$4 sm:$0xff]   ;;  %v7478_v48 = vld [vmem:[#allocation11 + $0x184] ss:$16 sps:$4 sm:$0xff]  }
 0x36f   :  { %v3060_v16 = vmax.f32 %v3052_v53, 0.0  ;;  %v7487_v53 = vld [vmem:[#allocation11 + $0x1ac] ss:$16 sps:$4 sm:$0xff]  }
 0x370   :  { %4734 = vmatpush1.bf16.msra.mxu0 %v7320_v57  ;;  %4898 = vmatpush1.bf16.msra.mxu1 %v7323_v58  ;;  %v7401_v57 = vld [vmem:[#allocation10 + $0x7e8] ss:$16 sps:$4 sm:$0xff]   ;;  %v7409_v58 = vld [vmem:[#allocation11 + $0xc] ss:$16 sps:$4 sm:$0xff]  }
 0x371   :  { %4735 = vmatprep.subr.bf16.mxu0 %v7328_v59  ;;  %4899 = vmatprep.subr.bf16.mxu1 %v7331_v60  ;;  %v7404_v59 = vld [vmem:[#allocation11] ss:$16 sps:$4 sm:$0xff]   ;;  %v7407_v60 = vld [vmem:[#allocation11 + $0x8] ss:$16 sps:$4 sm:$0xff]  }
 0x374   :  { %4736 = vmatpush1.bf16.msra.mxu0 %v7326_v61  ;;  %4900 = vmatpush1.bf16.msra.mxu1 %v7329_v62  ;;  %v3068_v61 = vpack.c.bf16 %v3060_v16, %v3060_v16  ;;  %v7412_v62 = vld [vmem:[#allocation11 + $0x24] ss:$16 sps:$4 sm:$0xff]   ;;  %v7488_v16 = vld [vmem:[#allocation11 + $0x1c0] ss:$16 sps:$4 sm:$0xff]  }
 0x375   :  { %4737 = vmatprep.subr.bf16.mxu0 %v7334_v0  ;;  %4901 = vmatprep.subr.bf16.mxu1 %v7337_v1  ;;  %v7415_v0 = vld [vmem:[#allocation11 + $0x2c] ss:$16 sps:$4 sm:$0xff]   ;;  %v7410_v1 = vld [vmem:[#allocation11 + $0x20] ss:$16 sps:$4 sm:$0xff]  }
 0x378   :  { %4738 = vmatpush1.bf16.msra.mxu0 %v7332_v35  ;;  %4902 = vmatpush1.bf16.msra.mxu1 %v7335_v2  ;;  %v7413_v35 = vld [vmem:[#allocation11 + $0x28] ss:$16 sps:$4 sm:$0xff]   ;;  %v7418_v2 = vld [vmem:[#allocation11 + $0x44] ss:$16 sps:$4 sm:$0xff]  }
 0x379   :  { %4739 = vmatprep.subr.bf16.mxu0 %v7340_v3  ;;  %4903 = vmatprep.subr.bf16.mxu1 %v7343_v4  ;;  %v7421_v3 = vld [vmem:[#allocation11 + $0x4c] ss:$16 sps:$4 sm:$0xff]   ;;  %v7416_v4 = vld [vmem:[#allocation11 + $0x40] ss:$16 sps:$4 sm:$0xff]  }
 0x37c   :  { %4740 = vmatpush1.bf16.msra.mxu0 %v7338_v5  ;;  %4904 = vmatpush1.bf16.msra.mxu1 %v7341_v6  ;;  %v7419_v5 = vld [vmem:[#allocation11 + $0x48] ss:$16 sps:$4 sm:$0xff]   ;;  %v7424_v6 = vld [vmem:[#allocation11 + $0x64] ss:$16 sps:$4 sm:$0xff]  }
 0x37d   :  { %4741 = vmatprep.subr.bf16.mxu0 %v7346_v7  ;;  %4905 = vmatprep.subr.bf16.mxu1 %v7349_v30  ;;  %v7427_v7 = vld [vmem:[#allocation11 + $0x6c] ss:$16 sps:$4 sm:$0xff]   ;;  %v7422_v30 = vld [vmem:[#allocation11 + $0x60] ss:$16 sps:$4 sm:$0xff]  }
 0x380   :  { %4742 = vmatpush1.bf16.msra.mxu0 %v7344_v8  ;;  %4906 = vmatpush1.bf16.msra.mxu1 %v7347_v9  ;;  %v7425_v8 = vld [vmem:[#allocation11 + $0x68] ss:$16 sps:$4 sm:$0xff]   ;;  %v7430_v9 = vld [vmem:[#allocation11 + $0x84] ss:$16 sps:$4 sm:$0xff]  }
 0x381   :  { %4743 = vmatprep.subr.bf16.mxu0 %v7352_v10  ;;  %4907 = vmatprep.subr.bf16.mxu1 %v7355_v11  ;;  %v7433_v10 = vld [vmem:[#allocation11 + $0x8c] ss:$16 sps:$4 sm:$0xff]   ;;  %v7428_v11 = vld [vmem:[#allocation11 + $0x80] ss:$16 sps:$4 sm:$0xff]  }
 0x384   :  { %4744 = vmatpush1.bf16.msra.mxu0 %v7350_v12  ;;  %4908 = vmatpush1.bf16.msra.mxu1 %v7353_v13  ;;  %v7431_v12 = vld [vmem:[#allocation11 + $0x88] ss:$16 sps:$4 sm:$0xff]   ;;  %v7436_v13 = vld [vmem:[#allocation11 + $0xa4] ss:$16 sps:$4 sm:$0xff]  }
 0x385   :  { %4745 = vmatprep.subr.bf16.mxu0 %v7358_v14  ;;  %4909 = vmatprep.subr.bf16.mxu1 %v7361_v15  ;;  %v7439_v14 = vld [vmem:[#allocation11 + $0xac] ss:$16 sps:$4 sm:$0xff]   ;;  %v7434_v15 = vld [vmem:[#allocation11 + $0xa0] ss:$16 sps:$4 sm:$0xff]  }
 0x388   :  { %4746 = vmatpush1.bf16.msra.mxu0 %v7356_v20  ;;  %4910 = vmatpush1.bf16.msra.mxu1 %v7359_v23  ;;  %v7437_v20 = vld [vmem:[#allocation11 + $0xa8] ss:$16 sps:$4 sm:$0xff]   ;;  %v7442_v23 = vld [vmem:[#allocation11 + $0xc4] ss:$16 sps:$4 sm:$0xff]  }
 0x389   :  { %4747 = vmatprep.subr.bf16.mxu0 %v7364_v24  ;;  %4911 = vmatprep.subr.bf16.mxu1 %v7367_v43  ;;  %v7445_v24 = vld [vmem:[#allocation11 + $0xcc] ss:$16 sps:$4 sm:$0xff]   ;;  %v7440_v43 = vld [vmem:[#allocation11 + $0xc0] ss:$16 sps:$4 sm:$0xff]  }
 0x38c   :  { %4748 = vmatpush1.bf16.msra.mxu0 %v7362_v25  ;;  %4912 = vmatpush1.bf16.msra.mxu1 %v7365_v26  ;;  %v7443_v25 = vld [vmem:[#allocation11 + $0xc8] ss:$16 sps:$4 sm:$0xff]   ;;  %v7448_v26 = vld [vmem:[#allocation11 + $0xe4] ss:$16 sps:$4 sm:$0xff]  }
 0x38d   :  { %4749 = vmatprep.subr.bf16.mxu0 %v7370_v29  ;;  %4913 = vmatprep.subr.bf16.mxu1 %v7373_v31  ;;  %v7451_v29 = vld [vmem:[#allocation11 + $0xec] ss:$16 sps:$4 sm:$0xff]   ;;  %v7446_v31 = vld [vmem:[#allocation11 + $0xe0] ss:$16 sps:$4 sm:$0xff]  }
 0x390   :  { %4750 = vmatpush1.bf16.msra.mxu0 %v7368_v32  ;;  %4914 = vmatpush1.bf16.msra.mxu1 %v7371_v33  ;;  %v7449_v32 = vld [vmem:[#allocation11 + $0xe8] ss:$16 sps:$4 sm:$0xff]   ;;  %v7454_v33 = vld [vmem:[#allocation11 + $0x104] ss:$16 sps:$4 sm:$0xff]  }
 0x391   :  { %4751 = vmatprep.subr.bf16.mxu0 %v7376_v34  ;;  %4915 = vmatprep.subr.bf16.mxu1 %v7379_v63  ;;  %v7457_v34 = vld [vmem:[#allocation11 + $0x10c] ss:$16 sps:$4 sm:$0xff]   ;;  %v7452_v63 = vld [vmem:[#allocation11 + $0x100] ss:$16 sps:$4 sm:$0xff]  }
 0x394   :  { %4752 = vmatpush1.bf16.msra.mxu0 %v7374_v44  ;;  %4916 = vmatpush1.bf16.msra.mxu1 %v7377_v36  ;;  %v7455_v44 = vld [vmem:[#allocation11 + $0x108] ss:$16 sps:$4 sm:$0xff]   ;;  %v7460_v36 = vld [vmem:[#allocation11 + $0x124] ss:$16 sps:$4 sm:$0xff]  }
 0x395   :  { %4753 = vmatprep.subr.bf16.mxu0 %v7382_v38  ;;  %4917 = vmatprep.subr.bf16.mxu1 %v7385_v39  ;;  %v7458_v38 = vld [vmem:[#allocation11 + $0x120] ss:$16 sps:$4 sm:$0xff]   ;;  %v7461_v39 = vld [vmem:[#allocation11 + $0x128] ss:$16 sps:$4 sm:$0xff]  }
 0x398   :  { %4754 = vmatpush1.bf16.msra.mxu0 %v7380_v40  ;;  %4918 = vmatpush1.bf16.msra.mxu1 %v7383_v41  ;;  %v7466_v40 = vld [vmem:[#allocation11 + $0x144] ss:$16 sps:$4 sm:$0xff]   ;;  %v7469_v41 = vld [vmem:[#allocation11 + $0x14c] ss:$16 sps:$4 sm:$0xff]  }
 0x399   :  { %4755 = vmatprep.subr.bf16.mxu0 %v7388_v42  ;;  %4919 = vmatprep.subr.bf16.mxu1 %v7391_v45  ;;  %v7467_v42 = vld [vmem:[#allocation11 + $0x148] ss:$16 sps:$4 sm:$0xff]   ;;  %v7472_v45 = vld [vmem:[#allocation11 + $0x164] ss:$16 sps:$4 sm:$0xff]  }
 0x39c   :  { %4756 = vmatpush1.bf16.msra.mxu0 %v7386_v46  ;;  %4920 = vmatpush1.bf16.msra.mxu1 %v7389_v47  ;;  %v7475_v46 = vld [vmem:[#allocation11 + $0x16c] ss:$16 sps:$4 sm:$0xff]   ;;  %v7470_v47 = vld [vmem:[#allocation11 + $0x160] ss:$16 sps:$4 sm:$0xff]  }
 0x39d   :  { %4757 = vmatprep.subr.bf16.mxu0 %v7394_v49  ;;  %4921 = vmatprep.subr.bf16.mxu1 %v7397_v50  ;;  %v7481_v49 = vld [vmem:[#allocation11 + $0x18c] ss:$16 sps:$4 sm:$0xff]   ;;  %v7476_v50 = vld [vmem:[#allocation11 + $0x180] ss:$16 sps:$4 sm:$0xff]  }
 0x3a0   :  { %4758 = vmatpush1.bf16.msra.mxu0 %v7392_v52  ;;  %4922 = vmatpush1.bf16.msra.mxu1 %v7395_v27  ;;  %v7479_v52 = vld [vmem:[#allocation11 + $0x188] ss:$16 sps:$4 sm:$0xff]   ;;  %v7484_v27 = vld [vmem:[#allocation11 + $0x1a4] ss:$16 sps:$4 sm:$0xff]  }
 0x3a1   :  { %4759 = vmatprep.subr.bf16.mxu0 %v7400_v54  ;;  %4923 = vmatprep.subr.bf16.mxu1 %v7403_v55  ;;  %v7482_v54 = vld [vmem:[#allocation11 + $0x1a0] ss:$16 sps:$4 sm:$0xff]   ;;  %v7485_v55 = vld [vmem:[#allocation11 + $0x1a8] ss:$16 sps:$4 sm:$0xff]  }
 0x3a4   :  { %4760 = vmatpush1.bf16.msra.mxu0 %v7398_v56  ;;  %4924 = vmatpush1.bf16.msra.mxu1 %v7401_v57  ;;  %v7490_v56 = vld [vmem:[#allocation11 + $0x1c4] ss:$16 sps:$4 sm:$0xff]   ;;  %v7493_v57 = vld [vmem:[#allocation11 + $0x1cc] ss:$16 sps:$4 sm:$0xff]  }
 0x3a5   :  { %5784 = vmatprep.subr.bf16.mxu0 %v7406_v28  ;;  %5866 = vmatprep.subr.bf16.mxu1 %v7409_v58  ;;  %v7491_v28 = vld [vmem:[#allocation11 + $0x1c8] ss:$16 sps:$4 sm:$0xff]   ;;  %v7496_v58 = vld [vmem:[#allocation11 + $0x1e4] ss:$16 sps:$4 sm:$0xff]  }
 0x3a7   :  { %4762 = vmatmul.mubr.bf16.vlgmr.msra.gmra.mrb[12].mxu0 %v3068_v61  ;;  %4926 = vmatmul.mubr.bf16.vlgmr.msra.gmra.mrb[12].mxu1 %v3068_v61  ;;  %v7497_v61 = vld [vmem:[#allocation11 + $0x1e8] ss:$16 sps:$4 sm:$0xff]  }
 0x3a8   :  { %5785 = vmatpush1.bf16.msra.mxu0 %v7404_v59  ;;  %5867 = vmatpush1.bf16.msra.mxu1 %v7407_v60  ;;  %v7499_v59 = vld [vmem:[#allocation11 + $0x1ec] ss:$16 sps:$4 sm:$0xff]   ;;  %v7494_v60 = vld [vmem:[#allocation11 + $0x1e0] ss:$16 sps:$4 sm:$0xff]  }
 0x3a9   :  { %5786 = vmatprep.subr.bf16.mxu0 %v7412_v62  ;;  %5868 = vmatprep.subr.bf16.mxu1 %v7415_v0  ;;  %v7502_v62 = vld [vmem:[#allocation11 + $0x204] ss:$16 sps:$4 sm:$0xff]   ;;  %v7505_v0 = vld [vmem:[#allocation11 + $0x20c] ss:$16 sps:$4 sm:$0xff]  }
 0x3ac   :  { %5787 = vmatpush1.bf16.msra.mxu0 %v7410_v1  ;;  %5869 = vmatpush1.bf16.msra.mxu1 %v7413_v35  ;;  %v4934_v1 = vld [vmem:[%s8095_s7] sm:$0xf]  ;;  %s7794_s7 = smov [#allocation13]  }
 0x3ad   :  { %5788 = vmatprep.subr.bf16.mxu0 %v7418_v2  ;;  %5870 = vmatprep.subr.bf16.mxu1 %v7421_v3  ;;  %v4960_v35 = vld [vmem:[%s8096_s8] sm:$0xf]  ;;  %v4939_v2 = vrot.slane %v4934_v1, %v7952_v18  ;;  %v4947_v3 = vrot.slane %v4934_v1, %v7955_v19  ;;  %s5958_s8 = sshll.u32 %s7794_s7, 4  ;;  %s5959_s8 = int_to_ptr.vmem [resolvable:$true] %s5958_s8 }
 0x3ae   :  { %s7728_s18 = scalar_lea.vmem %s5959_s8, 512  ;;  %p7733_p7 = scmp.lt.s32.totalorder %s5959_s8, %s5959_s8 }
 0x3af   :  { %p7729_p6 = scmp.ne.s32.totalorder %s5959_s8, %s7728_s18  ;;  %p7734_p8 = scmp.lt.s32.totalorder %s7728_s18, %s7728_s18 }
 0x3b0   :  { %5789 = vmatpush1.bf16.msra.mxu0 %v7416_v4  ;;  %5871 = vmatpush1.bf16.msra.mxu1 %v7419_v5  ;;  %v4943_v4 = vrot.slane %v4934_v1, %v7958_v21  ;;  %v4951_v5 = vrot.slane %v4934_v1, %v7961_v22  ;;  %v7542_v1 = vld [vmem:[#allocation11 + $0x2e0] ss:$16 sps:$4 sm:$0xff]  }
 0x3b1   :  { %5790 = vmatprep.subr.bf16.mxu0 %v7424_v6  ;;  %5872 = vmatprep.subr.bf16.mxu1 %v7427_v7  ;;  %v4965_v6 = vrot.slane %v4960_v35, %v7952_v18  ;;  %v4973_v7 = vrot.slane %v4960_v35, %v7955_v19  ;;  %p7735_p9 = por %p7734_p8, %p7733_p7 }
 0x3b3   :  { %p7736_p10 = pnand %p7735_p9, %p7729_p6 }
 0x3b4   :  { %5791 = vmatpush1.bf16.msra.mxu0 %v7422_v30  ;;  %5873 = vmatpush1.bf16.msra.mxu1 %v7425_v8 }
 0x3b5   :  { %5792 = vmatprep.subr.bf16.mxu0 %v7430_v9  ;;  %5874 = vmatprep.subr.bf16.mxu1 %v7433_v10  ;;  %v4969_v9 = vrot.slane %v4960_v35, %v7958_v21  ;;  %v4977_v10 = vrot.slane %v4960_v35, %v7961_v22  ;;  %v7545_v35 = vld [vmem:[#allocation11 + $0x2e8] ss:$16 sps:$4 sm:$0xff]  }
 0x3b8   :  { %5793 = vmatpush1.bf16.msra.mxu0 %v7428_v11  ;;  %5875 = vmatpush1.bf16.msra.mxu1 %v7431_v12 }
 0x3b9   :  { %5794 = vmatprep.subr.bf16.mxu0 %v7436_v13  ;;  %5876 = vmatprep.subr.bf16.mxu1 %v7439_v14 }
 0x3bc   :  { %5795 = vmatpush1.bf16.msra.mxu0 %v7434_v15  ;;  %5877 = vmatpush1.bf16.msra.mxu1 %v7437_v20 }
 0x3bd   :  { %5796 = vmatprep.subr.bf16.mxu0 %v7442_v23  ;;  %5878 = vmatprep.subr.bf16.mxu1 %v7445_v24 }
 0x3c0   :  { %5797 = vmatpush1.bf16.msra.mxu0 %v7440_v43  ;;  %5879 = vmatpush1.bf16.msra.mxu1 %v7443_v25 }
 0x3c1   :  { %5798 = vmatprep.subr.bf16.mxu0 %v7448_v26  ;;  %5880 = vmatprep.subr.bf16.mxu1 %v7451_v29 }
 0x3c4   :  { %5799 = vmatpush1.bf16.msra.mxu0 %v7446_v31  ;;  %5881 = vmatpush1.bf16.msra.mxu1 %v7449_v32 }
 0x3c5   :  { %5800 = vmatprep.subr.bf16.mxu0 %v7454_v33  ;;  %5882 = vmatprep.subr.bf16.mxu1 %v7457_v34 }
 0x3c8   :  { %5801 = vmatpush1.bf16.msra.mxu0 %v7452_v63  ;;  %5883 = vmatpush1.bf16.msra.mxu1 %v7455_v44 }
 0x3c9   :  { %5802 = vmatprep.subr.bf16.mxu0 %v7460_v36  ;;  %5884 = vmatprep.subr.bf16.mxu1 %v7463_v37  ;;  %v7500_v36 = vld [vmem:[#allocation11 + $0x200] ss:$16 sps:$4 sm:$0xff]   ;;  %v7503_v37 = vld [vmem:[#allocation11 + $0x208] ss:$16 sps:$4 sm:$0xff]  }
 0x3cc   :  { %5803 = vmatpush1.bf16.msra.mxu0 %v7458_v38  ;;  %5885 = vmatpush1.bf16.msra.mxu1 %v7461_v39  ;;  %v7508_v39 = vld [vmem:[#allocation11 + $0x224] ss:$16 sps:$4 sm:$0xff]  }
 0x3cd   :  { %5804 = vmatprep.subr.bf16.mxu0 %v7466_v40  ;;  %5886 = vmatprep.subr.bf16.mxu1 %v7469_v41  ;;  %v7511_v40 = vld [vmem:[#allocation11 + $0x22c] ss:$16 sps:$4 sm:$0xff]  }
 0x3d0   :  { %5805 = vmatpush1.bf16.msra.mxu0 %v7464_v51  ;;  %5887 = vmatpush1.bf16.msra.mxu1 %v7467_v42  ;;  %v7506_v51 = vld [vmem:[#allocation11 + $0x220] ss:$16 sps:$4 sm:$0xff]   ;;  %v7509_v42 = vld [vmem:[#allocation11 + $0x228] ss:$16 sps:$4 sm:$0xff]  }
 0x3d1   :  { %5806 = vmatprep.subr.bf16.mxu0 %v7472_v45  ;;  %5888 = vmatprep.subr.bf16.mxu1 %v7475_v46  ;;  %v7514_v45 = vld [vmem:[#allocation11 + $0x244] ss:$16 sps:$4 sm:$0xff]   ;;  %v7517_v46 = vld [vmem:[#allocation11 + $0x24c] ss:$16 sps:$4 sm:$0xff]  }
 0x3d4   :  { %5807 = vmatpush1.bf16.msra.mxu0 %v7470_v47  ;;  %5889 = vmatpush1.bf16.msra.mxu1 %v7473_v17  ;;  %v7512_v47 = vld [vmem:[#allocation11 + $0x240] ss:$16 sps:$4 sm:$0xff]   ;;  %v7515_v17 = vld [vmem:[#allocation11 + $0x248] ss:$16 sps:$4 sm:$0xff]  }
 0x3d5   :  { %5808 = vmatprep.subr.bf16.mxu0 %v7478_v48  ;;  %5890 = vmatprep.subr.bf16.mxu1 %v7481_v49  ;;  %v7520_v48 = vld [vmem:[#allocation11 + $0x264] ss:$16 sps:$4 sm:$0xff]   ;;  %v7523_v49 = vld [vmem:[#allocation11 + $0x26c] ss:$16 sps:$4 sm:$0xff]  }
 0x3d8   :  { %5809 = vmatpush1.bf16.msra.mxu0 %v7476_v50  ;;  %5891 = vmatpush1.bf16.msra.mxu1 %v7479_v52  ;;  %v7518_v50 = vld [vmem:[#allocation11 + $0x260] ss:$16 sps:$4 sm:$0xff]   ;;  %v7521_v52 = vld [vmem:[#allocation11 + $0x268] ss:$16 sps:$4 sm:$0xff]  }
 0x3d9   :  { %5810 = vmatprep.subr.bf16.mxu0 %v7484_v27  ;;  %5892 = vmatprep.subr.bf16.mxu1 %v7487_v53  ;;  %v7526_v27 = vld [vmem:[#allocation11 + $0x284] ss:$16 sps:$4 sm:$0xff]   ;;  %v7529_v53 = vld [vmem:[#allocation11 + $0x28c] ss:$16 sps:$4 sm:$0xff]  }
 0x3dc   :  { %5811 = vmatpush1.bf16.msra.mxu0 %v7482_v54  ;;  %5893 = vmatpush1.bf16.msra.mxu1 %v7485_v55  ;;  %v7524_v54 = vld [vmem:[#allocation11 + $0x280] ss:$16 sps:$4 sm:$0xff]   ;;  %v7527_v55 = vld [vmem:[#allocation11 + $0x288] ss:$16 sps:$4 sm:$0xff]  }
 0x3dd   :  { %5812 = vmatprep.subr.bf16.mxu0 %v7490_v56  ;;  %5894 = vmatprep.subr.bf16.mxu1 %v7493_v57  ;;  %v7532_v56 = vld [vmem:[#allocation11 + $0x2a4] ss:$16 sps:$4 sm:$0xff]   ;;  %v7535_v57 = vld [vmem:[#allocation11 + $0x2ac] ss:$16 sps:$4 sm:$0xff]  }
 0x3e0   :  { %5813 = vmatpush1.bf16.msra.mxu0 %v7488_v16  ;;  %5895 = vmatpush1.bf16.msra.mxu1 %v7491_v28  ;;  %v7530_v16 = vld [vmem:[#allocation11 + $0x2a0] ss:$16 sps:$4 sm:$0xff]   ;;  %v7533_v28 = vld [vmem:[#allocation11 + $0x2a8] ss:$16 sps:$4 sm:$0xff]  }
 0x3e1   :  { %5814 = vmatprep.subr.bf16.mxu0 %v7496_v58  ;;  %5896 = vmatprep.subr.bf16.mxu1 %v7499_v59  ;;  %v7538_v58 = vld [vmem:[#allocation11 + $0x2c4] ss:$16 sps:$4 sm:$0xff]   ;;  %v7541_v59 = vld [vmem:[#allocation11 + $0x2cc] ss:$16 sps:$4 sm:$0xff]  }
 0x3e4   :  { %5815 = vmatpush1.bf16.msra.mxu0 %v7494_v60  ;;  %5897 = vmatpush1.bf16.msra.mxu1 %v7497_v61  ;;  %v7536_v60 = vld [vmem:[#allocation11 + $0x2c0] ss:$16 sps:$4 sm:$0xff]   ;;  %v7539_v61 = vld [vmem:[#allocation11 + $0x2c8] ss:$16 sps:$4 sm:$0xff]  }
 0x3e5   :  { %5825 = vmatprep.subr.bf16.mxu0 %v7502_v62  ;;  %5907 = vmatprep.subr.bf16.mxu1 %v7505_v0  ;;  %v7544_v62 = vld [vmem:[#allocation11 + $0x2e4] ss:$16 sps:$4 sm:$0xff]   ;;  %v7547_v0 = vld [vmem:[#allocation11 + $0x2ec] ss:$16 sps:$4 sm:$0xff]  }
 0x47a   :  { %v4763_v30 = vpop.f32.mrb[12].mxu0  ;;  %v4927_v8 = vpop.f32.mrb[12].mxu1 }
 0x47b   :  { %v4956_v11 = vmul.f32 %v4939_v2, %v4763_v30  ;;  %v4958_v12 = vmul.f32 %v4947_v3, %v4927_v8  ;;  %v4765_v13 = vpop.f32.mrb[13].mxu0  ;;  %v4929_v14 = vpop.f32.mrb[13].mxu1  ;;  %v7550_v2 = vld [vmem:[#allocation11 + $0x304] ss:$16 sps:$4 sm:$0xff]   ;;  %v7553_v3 = vld [vmem:[#allocation11 + $0x30c] ss:$16 sps:$4 sm:$0xff]  }
 0x47c   :  { %v4957_v15 = vmul.f32 %v4943_v4, %v4765_v13  ;;  %v4959_v20 = vmul.f32 %v4951_v5, %v4929_v14  ;;  %v4767_v23 = vpop.f32.mrb[14].mxu0  ;;  %v4931_v24 = vpop.f32.mrb[14].mxu1  ;;  %v7548_v4 = vld [vmem:[#allocation11 + $0x300] ss:$16 sps:$4 sm:$0xff]   ;;  %v7551_v5 = vld [vmem:[#allocation11 + $0x308] ss:$16 sps:$4 sm:$0xff]  }
 0x47d   :  { %v4982_v43 = vadd.f32 %v4965_v6, %v4956_v11  ;;  %v8054_v25 = vadd.f32 %v4973_v7, %v4958_v12  ;;  %v4768_v26 = vpop.f32.mrb[15].mxu0  ;;  %v4932_v29 = vpop.f32.mrb[15].mxu1  ;;  %v7556_v6 = vld [vmem:[#allocation11 + $0x324] ss:$16 sps:$4 sm:$0xff]   ;;  %v7559_v7 = vld [vmem:[#allocation11 + $0x32c] ss:$16 sps:$4 sm:$0xff]  }
 0x47e   :  { %v4983_v31 = vadd.f32 %v4969_v9, %v4957_v15  ;;  %v4985_v32 = vadd.f32 %v4977_v10, %v4959_v20  ;;  %v7554_v30 = vld [vmem:[#allocation11 + $0x320] ss:$16 sps:$4 sm:$0xff]   ;;  %v7557_v8 = vld [vmem:[#allocation11 + $0x328] ss:$16 sps:$4 sm:$0xff]   ;;  %v7562_v9 = vld [vmem:[#allocation11 + $0x344] ss:$16 sps:$4 sm:$0xff]  }
 0x47f   :  { %v4986_v33 = vmax.f32 %v4982_v43, 0.0  ;;  %v7565_v10 = vld [vmem:[#allocation11 + $0x34c] ss:$16 sps:$4 sm:$0xff]   ;;  %v7560_v11 = vld [vmem:[#allocation11 + $0x340] ss:$16 sps:$4 sm:$0xff]  }
 0x480   :  { %v4987_v34 = vmax.f32 %v4983_v31, 0.0  ;;  %v4989_v63 = vmax.f32 %v4985_v32, 0.0  ;;  %v7563_v12 = vld [vmem:[#allocation11 + $0x348] ss:$16 sps:$4 sm:$0xff]   ;;  %v7568_v13 = vld [vmem:[#allocation11 + $0x364] ss:$16 sps:$4 sm:$0xff]  }
 0x481   :  { %v4990_v38 = vpack.c.bf16 %v4986_v33, %v4986_v33  ;;  %v7571_v14 = vld [vmem:[#allocation11 + $0x36c] ss:$16 sps:$4 sm:$0xff]   ;;  %v7566_v15 = vld [vmem:[#allocation11 + $0x360] ss:$16 sps:$4 sm:$0xff]   ;;  %v7569_v20 = vld [vmem:[#allocation11 + $0x368] ss:$16 sps:$4 sm:$0xff]  }
 0x482   :  { %v4991_v44 = vpack.c.bf16 %v4987_v34, %v4987_v34  ;;  %v4993_v41 = vpack.c.bf16 %v4989_v63, %v4989_v63  ;;  %v7574_v23 = vld [vmem:[#allocation11 + $0x384] ss:$16 sps:$4 sm:$0xff]   ;;  %v7577_v24 = vld [vmem:[#allocation11 + $0x38c] ss:$16 sps:$4 sm:$0xff]   ;;  %v7572_v43 = vld [vmem:[#allocation11 + $0x380] ss:$16 sps:$4 sm:$0xff]  }
 0x483   :  { %v7575_v26 = vld [vmem:[#allocation11 + $0x388] ss:$16 sps:$4 sm:$0xff]   ;;  %v7580_v29 = vld [vmem:[#allocation11 + $0x3a4] ss:$16 sps:$4 sm:$0xff]   ;;  %v7583_v31 = vld [vmem:[#allocation11 + $0x3ac] ss:$16 sps:$4 sm:$0xff]  }
 0x484   :  { %5816 = vmatprep.mubr.bf16.mxu0 %v4991_v44  ;;  %5898 = vmatprep.mubr.bf16.mxu1 %v4991_v44  ;;  %v7578_v32 = vld [vmem:[#allocation11 + $0x3a0] ss:$16 sps:$4 sm:$0xff]   ;;  %v7581_v33 = vld [vmem:[#allocation11 + $0x3a8] ss:$16 sps:$4 sm:$0xff]   ;;  %v7586_v34 = vld [vmem:[#allocation11 + $0x3c4] ss:$16 sps:$4 sm:$0xff]  }
 0x485   :  { %5817 = vmatmul.mubr.bf16.vlgmr.msra.gmra.mrb[16].mxu0 %v4990_v38  ;;  %5899 = vmatmul.mubr.bf16.vlgmr.msra.gmra.mrb[16].mxu1 %v4990_v38  ;;  %v7589_v63 = vld [vmem:[#allocation11 + $0x3cc] ss:$16 sps:$4 sm:$0xff]   ;;  %v7584_v44 = vld [vmem:[#allocation11 + $0x3c0] ss:$16 sps:$4 sm:$0xff]  }
 0x486   :  { %5826 = vmatpush1.bf16.msra.mxu0 %v7500_v36  ;;  %5908 = vmatpush1.bf16.msra.mxu1 %v7503_v37  ;;  %v7587_v36 = vld [vmem:[#allocation11 + $0x3c8] ss:$16 sps:$4 sm:$0xff]   ;;  %v7592_v37 = vld [vmem:[#allocation11 + $0x3e4] ss:$16 sps:$4 sm:$0xff]   ;;  %v7595_v38 = vld [vmem:[#allocation11 + $0x3ec] ss:$16 sps:$4 sm:$0xff]  }
 0x487   :  { %5857 = vmatprep.mubr.bf16.mxu0 %v4993_v41  ;;  %5939 = vmatprep.mubr.bf16.mxu1 %v4993_v41  ;;  %v4988_v41 = vmax.f32 %v8054_v25, 0.0 }
 0x488   :  { %5827 = vmatprep.subr.bf16.mxu0 %v7508_v39  ;;  %5909 = vmatprep.subr.bf16.mxu1 %v7511_v40  ;;  %v7590_v39 = vld [vmem:[#allocation11 + $0x3e0] ss:$16 sps:$4 sm:$0xff]   ;;  %v7593_v40 = vld [vmem:[#allocation11 + $0x3e8] ss:$16 sps:$4 sm:$0xff]  }
 0x48a   :  { %5828 = vmatpush1.bf16.msra.mxu0 %v7506_v51  ;;  %5910 = vmatpush1.bf16.msra.mxu1 %v7509_v42  ;;  %v4992_v51 = vpack.c.bf16 %v4988_v41, %v4988_v41 }
 0x48b   :  { %5829 = vmatprep.subr.bf16.mxu0 %v7514_v45  ;;  %5911 = vmatprep.subr.bf16.mxu1 %v7517_v46 }
 0x48e   :  { %5830 = vmatpush1.bf16.msra.mxu0 %v7512_v47  ;;  %5912 = vmatpush1.bf16.msra.mxu1 %v7515_v17 }
 0x48f   :  { %5831 = vmatprep.subr.bf16.mxu0 %v7520_v48  ;;  %5913 = vmatprep.subr.bf16.mxu1 %v7523_v49 }
 0x492   :  { %5832 = vmatpush1.bf16.msra.mxu0 %v7518_v50  ;;  %5914 = vmatpush1.bf16.msra.mxu1 %v7521_v52 }
 0x493   :  { %5833 = vmatprep.subr.bf16.mxu0 %v7526_v27  ;;  %5915 = vmatprep.subr.bf16.mxu1 %v7529_v53 }
 0x496   :  { %5834 = vmatpush1.bf16.msra.mxu0 %v7524_v54  ;;  %5916 = vmatpush1.bf16.msra.mxu1 %v7527_v55 }
 0x497   :  { %5835 = vmatprep.subr.bf16.mxu0 %v7532_v56  ;;  %5917 = vmatprep.subr.bf16.mxu1 %v7535_v57 }
 0x49a   :  { %5836 = vmatpush1.bf16.msra.mxu0 %v7530_v16  ;;  %5918 = vmatpush1.bf16.msra.mxu1 %v7533_v28 }
 0x49b   :  { %5837 = vmatprep.subr.bf16.mxu0 %v7538_v58  ;;  %5919 = vmatprep.subr.bf16.mxu1 %v7541_v59 }
 0x49e   :  { %5838 = vmatpush1.bf16.msra.mxu0 %v7536_v60  ;;  %5920 = vmatpush1.bf16.msra.mxu1 %v7539_v61 }
 0x49f   :  { %5839 = vmatprep.subr.bf16.mxu0 %v7544_v62  ;;  %5921 = vmatprep.subr.bf16.mxu1 %v7547_v0 }
 0x4a2   :  { %5840 = vmatpush1.bf16.msra.mxu0 %v7542_v1  ;;  %5922 = vmatpush1.bf16.msra.mxu1 %v7545_v35 }
 0x4a3   :  { %5841 = vmatprep.subr.bf16.mxu0 %v7550_v2  ;;  %5923 = vmatprep.subr.bf16.mxu1 %v7553_v3 }
 0x4a6   :  { %5842 = vmatpush1.bf16.msra.mxu0 %v7548_v4  ;;  %5924 = vmatpush1.bf16.msra.mxu1 %v7551_v5 }
 0x4a7   :  { %5843 = vmatprep.subr.bf16.mxu0 %v7556_v6  ;;  %5925 = vmatprep.subr.bf16.mxu1 %v7559_v7 }
 0x4aa   :  { %5844 = vmatpush1.bf16.msra.mxu0 %v7554_v30  ;;  %5926 = vmatpush1.bf16.msra.mxu1 %v7557_v8 }
 0x4ab   :  { %5845 = vmatprep.subr.bf16.mxu0 %v7562_v9  ;;  %5927 = vmatprep.subr.bf16.mxu1 %v7565_v10 }
 0x4ae   :  { %5846 = vmatpush1.bf16.msra.mxu0 %v7560_v11  ;;  %5928 = vmatpush1.bf16.msra.mxu1 %v7563_v12 }
 0x4af   :  { %5847 = vmatprep.subr.bf16.mxu0 %v7568_v13  ;;  %5929 = vmatprep.subr.bf16.mxu1 %v7571_v14 }
 0x4b2   :  { %5848 = vmatpush1.bf16.msra.mxu0 %v7566_v15  ;;  %5930 = vmatpush1.bf16.msra.mxu1 %v7569_v20 }
 0x4b3   :  { %5849 = vmatprep.subr.bf16.mxu0 %v7574_v23  ;;  %5931 = vmatprep.subr.bf16.mxu1 %v7577_v24 }
 0x4b6   :  { %5850 = vmatpush1.bf16.msra.mxu0 %v7572_v43  ;;  %5932 = vmatpush1.bf16.msra.mxu1 %v7575_v26 }
 0x4b7   :  { %5851 = vmatprep.subr.bf16.mxu0 %v7580_v29  ;;  %5933 = vmatprep.subr.bf16.mxu1 %v7583_v31 }
 0x4ba   :  { %5852 = vmatpush1.bf16.msra.mxu0 %v7578_v32  ;;  %5934 = vmatpush1.bf16.msra.mxu1 %v7581_v33 }
 0x4bb   :  { %5853 = vmatprep.subr.bf16.mxu0 %v7586_v34  ;;  %5935 = vmatprep.subr.bf16.mxu1 %v7589_v63 }
 0x4be   :  { %5854 = vmatpush1.bf16.msra.mxu0 %v7584_v44  ;;  %5936 = vmatpush1.bf16.msra.mxu1 %v7587_v36 }
 0x4bf   :  { %5855 = vmatprep.subr.bf16.mxu0 %v7592_v37  ;;  %5937 = vmatprep.subr.bf16.mxu1 %v7595_v38 }
 0x4c2   :  { %5856 = vmatpush1.bf16.msra.mxu0 %v7590_v39  ;;  %5938 = vmatpush1.bf16.msra.mxu1 %v7593_v40 }
 0x4c5   :  { %5858 = vmatmul.mubr.bf16.vlgmr.msra.gmra.mrb[16].mxu0 %v4992_v51  ;;  %5940 = vmatmul.mubr.bf16.vlgmr.msra.gmra.mrb[16].mxu1 %v4992_v51 }
 0x4c6   :  { %7739 = shalt.err (!%p7736_p10)
}
 0x4c7   :  { %s7740_s22 = scalar_lea.hbm %s8099_s11, 512 }
 0x4c8   :  { %p7741_p11 = scmp.ne.s32.totalorder %s8099_s11, %s7740_s22  ;;  %p7744_p12 = scmp.lt.u32.totalorder %s7740_s22, %s8099_s11 }
 0x4ca   :  { %p7746_p13 = pnand %p7744_p12, %p7741_p11 }
 0x4cc   :  { %7749 = shalt.err (!%p7746_p13)
}
 0x4cd   :  { %5961 = dma.vmem_to_hbm [thread:$0]  %s5959_s8, 512, %s8099_s11, [#allocation4]   ;;  %v5122_v25 = vld [vmem:[%s8098_s10] sm:$0xf] }
 0x4ce   :  { %v5127_v42 = vrot.slane %v5122_v25, %v7952_v18  ;;  %v5135_v45 = vrot.slane %v5122_v25, %v7955_v19  ;;  %v5131_v46 = vrot.slane %v5122_v25, %v7958_v21  ;;  %v5139_v47 = vrot.slane %v5122_v25, %v7961_v22  ;;  %s7795_s0 = smov [#allocation14]  }
 0x4cf   :  { %s5968_s15 = sshll.u32 %s7795_s0, 4  ;;  %s5969_s15 = int_to_ptr.vmem [resolvable:$true] %s5968_s15 }
 0x4d0   :  { %s7750_s10 = scalar_lea.vmem %s5969_s15, 512  ;;  %p7755_p1 = scmp.lt.s32.totalorder %s5969_s15, %s5969_s15 }
 0x4d1   :  { %p7751_p0 = scmp.ne.s32.totalorder %s5969_s15, %s7750_s10  ;;  %p7756_p2 = scmp.lt.s32.totalorder %s7750_s10, %s7750_s10 }
 0x4d3   :  { %p7757_p3 = por %p7756_p2, %p7755_p1 }
 0x4d5   :  { %p7758_p4 = pnand %p7757_p3, %p7751_p0 }
 0x598   :  { %v5859_v17 = vpop.f32.mrb[16].mxu0  ;;  %v5941_v48 = vpop.f32.mrb[16].mxu1 }
 0x599   :  { %v6756_v49 = vadd.f32 %v5859_v17, %v5127_v42  ;;  %v6758_v50 = vadd.f32 %v5941_v48, %v5135_v45  ;;  %v5861_v52 = vpop.f32.mrb[17].mxu0  ;;  %v5943_v27 = vpop.f32.mrb[17].mxu1 }
 0x59a   :  { %v6757_v53 = vadd.f32 %v5861_v52, %v5131_v46  ;;  %v6759_v54 = vadd.f32 %v5943_v27, %v5139_v47  ;;  %v5863_v55 = vpop.f32.mrb[18].mxu0  ;;  %v5945_v56 = vpop.f32.mrb[18].mxu1 }
 0x59b   :  { %5948 = vst [vmem:[#allocation14] sm:$0xff] %v6756_v49  ;;  %5950 = vst [vmem:[#allocation14 + $0x10] sm:$0xff] %v6758_v50  ;;  %v5864_v18 = vpop.f32.mrb[19].mxu0  ;;  %v5946_v19 = vpop.f32.mrb[19].mxu1 }
 0x59c   :  { %5949 = vst [vmem:[#allocation14 + $0x8] sm:$0xff] %v6757_v53  ;;  %5951 = vst [vmem:[#allocation14 + $0x18] sm:$0xff] %v6759_v54 }
 0x59d   :  { %7761 = shalt.err (!%p7758_p4)
}
 0x59e   :  { %s7762_s24 = scalar_lea.hbm %s8100_s12, 512 }
 0x59f   :  { %p7763_p5 = scmp.ne.s32.totalorder %s8100_s12, %s7762_s24  ;;  %p7766_p6 = scmp.lt.u32.totalorder %s7762_s24, %s8100_s12 }
 0x5a1   :  { %p7768_p7 = pnand %p7766_p6, %p7763_p5 }
 0x5a3   :  { %7771 = shalt.err (!%p7768_p7)
}
 0x5a4   :  { %5971 = dma.vmem_to_hbm [thread:$0]  %s5969_s15, 512, %s8100_s12, [#allocation15]  }
 0x5a5   :  { %7780 = dma.done.wait [#allocation4], 512  }
 0x5a6   :  { %7781 = vsyncadd [#allocation4], 4294966784 }
 0x5a7   :  { %7782 = dma.done.wait [#allocation15], 512  }
 0x5a8   :  { %7783 = vsyncadd [#allocation15], 4294966784 }
 0x5a9   :  { %5978 = vsyncpa [#allocation3], 1 }
 0x5aa   :  { %5979 = vsyncpa [#allocation6], 1 }
 0x5ab   :  { %5980 = vsyncpa [#allocation9], 1 }
 0x5ac   :  { %5981 = vsyncpa [#allocation12], 1 }
 0x5ad   :  { %5982 = vsyncpa [#allocation4], 1 }
 0x5ae   :  { %5983 = vsyncpa [#allocation15], 1 }

</bundles_post_ra>
